<compile_context>
chip_gen: v6e
topology: v6e:2x2x1
jax: 0.10.0
libtpu: 0.0.40
codegen_flags: <defaults>
</compile_context>

<pallas_src>
import functools

import jax
import jax.numpy as jnp
from jax.experimental import pallas as pl
from jax.experimental.pallas import tpu as pltpu


def _dropout_scale_mask(seed_i32, p, tm, hidden, layer):
    """Inverted-dropout multiplier (1/(1-p) or 0) per element, computed lazily.

    Counter-based hash (splitmix32 finalizer) from plain integer VPU ops, so it
    lowers on TPU and under interpret mode alike.  A per-layer salt makes the
    two dropout layers' keep decisions independent; the keep threshold uses the
    full 32-bit draw (no 16-bit quantization of p).
    """
    thr = jnp.uint32(min(int(p * 4294967296.0), 4294967295))
    scale = jnp.float32(1.0 / (1.0 - p))

    # Globally-unique counter per (row, feature) element across the whole grid.
    row0 = pl.program_id(0) * tm
    rows = jax.lax.broadcasted_iota(jnp.int32, (tm, hidden), 0) + row0
    cols = jax.lax.broadcasted_iota(jnp.int32, (tm, hidden), 1)
    if (hidden & (hidden - 1)) == 0:
        # power-of-two hidden: shift+or, no per-element 32-bit integer multiply
        ctr = (rows << (hidden.bit_length() - 1)) | cols
    else:
        ctr = rows * hidden + cols
    x = ctr.astype(jnp.uint32)

    # Seed / layer salt pre-mixed into one scalar (scalar-side, added once).
    salt = (seed_i32.astype(jnp.uint32) * jnp.uint32(0x9E3779B9)
            + jnp.uint32(2 * layer + 1) * jnp.uint32(0x85EBCA6B))
    x = x + salt
    x = (x ^ (x >> 16)) * jnp.uint32(0x7FEB352D)
    x = (x ^ (x >> 15)) * jnp.uint32(0x846CA68B)
    x = x ^ (x >> 16)

    return jnp.where(x >= thr, scale, jnp.float32(0.0))   # P(keep) = 1 - p


def mlp_kernel(seed_ref, z_ref, w1_ref, b1_ref, w2_ref, b2_ref, w3_ref, b3_ref,
               o_ref, *, p, tm, hidden, compute_dtype):
    apply_dropout = 0.0 < p < 1.0
    drop_all = p >= 1.0

    # z streams from HBM as f32 (no wrapper-side astype pass); the narrowing
    # cast happens here on the VPU, hidden under the DMA / MXU work.
    z = z_ref[...].astype(compute_dtype)

    # layer 1: Linear(-1 -> hidden) + ReLU + dropout   (f32 MXU accumulation)
    h = jnp.dot(z, w1_ref[...], preferred_element_type=jnp.float32) + b1_ref[...]
    h = jnp.maximum(h, 0.0)
    if apply_dropout:
        # Mask generated at point of use: no [tm, hidden] f32 mask stays live
        # across a matmul, so no vreg spill/reload.
        h = h * _dropout_scale_mask(seed_ref[0], p, tm, hidden, layer=0)
    elif drop_all:
        h = jnp.zeros_like(h)

    # layer 2: Linear(hidden -> hidden) + ReLU + dropout
    h = jnp.dot(h.astype(compute_dtype), w2_ref[...],
                preferred_element_type=jnp.float32) + b2_ref[...]
    h = jnp.maximum(h, 0.0)
    if apply_dropout:
        h = h * _dropout_scale_mask(seed_ref[0], p, tm, hidden, layer=1)
    elif drop_all:
        h = jnp.zeros_like(h)

    # layer 3: Linear(hidden -> num_classes), no activation
    out = jnp.dot(h.astype(compute_dtype), w3_ref[...],
                  preferred_element_type=jnp.float32) + b3_ref[...]
    o_ref[...] = out.astype(o_ref.dtype)


def linear_classifier_forward(z, params, *, dropout_p, seed, tm_max=2048,
                              compute_dtype=jnp.bfloat16):
    """Fused MLP forward.  z: [N, F] float32.  Returns [N, num_classes] f32."""
    w1, b1, w2, b2, w3, b3 = params
    N, f_in = z.shape
    hidden = w1.shape[1]
    num_classes = w3.shape[1]

    # --- tiling --------------------------------------------------------------
    # 1-2 grid steps for small N (per-step pipeline overhead ~0.35 us); for
    # large N cap the tile at tm_max rows and round the tile count up to an
    # even number so the "parallel" row axis splits evenly across v7x's two
    # TensorCores.  The last block may be partial: Pallas masks the edge-block
    # reads and discards out-of-bounds writes, and there are no cross-row
    # reductions, so no wrapper-side pad / slice pass is needed.
    if N <= tm_max:
        n_tiles = 1
    else:
        n_tiles = (N + tm_max - 1) // tm_max
        n_tiles += n_tiles % 2                        # even split for v7x
    tm_eff = -(-N // n_tiles)                         # ceil(N / n_tiles)
    tm_eff = max(16, ((tm_eff + 15) // 16) * 16)      # 16-sublane (bf16) align
    n_tiles = (N + tm_eff - 1) // tm_eff

    # --- operand dtypes ------------------------------------------------------
    # z stays f32 in HBM (cast inside the kernel); only the tiny weights are
    # pre-narrowed.  Biases stay f32 (added to the f32 accumulator; v5e-safe).
    w1_c, w2_c, w3_c = (w.astype(compute_dtype) for w in (w1, w2, w3))
    b1_f, b2_f, b3_f = (b.astype(jnp.float32) for b in (b1, b2, b3))

    seed_arr = jnp.asarray([seed], dtype=jnp.int32)
    kernel = functools.partial(mlp_kernel, p=float(dropout_p), tm=tm_eff,
                               hidden=hidden, compute_dtype=compute_dtype)

    grid_spec = pltpu.PrefetchScalarGridSpec(
        num_scalar_prefetch=1,
        grid=(n_tiles,),
        in_specs=[
            pl.BlockSpec((tm_eff, f_in), lambda i, seed: (i, 0)),        # z (f32)
            # Constant index_maps: weights fetched once, VMEM resident.
            # TODO(synk): at large hidden, add pipeline_mode=pl.Buffered(1)
            # here and set vmem_limit_bytes (v7x has half the VMEM of v6e).
            pl.BlockSpec((f_in, hidden), lambda i, seed: (0, 0)),        # w1
            pl.BlockSpec((1, hidden), lambda i, seed: (0, 0)),           # b1
            pl.BlockSpec((hidden, hidden), lambda i, seed: (0, 0)),      # w2
            pl.BlockSpec((1, hidden), lambda i, seed: (0, 0)),           # b2
            pl.BlockSpec((hidden, num_classes), lambda i, seed: (0, 0)), # w3
            pl.BlockSpec((1, num_classes), lambda i, seed: (0, 0)),      # b3
        ],
        # num_classes=8 output kept unpadded: padding to 128 lanes would 16x
        # the write bytes on a read-bound kernel; large tm batches the stores.
        out_specs=pl.BlockSpec((tm_eff, num_classes), lambda i, seed: (i, 0)),
    )

    flops = 2 * N * (f_in * hidden + hidden * hidden + hidden * num_classes)
    bytes_accessed = (
        N * f_in * 4                                   # z streamed as f32
        + sum(a.size * a.dtype.itemsize
              for a in (w1_c, w2_c, w3_c, b1_f, b2_f, b3_f))
        + N * num_classes * 4)                         # f32 output
    cost = pl.CostEstimate(flops=flops, transcendentals=0,
                           bytes_accessed=bytes_accessed)

    return pl.pallas_call(
        kernel,
        out_shape=jax.ShapeDtypeStruct((N, num_classes), jnp.float32),
        grid_spec=grid_spec,
        compiler_params=pltpu.CompilerParams(
            # Rows are independent -> let v7x shard the loop over its 2 TCs.
            dimension_semantics=("parallel",)),
        cost_estimate=cost,
    )(seed_arr, z, w1_c, b1_f, w2_c, b2_f, w3_c, b3_f)


def reference_forward(z, params):
    """Pure-JAX reference (dropout disabled, i.e. eval mode)."""
    w1, b1, w2, b2, w3, b3 = params
    h = jnp.maximum(z @ w1 + b1, 0.0)
    h = jnp.maximum(h @ w2 + b2, 0.0)
    return h @ w3 + b3


def init_params(key, in_dim, hidden_dim, num_classes):
    """Deterministic Glorot-uniform-ish init (shapes match the torch module)."""
    ks = jax.random.split(key, 6)

    def glorot(k, fan_in, fan_out):
        lim = (6.0 / (fan_in + fan_out)) ** 0.5
        return jax.random.uniform(k, (fan_in, fan_out), jnp.float32, -lim, lim)

    w1 = glorot(ks[0], in_dim, hidden_dim)
    b1 = jax.random.uniform(ks[1], (1, hidden_dim), jnp.float32, -0.1, 0.1)
    w2 = glorot(ks[2], hidden_dim, hidden_dim)
    b2 = jax.random.uniform(ks[3], (1, hidden_dim), jnp.float32, -0.1, 0.1)
    w3 = glorot(ks[4], hidden_dim, num_classes)
    b3 = jax.random.uniform(ks[5], (1, num_classes), jnp.float32, -0.1, 0.1)
    return (w1, b1, w2, b2, w3, b3)


if __name__ == "__main__":
    # Small, MLP-consistent shapes: N edges x in_dim features.
    N, IN_DIM, HIDDEN, NUM_CLASSES = 2500, 32, 32, 8
    DROPOUT_P = 0.5  # torch F.dropout defaults to training=True in the module

    key = jax.random.PRNGKey(0)
    k_x, k_p = jax.random.split(key)
    z = jax.random.normal(k_x, (N, IN_DIM), dtype=jnp.float32)
    params = init_params(k_p, IN_DIM, HIDDEN, NUM_CLASSES)
    ref = reference_forward(z, params)

    # 1) correctness: f32 compute path, dropout off
    out_f32 = jax.block_until_ready(
        linear_classifier_forward(z, params, dropout_p=0.0, seed=0,
                                  compute_dtype=jnp.float32))
    assert out_f32.shape == (N, NUM_CLASSES)
    assert jnp.allclose(out_f32, ref, atol=2e-3, rtol=2e-3), "f32 mismatch vs ref"

    # 2) correctness: bf16 streamed-compute path, dropout off (relaxed tol)
    out_bf16 = jax.block_until_ready(
        linear_classifier_forward(z, params, dropout_p=0.0, seed=0))
    assert out_bf16.shape == (N, NUM_CLASSES)
    assert jnp.allclose(out_bf16, ref, atol=1e-1, rtol=5e-2), "bf16 mismatch vs ref"

    # 3) training-mode run (dropout on, bf16 path)
    out = jax.block_until_ready(
        linear_classifier_forward(z, params, dropout_p=DROPOUT_P, seed=1234))
    assert out.shape == (N, NUM_CLASSES) and out.dtype == jnp.float32
    assert bool(jnp.all(jnp.isfinite(out)))
    print("KERNEL_OK")
</pallas_src>

<mosaic_0001>
module attributes {stable_mosaic.version = 11 : i64} {
  func.func @mlp_kernel(%arg0: i32, %arg1: memref<1xi32, #tpu.memory_space<smem>>, %arg2: memref<1264x32xf32, #tpu.memory_space<vmem>>, %arg3: memref<32x32xf32, #tpu.memory_space<vmem>>, %arg4: memref<1x32xf32, #tpu.memory_space<vmem>>, %arg5: memref<32x32xf32, #tpu.memory_space<vmem>>, %arg6: memref<1x32xf32, #tpu.memory_space<vmem>>, %arg7: memref<32x8xf32, #tpu.memory_space<vmem>>, %arg8: memref<1x8xf32, #tpu.memory_space<vmem>>, %arg9: memref<1264x8xf32, #tpu.memory_space<vmem>>) attributes {dimension_semantics = [#tpu.dimension_semantics<parallel>], iteration_bounds = array<i64: 2>, scalar_prefetch = 1 : i64, scratch_operands = 0 : i64, tpu.core_type = #tpu.core_type<tc>, window_params = [{transform_indices = @transform_0, window_bounds = array<i64: 1264, 32>}, {pipeline_mode = #tpu.pipeline_mode<synchronous>, transform_indices = @transform_1, window_bounds = array<i64: 32, 32>}, {pipeline_mode = #tpu.pipeline_mode<synchronous>, transform_indices = @transform_2, window_bounds = array<i64: 1, 32>}, {pipeline_mode = #tpu.pipeline_mode<synchronous>, transform_indices = @transform_3, window_bounds = array<i64: 32, 32>}, {pipeline_mode = #tpu.pipeline_mode<synchronous>, transform_indices = @transform_4, window_bounds = array<i64: 1, 32>}, {pipeline_mode = #tpu.pipeline_mode<synchronous>, transform_indices = @transform_5, window_bounds = array<i64: 32, 8>}, {pipeline_mode = #tpu.pipeline_mode<synchronous>, transform_indices = @transform_6, window_bounds = array<i64: 1, 8>}, {transform_indices = @transform_7, window_bounds = array<i64: 1264, 8>}]} {
    %c0 = arith.constant 0 : index
    %c0_0 = arith.constant 0 : index
    %0 = vector.load %arg2[%c0, %c0_0] : memref<1264x32xf32, #tpu.memory_space<vmem>>, vector<1264x32xf32>
    %c0_1 = arith.constant 0 : index
    %c0_2 = arith.constant 0 : index
    %1 = vector.load %arg3[%c0_1, %c0_2] : memref<32x32xf32, #tpu.memory_space<vmem>>, vector<32x32xf32>
    %cst = arith.constant dense<0.000000e+00> : vector<1264x32xf32>
    %2 = tpu.matmul %0, %1, %cst {dimension_numbers = #tpu.dot_dimension_numbers<[1], [0], [0], [1], [0, 0, 1, 1], [], []>} : vector<1264x32xf32>, vector<32x32xf32>, vector<1264x32xf32> -> vector<1264x32xf32>
    %c0_3 = arith.constant 0 : index
    %c0_4 = arith.constant 0 : index
    %3 = vector.load %arg4[%c0_3, %c0_4] : memref<1x32xf32, #tpu.memory_space<vmem>>, vector<1x32xf32>
    %4 = vector.broadcast %3 : vector<1x32xf32> to vector<1264x32xf32>
    %5 = arith.addf %2, %4 : vector<1264x32xf32>
    %cst_5 = arith.constant 0.000000e+00 : f32
    %6 = vector.broadcast %cst_5 : f32 to vector<1264x32xf32>
    %7 = arith.maximumf %5, %6 : vector<1264x32xf32>
    %c0_6 = arith.constant 0 : index
    %c0_7 = arith.constant 0 : index
    %8 = vector.load %arg5[%c0_6, %c0_7] : memref<32x32xf32, #tpu.memory_space<vmem>>, vector<32x32xf32>
    %cst_8 = arith.constant dense<0.000000e+00> : vector<1264x32xf32>
    %9 = tpu.matmul %7, %8, %cst_8 {dimension_numbers = #tpu.dot_dimension_numbers<[1], [0], [0], [1], [0, 0, 1, 1], [], []>} : vector<1264x32xf32>, vector<32x32xf32>, vector<1264x32xf32> -> vector<1264x32xf32>
    %c0_9 = arith.constant 0 : index
    %c0_10 = arith.constant 0 : index
    %10 = vector.load %arg6[%c0_9, %c0_10] : memref<1x32xf32, #tpu.memory_space<vmem>>, vector<1x32xf32>
    %11 = vector.broadcast %10 : vector<1x32xf32> to vector<1264x32xf32>
    %12 = arith.addf %9, %11 : vector<1264x32xf32>
    %cst_11 = arith.constant 0.000000e+00 : f32
    %13 = vector.broadcast %cst_11 : f32 to vector<1264x32xf32>
    %14 = arith.maximumf %12, %13 : vector<1264x32xf32>
    %c0_12 = arith.constant 0 : index
    %c0_13 = arith.constant 0 : index
    %15 = vector.load %arg7[%c0_12, %c0_13] : memref<32x8xf32, #tpu.memory_space<vmem>>, vector<32x8xf32>
    %cst_14 = arith.constant dense<0.000000e+00> : vector<1264x8xf32>
    %16 = tpu.matmul %14, %15, %cst_14 {dimension_numbers = #tpu.dot_dimension_numbers<[1], [0], [0], [1], [0, 0, 1, 1], [], []>} : vector<1264x32xf32>, vector<32x8xf32>, vector<1264x8xf32> -> vector<1264x8xf32>
    %c0_15 = arith.constant 0 : index
    %c0_16 = arith.constant 0 : index
    %17 = vector.load %arg8[%c0_15, %c0_16] : memref<1x8xf32, #tpu.memory_space<vmem>>, vector<1x8xf32>
    %18 = vector.broadcast %17 : vector<1x8xf32> to vector<1264x8xf32>
    %19 = arith.addf %16, %18 : vector<1264x8xf32>
    %c0_17 = arith.constant 0 : index
    %c0_18 = arith.constant 0 : index
    %20 = vector.load %arg9[%c0_17, %c0_18] : memref<1264x8xf32, #tpu.memory_space<vmem>>, vector<1264x8xf32>
    tpu.vector_store %arg9[%c0_17, %c0_18], %19 {strides = array<i32>} : memref<1264x8xf32, #tpu.memory_space<vmem>>, vector<1264x8xf32>,
    return
  }
  func.func @transform_0(%arg0: i32, %arg1: memref<1xi32, #tpu.memory_space<smem>>) -> (i32, i32) {
    %c0_i32 = arith.constant 0 : i32
    %c0_i32_0 = arith.constant 0 : i32
    return %arg0, %c0_i32 : i32, i32
  }
  func.func @transform_1(%arg0: i32, %arg1: memref<1xi32, #tpu.memory_space<smem>>) -> (i32, i32) {
    %c0_i32 = arith.constant 0 : i32
    %c0_i32_0 = arith.constant 0 : i32
    %c0_i32_1 = arith.constant 0 : i32
    return %c0_i32, %c0_i32_0 : i32, i32
  }
  func.func @transform_2(%arg0: i32, %arg1: memref<1xi32, #tpu.memory_space<smem>>) -> (i32, i32) {
    %c0_i32 = arith.constant 0 : i32
    %c0_i32_0 = arith.constant 0 : i32
    %c0_i32_1 = arith.constant 0 : i32
    return %c0_i32, %c0_i32_0 : i32, i32
  }
  func.func @transform_3(%arg0: i32, %arg1: memref<1xi32, #tpu.memory_space<smem>>) -> (i32, i32) {
    %c0_i32 = arith.constant 0 : i32
    %c0_i32_0 = arith.constant 0 : i32
    %c0_i32_1 = arith.constant 0 : i32
    return %c0_i32, %c0_i32_0 : i32, i32
  }
  func.func @transform_4(%arg0: i32, %arg1: memref<1xi32, #tpu.memory_space<smem>>) -> (i32, i32) {
    %c0_i32 = arith.constant 0 : i32
    %c0_i32_0 = arith.constant 0 : i32
    %c0_i32_1 = arith.constant 0 : i32
    return %c0_i32, %c0_i32_0 : i32, i32
  }
  func.func @transform_5(%arg0: i32, %arg1: memref<1xi32, #tpu.memory_space<smem>>) -> (i32, i32) {
    %c0_i32 = arith.constant 0 : i32
    %c0_i32_0 = arith.constant 0 : i32
    %c0_i32_1 = arith.constant 0 : i32
    return %c0_i32, %c0_i32_0 : i32, i32
  }
  func.func @transform_6(%arg0: i32, %arg1: memref<1xi32, #tpu.memory_space<smem>>) -> (i32, i32) {
    %c0_i32 = arith.constant 0 : i32
    %c0_i32_0 = arith.constant 0 : i32
    %c0_i32_1 = arith.constant 0 : i32
    return %c0_i32, %c0_i32_0 : i32, i32
  }
  func.func @transform_7(%arg0: i32, %arg1: memref<1xi32, #tpu.memory_space<smem>>) -> (i32, i32) {
    %c0_i32 = arith.constant 0 : i32
    %c0_i32_0 = arith.constant 0 : i32
    return %arg0, %c0_i32 : i32, i32
  }
}

</mosaic_0001>

<bundles_post_ra>
// kernel: tpu_custom_call.1
= control target key start
LH: loop header
LB: loop body
LE: loop exit
PB: predicated region body
PF: predicated region fallthrough
CT: control target
= control target key end

     0   :  { %s7378_s26 = smov 0   ;;  %s7380_s27 = smov 0   ;;  %s9348_s0 = inlined_call_operand.<no memory space> [shape: s32[1], index: 0, kind: input, shape index: {}]   ;;  %s9349_s1 = inlined_call_operand.vmem [shape: f32[2500,32], index: 1, kind: input, shape index: {}]   ;;  %s9350_s2 = inlined_call_operand.vmem [shape: f32[32,32], index: 2, kind: input, shape index: {}]   ;;  %s9351_s3 = inlined_call_operand.vmem [shape: f32[1,32], index: 3, kind: input, shape index: {}]   ;;  %s9352_s4 = inlined_call_operand.vmem [shape: f32[32,32], index: 4, kind: input, shape index: {}]   ;;  %s9353_s5 = inlined_call_operand.vmem [shape: f32[1,32], index: 5, kind: input, shape index: {}]   ;;  %s9354_s6 = inlined_call_operand.vmem [shape: f32[32,8], index: 6, kind: input, shape index: {}]   ;;  %s9355_s7 = inlined_call_operand.vmem [shape: f32[1,8], index: 7, kind: input, shape index: {}]   ;;  %s9356_s8 = inlined_call_operand.vmem [shape: f32[2500,8], index: 8, kind: output, shape index: {}]  }
   0x1   :  { %s7382_s28 = smov 0  }
   0x2 LB: > { %s7391_s29 = sadd.s32 4294967295, %s7299_s28   ;;  %s7393_s30 = sadd.s32 1, %s7299_s28   ;;  %s7299_s28 = sphi %s7382_s28, %s9401_s28   ;;  %s7295_s27 = sphi %s7380_s27, %s9400_s27   ;;  %s7291_s26 = sphi %s7378_s26, %s9399_s26  }
   0x3   : > { %s175_s9 = ssub.s32 %s7299_s28, %s7393_s30  ;;  %s178_s10 = sadd.s32 1, %s7295_s27 }
   0x4   : > { %p176_p0 = scmp.eq.s32.totalorder %s175_s9, 0  ;;  %p188_p1 = scmp.ne.s32.totalorder %s7295_s27, %s7291_s26 }
   0x5   : > { %p189_p2 = scmp.eq.s32.totalorder %s7391_s29, 1  ;;  %p5427_p3 = scmp.ge.s32.totalorder %s7299_s28, 1 }
   0x6   : > { %s7401_s11 = scalar_select %p176_p0, %s7295_s27, %s178_s10  }
   0x7   : > { %p7403_p4 = por %p189_p2, %p188_p1  ;;  %p248_p5 = scmp.lt.s32.totalorder %s7299_s28, 3 }
   0x9   : > { %p249_p6 = pnand %p5427_p3, %p248_p5 }
   0xb   : > { %252 = sbr.rel (%p249_p6) target bundleno = 1000 (0x3e8), region = 48 }
  0x10   : > { %v463_v0 = vld [vmem:[%s9350_s2 + $0x18] sm:$0xff]  ;;  %v462_v1 = vld [vmem:[%s9350_s2 + $0x10] sm:$0xff]  ;;  %s7414_s17 = smul.u32 158, %s7391_s29  ;;  %v461_v2 = vld [vmem:[%s9350_s2 + $0x8] sm:$0xff]  ;;  %vm471_vm0 = vcmask 261120   ;;  %s280_s19 = sand.u32 1, %s7291_s26  }
  0x11   : > { %6410 = vmatprep.subr.mxu0 %v463_v0  ;;  %7145 = vmatprep.subr.mxu1 %v463_v0  ;;  %v460_v3 = vld [vmem:[%s9350_s2] sm:$0xff]  ;;  %v1962_v4 = vld [vmem:[%s9352_s4 + $0x18] sm:$0xff]  ;;  %v1961_v15 = vld [vmem:[%s9352_s4 + $0x10] sm:$0xff]  ;;  %s7153_s20 = smul.u32 1264, %s280_s19  ;;  %vm4797_vm1 = vcmask 64512  }
  0x12   : > { %6411 = vmatpush3.msra.mxu0 %v463_v0  ;;  %p288_p7 = scmp.lt.s32.totalorder %s7414_s17, 312  ;;  %7149 = vmatpush3.msra.mxu1 %v463_v0  ;;  %v1960_v20 = vld [vmem:[%s9352_s4 + $0x8] sm:$0xff]  ;;  %v1959_v54 = vld [vmem:[%s9352_s4] sm:$0xff]  ;;  %s4964_s24 = ssub.s32 (%p7403_p4), 313, %s7414_s17 }
  0x13   : > { %6412 = vmatprep.subr.mxu0 %v462_v1  ;;  %7146 = vmatprep.subr.mxu1 %v462_v1  ;;  %s8545_s26 = scalar_lea.vmem [#allocation4], %s7153_s20   ;;  %s5921_s25 = smul.u32 (%p7403_p4), 1264, %s7391_s29 }
  0x14   : > { %6413 = vmatpush3.msra.mxu0 %v462_v1  ;;  %s289_s22 = scalar_select %p288_p7, %s7414_s17, 312  ;;  %7150 = vmatpush3.msra.mxu1 %v462_v1 }
  0x15   : > { %6414 = vmatprep.subr.mxu0 %v461_v2  ;;  %7147 = vmatprep.subr.mxu1 %v461_v2  ;;  %p4965_p8 = scmp.lt.s32.totalorder (%p7403_p4), %s4964_s24, 158  ;;  %s9149_s10 = scalar_lea.vmem (%p7403_p4), %s9356_s8, %s5921_s25  }
  0x16   : > { %6415 = vmatpush3.msra.mxu0 %v461_v2  ;;  %s5428_s23 = sshll.u32 %s289_s22, 3  ;;  %7151 = vmatpush3.msra.mxu1 %v461_v2 }
  0x17   : > { %6416 = vmatprep.subr.mxu0 %v460_v3  ;;  %s7430_s9 = scalar_lea.vmem %s9349_s1, %s5428_s23  ;;  %7148 = vmatprep.subr.mxu1 %v460_v3 }
  0x18   : > { %6417 = vmatpush3.msra.mxu0 %v460_v3  ;;  %v302_v5 = vld [vmem:[%s7430_s9] sm:$0xff]  ;;  %v303_v6 = vld [vmem:[%s7430_s9 + $0x8] sm:$0xff]  ;;  %v304_v7 = vld [vmem:[%s7430_s9 + $0x10] sm:$0xff]  ;;  %7152 = vmatpush3.msra.mxu1 %v460_v3 }
  0x19   : > { %6418 = vmatprep.mubr.msk.f32.mxu0 %vm471_vm0, %v302_v5  ;;  %6655 = vmatprep.subr.mxu1 %v1962_v4  ;;  %v305_v8 = vld [vmem:[%s7430_s9 + $0x18] sm:$0xff]  ;;  %v306_v9 = vld [vmem:[%s7430_s9 + $0x20] sm:$0xff]  ;;  %v307_v10 = vld [vmem:[%s7430_s9 + $0x28] sm:$0xff] }
  0x1a   : > { %6419 = vmatmul.mubr.msk.f32.vlgmr.msra.gmra.mxu0 %vm471_vm0, %v303_v6  ;;  %v382_v11 = vld [vmem:[%s7430_s9 + $0x280] sm:$0xff]  ;;  %v383_v12 = vld [vmem:[%s7430_s9 + $0x288] sm:$0xff]  ;;  %v308_v13 = vld [vmem:[%s7430_s9 + $0x30] sm:$0xff] }
  0x1b   : > { %6421 = vmatprep.mubr.msk.f32.mxu0 %vm471_vm0, %v304_v7  ;;  %6538 = vmatprep.mubr.msk.f32.mxu1 %vm471_vm0, %v382_v11  ;;  %v384_v14 = vld [vmem:[%s7430_s9 + $0x290] sm:$0xff]  ;;  %v385_v16 = vld [vmem:[%s7430_s9 + $0x298] sm:$0xff]  ;;  %v386_v18 = vld [vmem:[%s7430_s9 + $0x2a0] sm:$0xff] }
  0x1c   : > { %6539 = vmatmul.mubr.msk.f32.vlgmr.msra.gmra.mxu1 %vm471_vm0, %v383_v12  ;;  %v309_v17 = vld [vmem:[%s7430_s9 + $0x38] sm:$0xff]  ;;  %v310_v19 = vld [vmem:[%s7430_s9 + $0x40] sm:$0xff]  ;;  %v387_v21 = vld [vmem:[%s7430_s9 + $0x2a8] sm:$0xff] }
  0x1d   : > { %6656 = vmatpush3.msra.mxu1 %v1962_v4  ;;  %6541 = vmatprep.mubr.msk.f32.mxu1 %vm471_vm0, %v384_v14  ;;  %v311_v22 = vld [vmem:[%s7430_s9 + $0x48] sm:$0xff]  ;;  %v388_v23 = vld [vmem:[%s7430_s9 + $0x2b0] sm:$0xff]  ;;  %v389_v25 = vld [vmem:[%s7430_s9 + $0x2b8] sm:$0xff] }
  0x1e   : > { %6422 = vmatmul.mubr.msk.f32.gmra.mxu0 %vm471_vm0, %v305_v8  ;;  %6657 = vmatprep.subr.mxu1 %v1961_v15  ;;  %v312_v24 = vld [vmem:[%s7430_s9 + $0x50] sm:$0xff]  ;;  %v313_v26 = vld [vmem:[%s7430_s9 + $0x58] sm:$0xff]  ;;  %v390_v27 = vld [vmem:[%s7430_s9 + $0x2c0] sm:$0xff] }
  0x1f   : > { %6424 = vmatprep.mubr.msk.f32.mxu0 %vm471_vm0, %v306_v9  ;;  %6658 = vmatpush3.msra.mxu1 %v1961_v15  ;;  %v314_v28 = vld [vmem:[%s7430_s9 + $0x60] sm:$0xff]  ;;  %v391_v29 = vld [vmem:[%s7430_s9 + $0x2c8] sm:$0xff]  ;;  %v392_v31 = vld [vmem:[%s7430_s9 + $0x2d0] sm:$0xff] }
  0x20   : > { %6542 = vmatmul.mubr.msk.f32.gmra.mxu1 %vm471_vm0, %v385_v16  ;;  %6659 = vmatprep.subr.mxu1 %v1960_v20  ;;  %v315_v30 = vld [vmem:[%s7430_s9 + $0x68] sm:$0xff]  ;;  %v316_v32 = vld [vmem:[%s7430_s9 + $0x70] sm:$0xff]  ;;  %v393_v33 = vld [vmem:[%s7430_s9 + $0x2d8] sm:$0xff] }
  0x21   : > { %6544 = vmatprep.mubr.msk.f32.mxu1 %vm471_vm0, %v386_v18  ;;  %6660 = vmatpush3.msra.mxu1 %v1960_v20  ;;  %v317_v34 = vld [vmem:[%s7430_s9 + $0x78] sm:$0xff]  ;;  %v394_v35 = vld [vmem:[%s7430_s9 + $0x2e0] sm:$0xff]  ;;  %v395_v37 = vld [vmem:[%s7430_s9 + $0x2e8] sm:$0xff] }
  0x22   : > { %6425 = vmatmul.mubr.msk.f32.gmra.mxu0 %vm471_vm0, %v307_v10  ;;  %v318_v36 = vld [vmem:[%s7430_s9 + $0x80] sm:$0xff]  ;;  %v319_v38 = vld [vmem:[%s7430_s9 + $0x88] sm:$0xff]  ;;  %v396_v39 = vld [vmem:[%s7430_s9 + $0x2f0] sm:$0xff]  ;;  %6661 = vmatprep.subr.mxu1 %v1959_v54 }
  0x23   : > { %6427 = vmatprep.mubr.msk.f32.mxu0 %vm471_vm0, %v308_v13  ;;  %v320_v40 = vld [vmem:[%s7430_s9 + $0x90] sm:$0xff]  ;;  %v397_v41 = vld [vmem:[%s7430_s9 + $0x2f8] sm:$0xff]  ;;  %v398_v43 = vld [vmem:[%s7430_s9 + $0x300] sm:$0xff]  ;;  %6662 = vmatpush3.msra.mxu1 %v1959_v54 }
  0x24   : > { %6545 = vmatmul.mubr.msk.f32.gmra.mxu1 %vm471_vm0, %v387_v21  ;;  %v321_v42 = vld [vmem:[%s7430_s9 + $0x98] sm:$0xff]  ;;  %v322_v44 = vld [vmem:[%s7430_s9 + $0xa0] sm:$0xff]  ;;  %v399_v45 = vld [vmem:[%s7430_s9 + $0x308] sm:$0xff] }
  0x25   : > { %6547 = vmatprep.mubr.msk.f32.mxu1 %vm471_vm0, %v388_v23  ;;  %v323_v46 = vld [vmem:[%s7430_s9 + $0xa8] sm:$0xff]  ;;  %v400_v47 = vld [vmem:[%s7430_s9 + $0x310] sm:$0xff]  ;;  %v401_v49 = vld [vmem:[%s7430_s9 + $0x318] sm:$0xff] }
  0x26   : > { %6428 = vmatmul.mubr.msk.f32.gmra.mxu0 %vm471_vm0, %v309_v17  ;;  %v324_v48 = vld [vmem:[%s7430_s9 + $0xb0] sm:$0xff]  ;;  %v325_v50 = vld [vmem:[%s7430_s9 + $0xb8] sm:$0xff]  ;;  %v402_v51 = vld [vmem:[%s7430_s9 + $0x320] sm:$0xff] }
  0x27   : > { %6430 = vmatprep.mubr.msk.f32.mxu0 %vm471_vm0, %v310_v19  ;;  %v326_v52 = vld [vmem:[%s7430_s9 + $0xc0] sm:$0xff]  ;;  %v403_v53 = vld [vmem:[%s7430_s9 + $0x328] sm:$0xff]  ;;  %v404_v56 = vld [vmem:[%s7430_s9 + $0x330] sm:$0xff] }
  0x28   : > { %6548 = vmatmul.mubr.msk.f32.gmra.mxu1 %vm471_vm0, %v389_v25  ;;  %v327_v55 = vld [vmem:[%s7430_s9 + $0xc8] sm:$0xff]  ;;  %v328_v57 = vld [vmem:[%s7430_s9 + $0xd0] sm:$0xff]  ;;  %v405_v58 = vld [vmem:[%s7430_s9 + $0x338] sm:$0xff] }
  0x29   : > { %6550 = vmatprep.mubr.msk.f32.mxu1 %vm471_vm0, %v390_v27  ;;  %v329_v59 = vld [vmem:[%s7430_s9 + $0xd8] sm:$0xff]  ;;  %v406_v60 = vld [vmem:[%s7430_s9 + $0x340] sm:$0xff]  ;;  %v407_v62 = vld [vmem:[%s7430_s9 + $0x348] sm:$0xff] }
  0x2a   : > { %6431 = vmatmul.mubr.msk.f32.gmra.mxu0 %vm471_vm0, %v311_v22  ;;  %v330_v61 = vld [vmem:[%s7430_s9 + $0xe0] sm:$0xff]  ;;  %v331_v63 = vld [vmem:[%s7430_s9 + $0xe8] sm:$0xff]  ;;  %v408_v0 = vld [vmem:[%s7430_s9 + $0x350] sm:$0xff] }
  0x2b   : > { %6433 = vmatprep.mubr.msk.f32.mxu0 %vm471_vm0, %v312_v24  ;;  %v332_v1 = vld [vmem:[%s7430_s9 + $0xf0] sm:$0xff]  ;;  %v409_v2 = vld [vmem:[%s7430_s9 + $0x358] sm:$0xff]  ;;  %v410_v4 = vld [vmem:[%s7430_s9 + $0x360] sm:$0xff] }
  0x2c   : > { %6551 = vmatmul.mubr.msk.f32.gmra.mxu1 %vm471_vm0, %v391_v29  ;;  %v333_v3 = vld [vmem:[%s7430_s9 + $0xf8] sm:$0xff]  ;;  %v334_v5 = vld [vmem:[%s7430_s9 + $0x100] sm:$0xff]  ;;  %v411_v6 = vld [vmem:[%s7430_s9 + $0x368] sm:$0xff] }
  0x2d   : > { %6553 = vmatprep.mubr.msk.f32.mxu1 %vm471_vm0, %v392_v31  ;;  %v335_v7 = vld [vmem:[%s7430_s9 + $0x108] sm:$0xff]  ;;  %v412_v8 = vld [vmem:[%s7430_s9 + $0x370] sm:$0xff]  ;;  %v413_v10 = vld [vmem:[%s7430_s9 + $0x378] sm:$0xff] }
  0x2e   : > { %6434 = vmatmul.mubr.msk.f32.gmra.mxu0 %vm471_vm0, %v313_v26  ;;  %v336_v9 = vld [vmem:[%s7430_s9 + $0x110] sm:$0xff]  ;;  %v337_v11 = vld [vmem:[%s7430_s9 + $0x118] sm:$0xff]  ;;  %v414_v12 = vld [vmem:[%s7430_s9 + $0x380] sm:$0xff] }
  0x2f   : > { %6436 = vmatprep.mubr.msk.f32.mxu0 %vm471_vm0, %v314_v28  ;;  %v338_v13 = vld [vmem:[%s7430_s9 + $0x120] sm:$0xff]  ;;  %v415_v14 = vld [vmem:[%s7430_s9 + $0x388] sm:$0xff]  ;;  %v416_v16 = vld [vmem:[%s7430_s9 + $0x390] sm:$0xff] }
  0x30   : > { %6554 = vmatmul.mubr.msk.f32.gmra.mxu1 %vm471_vm0, %v393_v33  ;;  %v339_v15 = vld [vmem:[%s7430_s9 + $0x128] sm:$0xff]  ;;  %v340_v17 = vld [vmem:[%s7430_s9 + $0x130] sm:$0xff]  ;;  %v417_v18 = vld [vmem:[%s7430_s9 + $0x398] sm:$0xff] }
  0x31   : > { %6556 = vmatprep.mubr.msk.f32.mxu1 %vm471_vm0, %v394_v35  ;;  %v341_v19 = vld [vmem:[%s7430_s9 + $0x138] sm:$0xff]  ;;  %v418_v20 = vld [vmem:[%s7430_s9 + $0x3a0] sm:$0xff]  ;;  %v419_v22 = vld [vmem:[%s7430_s9 + $0x3a8] sm:$0xff] }
  0x32   : > { %6437 = vmatmul.mubr.msk.f32.gmra.mxu0 %vm471_vm0, %v315_v30  ;;  %v342_v21 = vld [vmem:[%s7430_s9 + $0x140] sm:$0xff]  ;;  %v343_v23 = vld [vmem:[%s7430_s9 + $0x148] sm:$0xff]  ;;  %v420_v24 = vld [vmem:[%s7430_s9 + $0x3b0] sm:$0xff] }
  0x33   : > { %6439 = vmatprep.mubr.msk.f32.mxu0 %vm471_vm0, %v316_v32  ;;  %v344_v25 = vld [vmem:[%s7430_s9 + $0x150] sm:$0xff]  ;;  %v421_v26 = vld [vmem:[%s7430_s9 + $0x3b8] sm:$0xff]  ;;  %v422_v28 = vld [vmem:[%s7430_s9 + $0x3c0] sm:$0xff] }
  0x34   : > { %6557 = vmatmul.mubr.msk.f32.gmra.mxu1 %vm471_vm0, %v395_v37  ;;  %v345_v27 = vld [vmem:[%s7430_s9 + $0x158] sm:$0xff]  ;;  %v346_v29 = vld [vmem:[%s7430_s9 + $0x160] sm:$0xff]  ;;  %v423_v30 = vld [vmem:[%s7430_s9 + $0x3c8] sm:$0xff] }
  0x35   : > { %6559 = vmatprep.mubr.msk.f32.mxu1 %vm471_vm0, %v396_v39  ;;  %v347_v31 = vld [vmem:[%s7430_s9 + $0x168] sm:$0xff]  ;;  %v424_v32 = vld [vmem:[%s7430_s9 + $0x3d0] sm:$0xff]  ;;  %v349_v35 = vld [vmem:[%s7430_s9 + $0x178] sm:$0xff] }
  0x36   : > { %6440 = vmatmul.mubr.msk.f32.gmra.mxu0 %vm471_vm0, %v317_v34  ;;  %v348_v33 = vld [vmem:[%s7430_s9 + $0x170] sm:$0xff]  ;;  %v425_v34 = vld [vmem:[%s7430_s9 + $0x3d8] sm:$0xff]  ;;  %v350_v37 = vld [vmem:[%s7430_s9 + $0x180] sm:$0xff] }
  0x37   : > { %6442 = vmatprep.mubr.msk.f32.mxu0 %vm471_vm0, %v318_v36  ;;  %v426_v36 = vld [vmem:[%s7430_s9 + $0x3e0] sm:$0xff]  ;;  %v351_v39 = vld [vmem:[%s7430_s9 + $0x188] sm:$0xff] }
  0x38   : > { %6560 = vmatmul.mubr.msk.f32.gmra.mxu1 %vm471_vm0, %v397_v41  ;;  %v352_v41 = vld [vmem:[%s7430_s9 + $0x190] sm:$0xff]  ;;  %v435_v54 = vld [vmem:[%s7430_s9 + $0x428] sm:$0xff] }
  0x39   : > { %6562 = vmatprep.mubr.msk.f32.mxu1 %vm471_vm0, %v398_v43  ;;  %v353_v43 = vld [vmem:[%s7430_s9 + $0x198] sm:$0xff] }
  0x3a   : > { %6443 = vmatmul.mubr.msk.f32.gmra.mxu0 %vm471_vm0, %v319_v38  ;;  %v427_v38 = vld [vmem:[%s7430_s9 + $0x3e8] sm:$0xff] }
  0x3b   : > { %6445 = vmatprep.mubr.msk.f32.mxu0 %vm471_vm0, %v320_v40  ;;  %v428_v40 = vld [vmem:[%s7430_s9 + $0x3f0] sm:$0xff] }
  0x3c   : > { %6563 = vmatmul.mubr.msk.f32.gmra.mxu1 %vm471_vm0, %v399_v45  ;;  %v354_v45 = vld [vmem:[%s7430_s9 + $0x1a0] sm:$0xff] }
  0x3d   : > { %6565 = vmatprep.mubr.msk.f32.mxu1 %vm471_vm0, %v400_v47  ;;  %v355_v47 = vld [vmem:[%s7430_s9 + $0x1a8] sm:$0xff] }
  0x3e   : > { %6446 = vmatmul.mubr.msk.f32.gmra.mxu0 %vm471_vm0, %v321_v42  ;;  %v429_v42 = vld [vmem:[%s7430_s9 + $0x3f8] sm:$0xff] }
  0x3f   : > { %6448 = vmatprep.mubr.msk.f32.mxu0 %vm471_vm0, %v322_v44  ;;  %v430_v44 = vld [vmem:[%s7430_s9 + $0x400] sm:$0xff] }
  0x40   : > { %6566 = vmatmul.mubr.msk.f32.gmra.mxu1 %vm471_vm0, %v401_v49  ;;  %v356_v49 = vld [vmem:[%s7430_s9 + $0x1b0] sm:$0xff] }
  0x41   : > { %6568 = vmatprep.mubr.msk.f32.mxu1 %vm471_vm0, %v402_v51  ;;  %v357_v51 = vld [vmem:[%s7430_s9 + $0x1b8] sm:$0xff] }
  0x42   : > { %6449 = vmatmul.mubr.msk.f32.gmra.mxu0 %vm471_vm0, %v323_v46  ;;  %v431_v46 = vld [vmem:[%s7430_s9 + $0x408] sm:$0xff] }
  0x43   : > { %6451 = vmatprep.mubr.msk.f32.mxu0 %vm471_vm0, %v324_v48  ;;  %v432_v48 = vld [vmem:[%s7430_s9 + $0x410] sm:$0xff] }
  0x44   : > { %6569 = vmatmul.mubr.msk.f32.gmra.mxu1 %vm471_vm0, %v403_v53  ;;  %v358_v53 = vld [vmem:[%s7430_s9 + $0x1c0] sm:$0xff] }
  0x45   : > { %6571 = vmatprep.mubr.msk.f32.mxu1 %vm471_vm0, %v404_v56  ;;  %v436_v56 = vld [vmem:[%s7430_s9 + $0x430] sm:$0xff] }
  0x46   : > { %6452 = vmatmul.mubr.msk.f32.gmra.mxu0 %vm471_vm0, %v325_v50  ;;  %v433_v50 = vld [vmem:[%s7430_s9 + $0x418] sm:$0xff] }
  0x47   : > { %6454 = vmatprep.mubr.msk.f32.mxu0 %vm471_vm0, %v326_v52  ;;  %v434_v52 = vld [vmem:[%s7430_s9 + $0x420] sm:$0xff] }
  0x48   : > { %6572 = vmatmul.mubr.msk.f32.gmra.mxu1 %vm471_vm0, %v405_v58  ;;  %v437_v58 = vld [vmem:[%s7430_s9 + $0x438] sm:$0xff] }
  0x49   : > { %6574 = vmatprep.mubr.msk.f32.mxu1 %vm471_vm0, %v406_v60  ;;  %v438_v60 = vld [vmem:[%s7430_s9 + $0x440] sm:$0xff] }
  0x4a   : > { %6455 = vmatmul.mubr.msk.f32.gmra.mxu0 %vm471_vm0, %v327_v55  ;;  %v359_v55 = vld [vmem:[%s7430_s9 + $0x1c8] sm:$0xff] }
  0x4b   : > { %6457 = vmatprep.mubr.msk.f32.mxu0 %vm471_vm0, %v328_v57  ;;  %v360_v57 = vld [vmem:[%s7430_s9 + $0x1d0] sm:$0xff] }
  0x4c   : > { %6575 = vmatmul.mubr.msk.f32.gmra.mxu1 %vm471_vm0, %v407_v62  ;;  %v362_v62 = vld [vmem:[%s7430_s9 + $0x1e0] sm:$0xff] }
  0x4d   : > { %6577 = vmatprep.mubr.msk.f32.mxu1 %vm471_vm0, %v408_v0  ;;  %v363_v0 = vld [vmem:[%s7430_s9 + $0x1e8] sm:$0xff] }
  0x4e   : > { %6458 = vmatmul.mubr.msk.f32.gmra.mxu0 %vm471_vm0, %v329_v59  ;;  %v361_v59 = vld [vmem:[%s7430_s9 + $0x1d8] sm:$0xff] }
  0x4f   : > { %6460 = vmatprep.mubr.msk.f32.mxu0 %vm471_vm0, %v330_v61  ;;  %v3460_v61 = vld [vmem:[%s9354_s6 + $0x18] sm:$0xff] }
  0x50   : > { %6578 = vmatmul.mubr.msk.f32.gmra.mxu1 %vm471_vm0, %v409_v2  ;;  %6900 = vmatprep.subr.mxu0 %v3460_v61  ;;  %v364_v2 = vld [vmem:[%s7430_s9 + $0x1f0] sm:$0xff] }
  0x51   : > { %6580 = vmatprep.mubr.msk.f32.mxu1 %vm471_vm0, %v410_v4  ;;  %6901 = vmatpush3.msra.mxu0 %v3460_v61  ;;  %v365_v4 = vld [vmem:[%s7430_s9 + $0x1f8] sm:$0xff] }
  0x52   : > { %6461 = vmatmul.mubr.msk.f32.gmra.mxu0 %vm471_vm0, %v331_v63  ;;  %v439_v63 = vld [vmem:[%s7430_s9 + $0x448] sm:$0xff] }
  0x53   : > { %6463 = vmatprep.mubr.msk.f32.mxu0 %vm471_vm0, %v332_v1  ;;  %v440_v1 = vld [vmem:[%s7430_s9 + $0x450] sm:$0xff] }
  0x54   : > { %6581 = vmatmul.mubr.msk.f32.gmra.mxu1 %vm471_vm0, %v411_v6  ;;  %v366_v6 = vld [vmem:[%s7430_s9 + $0x200] sm:$0xff] }
  0x55   : > { %6583 = vmatprep.mubr.msk.f32.mxu1 %vm471_vm0, %v412_v8  ;;  %v367_v8 = vld [vmem:[%s7430_s9 + $0x208] sm:$0xff] }
  0x56   : > { %6464 = vmatmul.mubr.msk.f32.gmra.mxu0 %vm471_vm0, %v333_v3  ;;  %v441_v3 = vld [vmem:[%s7430_s9 + $0x458] sm:$0xff] }
  0x57   : > { %6466 = vmatprep.mubr.msk.f32.mxu0 %vm471_vm0, %v334_v5  ;;  %v442_v5 = vld [vmem:[%s7430_s9 + $0x460] sm:$0xff] }
  0x58   : > { %6584 = vmatmul.mubr.msk.f32.gmra.mxu1 %vm471_vm0, %v413_v10  ;;  %v368_v10 = vld [vmem:[%s7430_s9 + $0x210] sm:$0xff] }
  0x59   : > { %6586 = vmatprep.mubr.msk.f32.mxu1 %vm471_vm0, %v414_v12  ;;  %v369_v12 = vld [vmem:[%s7430_s9 + $0x218] sm:$0xff] }
  0x5a   : > { %6467 = vmatmul.mubr.msk.f32.gmra.mxu0 %vm471_vm0, %v335_v7  ;;  %v443_v7 = vld [vmem:[%s7430_s9 + $0x468] sm:$0xff] }
  0x5b   : > { %6469 = vmatprep.mubr.msk.f32.mxu0 %vm471_vm0, %v336_v9  ;;  %v444_v9 = vld [vmem:[%s7430_s9 + $0x470] sm:$0xff] }
  0x5c   : > { %6587 = vmatmul.mubr.msk.f32.gmra.mxu1 %vm471_vm0, %v415_v14  ;;  %v370_v14 = vld [vmem:[%s7430_s9 + $0x220] sm:$0xff] }
  0x5d   : > { %6589 = vmatprep.mubr.msk.f32.mxu1 %vm471_vm0, %v416_v16  ;;  %v371_v16 = vld [vmem:[%s7430_s9 + $0x228] sm:$0xff] }
  0x5e   : > { %6470 = vmatmul.mubr.msk.f32.gmra.mxu0 %vm471_vm0, %v337_v11  ;;  %v445_v11 = vld [vmem:[%s7430_s9 + $0x478] sm:$0xff] }
  0x5f   : > { %6472 = vmatprep.mubr.msk.f32.mxu0 %vm471_vm0, %v338_v13  ;;  %v446_v13 = vld [vmem:[%s7430_s9 + $0x480] sm:$0xff] }
  0x60   : > { %6590 = vmatmul.mubr.msk.f32.gmra.mxu1 %vm471_vm0, %v417_v18  ;;  %v372_v18 = vld [vmem:[%s7430_s9 + $0x230] sm:$0xff] }
  0x61   : > { %6592 = vmatprep.mubr.msk.f32.mxu1 %vm471_vm0, %v418_v20  ;;  %v373_v20 = vld [vmem:[%s7430_s9 + $0x238] sm:$0xff] }
  0x62   : > { %6473 = vmatmul.mubr.msk.f32.gmra.mxu0 %vm471_vm0, %v339_v15  ;;  %v447_v15 = vld [vmem:[%s7430_s9 + $0x488] sm:$0xff] }
  0x63   : > { %6475 = vmatprep.mubr.msk.f32.mxu0 %vm471_vm0, %v340_v17  ;;  %v448_v17 = vld [vmem:[%s7430_s9 + $0x490] sm:$0xff] }
  0x64   : > { %6593 = vmatmul.mubr.msk.f32.gmra.mxu1 %vm471_vm0, %v419_v22  ;;  %v374_v22 = vld [vmem:[%s7430_s9 + $0x240] sm:$0xff] }
  0x65   : > { %6595 = vmatprep.mubr.msk.f32.mxu1 %vm471_vm0, %v420_v24  ;;  %v375_v24 = vld [vmem:[%s7430_s9 + $0x248] sm:$0xff] }
  0x66   : > { %6476 = vmatmul.mubr.msk.f32.gmra.mxu0 %vm471_vm0, %v341_v19  ;;  %v449_v19 = vld [vmem:[%s7430_s9 + $0x498] sm:$0xff] }
  0x67   : > { %6478 = vmatprep.mubr.msk.f32.mxu0 %vm471_vm0, %v342_v21  ;;  %v450_v21 = vld [vmem:[%s7430_s9 + $0x4a0] sm:$0xff] }
  0x68   : > { %6596 = vmatmul.mubr.msk.f32.gmra.mxu1 %vm471_vm0, %v421_v26  ;;  %v376_v26 = vld [vmem:[%s7430_s9 + $0x250] sm:$0xff] }
  0x69   : > { %6598 = vmatprep.mubr.msk.f32.mxu1 %vm471_vm0, %v422_v28  ;;  %v377_v28 = vld [vmem:[%s7430_s9 + $0x258] sm:$0xff] }
  0x6a   : > { %6479 = vmatmul.mubr.msk.f32.gmra.mxu0 %vm471_vm0, %v343_v23  ;;  %v451_v23 = vld [vmem:[%s7430_s9 + $0x4a8] sm:$0xff] }
  0x6b   : > { %6481 = vmatprep.mubr.msk.f32.mxu0 %vm471_vm0, %v344_v25  ;;  %v452_v25 = vld [vmem:[%s7430_s9 + $0x4b0] sm:$0xff] }
  0x6c   : > { %6599 = vmatmul.mubr.msk.f32.gmra.mxu1 %vm471_vm0, %v423_v30  ;;  %v378_v30 = vld [vmem:[%s7430_s9 + $0x260] sm:$0xff] }
  0x6d   : > { %6601 = vmatprep.mubr.msk.f32.mxu1 %vm471_vm0, %v424_v32  ;;  %v379_v32 = vld [vmem:[%s7430_s9 + $0x268] sm:$0xff] }
  0x6e   : > { %6482 = vmatmul.mubr.msk.f32.gmra.mxu0 %vm471_vm0, %v345_v27  ;;  %v453_v27 = vld [vmem:[%s7430_s9 + $0x4b8] sm:$0xff] }
  0x6f   : > { %6484 = vmatprep.mubr.msk.f32.mxu0 %vm471_vm0, %v346_v29  ;;  %v454_v29 = vld [vmem:[%s7430_s9 + $0x4c0] sm:$0xff] }
  0x70   : > { %6602 = vmatmul.mubr.msk.f32.gmra.mxu1 %vm471_vm0, %v425_v34  ;;  %v380_v34 = vld [vmem:[%s7430_s9 + $0x270] sm:$0xff] }
  0x71   : > { %6604 = vmatprep.mubr.msk.f32.mxu1 %vm471_vm0, %v426_v36  ;;  %v381_v36 = vld [vmem:[%s7430_s9 + $0x278] sm:$0xff] }
  0x72   : > { %6485 = vmatmul.mubr.msk.f32.gmra.mxu0 %vm471_vm0, %v347_v31  ;;  %v455_v31 = vld [vmem:[%s7430_s9 + $0x4c8] sm:$0xff] }
  0x73   : > { %6487 = vmatprep.mubr.msk.f32.mxu0 %vm471_vm0, %v348_v33  ;;  %v456_v33 = vld [vmem:[%s7430_s9 + $0x4d0] sm:$0xff] }
  0x74   : > { %6605 = vmatmul.mubr.msk.f32.gmra.mxu1 %vm471_vm0, %v427_v38  ;;  %v3459_v38 = vld [vmem:[%s9354_s6 + $0x10] sm:$0xff] }
  0x75   : > { %6607 = vmatprep.mubr.msk.f32.mxu1 %vm471_vm0, %v428_v40  ;;  %6902 = vmatprep.subr.mxu0 %v3459_v38  ;;  %v7766_v40 = vld [vmem:[%s9351_s3] ss:$0 sm:$0xff] }
  0x76   : > { %6488 = vmatmul.mubr.msk.f32.gmra.mxu0 %vm471_vm0, %v349_v35  ;;  %v457_v35 = vld [vmem:[%s7430_s9 + $0x4d8] sm:$0xff] }
  0x77   : > { %6490 = vmatprep.mubr.msk.f32.mxu0 %vm471_vm0, %v350_v37  ;;  %v458_v37 = vld [vmem:[%s7430_s9 + $0x4e0] sm:$0xff]  ;;  %6903 = vmatpush3.msra.mxu0 %v3459_v38 }
  0x78   : > { %6608 = vmatmul.mubr.msk.f32.gmra.mxu1 %vm471_vm0, %v429_v42  ;;  %v3458_v42 = vld [vmem:[%s9354_s6 + $0x8] sm:$0xff] }
  0x79   : > { %6610 = vmatprep.mubr.msk.f32.mxu1 %vm471_vm0, %v430_v44  ;;  %6904 = vmatprep.subr.mxu0 %v3458_v42 }
  0x7a   : > { %6491 = vmatmul.mubr.msk.f32.gmra.mxu0 %vm471_vm0, %v351_v39  ;;  %v459_v39 = vld [vmem:[%s7430_s9 + $0x4e8] sm:$0xff] }
  0x7b   : > { %6493 = vmatprep.mubr.msk.f32.mxu0 %vm471_vm0, %v352_v41  ;;  %6905 = vmatpush3.msra.mxu0 %v3458_v42 }
  0x7c   : > { %6611 = vmatmul.mubr.msk.f32.gmra.mxu1 %vm471_vm0, %v431_v46 }
  0x7d   : > { %6613 = vmatprep.mubr.msk.f32.mxu1 %vm471_vm0, %v432_v48 }
  0x7e   : > { %6494 = vmatmul.mubr.msk.f32.gmra.mxu0 %vm471_vm0, %v353_v43 }
  0x7f   : > { %6496 = vmatprep.mubr.msk.f32.mxu0 %vm471_vm0, %v354_v45 }
  0x80   : > { %6614 = vmatmul.mubr.msk.f32.gmra.mxu1 %vm471_vm0, %v433_v50 }
  0x81   : > { %6616 = vmatprep.mubr.msk.f32.mxu1 %vm471_vm0, %v434_v52 }
  0x82   : > { %6497 = vmatmul.mubr.msk.f32.gmra.mxu0 %vm471_vm0, %v355_v47 }
  0x83   : > { %6499 = vmatprep.mubr.msk.f32.mxu0 %vm471_vm0, %v356_v49 }
  0x84   : > { %6617 = vmatmul.mubr.msk.f32.gmra.mxu1 %vm471_vm0, %v435_v54 }
  0x85   : > { %6619 = vmatprep.mubr.msk.f32.mxu1 %vm471_vm0, %v436_v56 }
  0x86   : > { %6500 = vmatmul.mubr.msk.f32.gmra.mxu0 %vm471_vm0, %v357_v51 }
  0x87   : > { %6502 = vmatprep.mubr.msk.f32.mxu0 %vm471_vm0, %v358_v53 }
  0x88   : > { %6620 = vmatmul.mubr.msk.f32.gmra.mxu1 %vm471_vm0, %v437_v58 }
  0x89   : > { %6622 = vmatprep.mubr.msk.f32.mxu1 %vm471_vm0, %v438_v60 }
  0x8a   : > { %6503 = vmatmul.mubr.msk.f32.gmra.mxu0 %vm471_vm0, %v359_v55 }
  0x8b   : > { %6505 = vmatprep.mubr.msk.f32.mxu0 %vm471_vm0, %v360_v57 }
  0x8c   : > { %6623 = vmatmul.mubr.msk.f32.gmra.mxu1 %vm471_vm0, %v439_v63 }
  0x8d   : > { %6625 = vmatprep.mubr.msk.f32.mxu1 %vm471_vm0, %v440_v1 }
  0x8e   : > { %6506 = vmatmul.mubr.msk.f32.gmra.mxu0 %vm471_vm0, %v361_v59 }
  0x8f   : > { %6508 = vmatprep.mubr.msk.f32.mxu0 %vm471_vm0, %v362_v62 }
  0x90   : > { %6626 = vmatmul.mubr.msk.f32.gmra.mxu1 %vm471_vm0, %v441_v3 }
  0x91   : > { %6628 = vmatprep.mubr.msk.f32.mxu1 %vm471_vm0, %v442_v5 }
  0x92   : > { %6509 = vmatmul.mubr.msk.f32.gmra.mxu0 %vm471_vm0, %v363_v0 }
  0x93   : > { %6511 = vmatprep.mubr.msk.f32.mxu0 %vm471_vm0, %v364_v2 }
  0x94   : > { %6629 = vmatmul.mubr.msk.f32.gmra.mxu1 %vm471_vm0, %v443_v7 }
  0x95   : > { %6631 = vmatprep.mubr.msk.f32.mxu1 %vm471_vm0, %v444_v9 }
  0x96   : > { %6512 = vmatmul.mubr.msk.f32.gmra.mxu0 %vm471_vm0, %v365_v4 }
  0x97   : > { %6514 = vmatprep.mubr.msk.f32.mxu0 %vm471_vm0, %v366_v6 }
  0x98   : > { %6632 = vmatmul.mubr.msk.f32.gmra.mxu1 %vm471_vm0, %v445_v11 }
  0x99   : > { %6634 = vmatprep.mubr.msk.f32.mxu1 %vm471_vm0, %v446_v13 }
  0x9a   : > { %6515 = vmatmul.mubr.msk.f32.gmra.mxu0 %vm471_vm0, %v367_v8 }
  0x9b   : > { %6517 = vmatprep.mubr.msk.f32.mxu0 %vm471_vm0, %v368_v10 }
  0x9c   : > { %6635 = vmatmul.mubr.msk.f32.gmra.mxu1 %vm471_vm0, %v447_v15 }
  0x9d   : > { %6637 = vmatprep.mubr.msk.f32.mxu1 %vm471_vm0, %v448_v17 }
  0x9e   : > { %6518 = vmatmul.mubr.msk.f32.gmra.mxu0 %vm471_vm0, %v369_v12 }
  0x9f   : > { %6520 = vmatprep.mubr.msk.f32.mxu0 %vm471_vm0, %v370_v14 }
  0xa0   : > { %6638 = vmatmul.mubr.msk.f32.gmra.mxu1 %vm471_vm0, %v449_v19 }
  0xa1   : > { %6640 = vmatprep.mubr.msk.f32.mxu1 %vm471_vm0, %v450_v21 }
  0xa2   : > { %6521 = vmatmul.mubr.msk.f32.gmra.mxu0 %vm471_vm0, %v371_v16 }
  0xa3   : > { %6523 = vmatprep.mubr.msk.f32.mxu0 %vm471_vm0, %v372_v18 }
  0xa4   : > { %6641 = vmatmul.mubr.msk.f32.gmra.mxu1 %vm471_vm0, %v451_v23 }
  0xa5   : > { %6643 = vmatprep.mubr.msk.f32.mxu1 %vm471_vm0, %v452_v25 }
  0xa6   : > { %6524 = vmatmul.mubr.msk.f32.gmra.mxu0 %vm471_vm0, %v373_v20 }
  0xa7   : > { %6526 = vmatprep.mubr.msk.f32.mxu0 %vm471_vm0, %v374_v22 }
  0xa8   : > { %6644 = vmatmul.mubr.msk.f32.gmra.mxu1 %vm471_vm0, %v453_v27 }
  0xa9   : > { %6646 = vmatprep.mubr.msk.f32.mxu1 %vm471_vm0, %v454_v29 }
  0xaa   : > { %6527 = vmatmul.mubr.msk.f32.gmra.mxu0 %vm471_vm0, %v375_v24 }
  0xab   : > { %6529 = vmatprep.mubr.msk.f32.mxu0 %vm471_vm0, %v376_v26 }
  0xac   : > { %6647 = vmatmul.mubr.msk.f32.gmra.mxu1 %vm471_vm0, %v455_v31 }
  0xad   : > { %6649 = vmatprep.mubr.msk.f32.mxu1 %vm471_vm0, %v456_v33 }
  0xae   : > { %6530 = vmatmul.mubr.msk.f32.gmra.mxu0 %vm471_vm0, %v377_v28 }
  0xaf   : > { %6532 = vmatprep.mubr.msk.f32.mxu0 %vm471_vm0, %v378_v30 }
  0xb0   : > { %6650 = vmatmul.mubr.msk.f32.gmra.mxu1 %vm471_vm0, %v457_v35 }
  0xb1   : > { %6652 = vmatprep.mubr.msk.f32.mxu1 %vm471_vm0, %v458_v37 }
  0xb2   : > { %6533 = vmatmul.mubr.msk.f32.gmra.mxu0 %vm471_vm0, %v379_v32 }
  0xb3   : > { %6535 = vmatprep.mubr.msk.f32.mxu0 %vm471_vm0, %v380_v34 }
  0xb4   : > { %6653 = vmatmul.mubr.msk.f32.gmra.mxu1 %vm471_vm0, %v459_v39 }
  0xb6   : > { %6536 = vmatmul.mubr.msk.f32.gmra.mxu0 %vm471_vm0, %v381_v36 }
  0xda   : > { %v6420_v41 = vpop.f32.mrf.mxu0 }
  0xdb   : > { %v1018_v43 = vadd.f32 %v6420_v41, %v7766_v40 }
  0xdc   : > { %v1012_v44 = vpop.f32.mrf.mxu0  ;;  %v7776_v52 = vpop.f32.mrf.mxu1 }
  0xdd   : > { %v1013_v45 = vadd.f32 %v7766_v40, %v1012_v44  ;;  %v1802_v48 = vmax.f32 %v1018_v43, 0.0 }
  0xde   : > { %v6423_v46 = vpop.f32.mrf.mxu0  ;;  %v7779_v55 = vpop.f32.mrf.mxu1 }
  0xdf   : > { %v1801_v47 = vmax.f32 %v1013_v45, 0.0  ;;  %v1028_v49 = vadd.f32 %v6423_v46, %v7766_v40 }
  0xe0   : > { %v1022_v50 = vpop.f32.mrf.mxu0  ;;  %v7784_v60 = vpop.f32.mrf.mxu1 }
  0xe1   : > { %v1023_v51 = vadd.f32 %v7766_v40, %v1022_v50  ;;  %6663 = vmatprep.mubr.msk.f32.mxu1 %vm471_vm0, %v1801_v47  ;;  %v1804_v56 = vmax.f32 %v1028_v49, 0.0  ;;  %v3457_v49 = vld [vmem:[%s9354_s6] sm:$0xff] }
  0xe2   : > { %v6426_v53 = vpop.f32.mrf.mxu0  ;;  %6664 = vmatmul.mubr.msk.f32.vlgmr.msra.gmra.mxu1 %vm471_vm0, %v1802_v48  ;;  %v7787_v63 = vpop.f32.mrf.mxu1  ;;  %6906 = vmatprep.subr.mxu0 %v3457_v49 }
  0xe3   : > { %v1803_v54 = vmax.f32 %v1023_v51, 0.0  ;;  %v1038_v57 = vadd.f32 %v6426_v53, %v7766_v40  ;;  %6907 = vmatpush3.msra.mxu0 %v3457_v49 }
  0xe4   : > { %v1032_v58 = vpop.f32.mrf.mxu0  ;;  %v7792_v4 = vpop.f32.mrf.mxu1 }
  0xe5   : > { %v1033_v59 = vadd.f32 %v7766_v40, %v1032_v58  ;;  %6666 = vmatprep.mubr.msk.f32.mxu1 %vm471_vm0, %v1803_v54  ;;  %v1806_v0 = vmax.f32 %v1038_v57, 0.0 }
  0xe6   : > { %v6429_v61 = vpop.f32.mrf.mxu0  ;;  %6667 = vmatmul.mubr.msk.f32.gmra.mxu1 %vm471_vm0, %v1804_v56  ;;  %v7795_v7 = vpop.f32.mrf.mxu1 }
  0xe7   : > { %v1805_v62 = vmax.f32 %v1033_v59, 0.0  ;;  %v1048_v1 = vadd.f32 %v6429_v61, %v7766_v40 }
  0xe8   : > { %v1042_v2 = vpop.f32.mrf.mxu0  ;;  %v7800_v12 = vpop.f32.mrf.mxu1 }
  0xe9   : > { %v1043_v3 = vadd.f32 %v7766_v40, %v1042_v2  ;;  %6669 = vmatprep.mubr.msk.f32.mxu1 %vm471_vm0, %v1805_v62  ;;  %v1808_v8 = vmax.f32 %v1048_v1, 0.0 }
  0xea   : > { %v6432_v5 = vpop.f32.mrf.mxu0  ;;  %6670 = vmatmul.mubr.msk.f32.gmra.mxu1 %vm471_vm0, %v1806_v0  ;;  %v7803_v15 = vpop.f32.mrf.mxu1 }
  0xeb   : > { %v1807_v6 = vmax.f32 %v1043_v3, 0.0  ;;  %v1058_v9 = vadd.f32 %v6432_v5, %v7766_v40 }
  0xec   : > { %v1052_v10 = vpop.f32.mrf.mxu0  ;;  %v7808_v20 = vpop.f32.mrf.mxu1 }
  0xed   : > { %v1053_v11 = vadd.f32 %v7766_v40, %v1052_v10  ;;  %6672 = vmatprep.mubr.msk.f32.mxu1 %vm471_vm0, %v1807_v6  ;;  %v1810_v16 = vmax.f32 %v1058_v9, 0.0 }
  0xee   : > { %v6435_v13 = vpop.f32.mrf.mxu0  ;;  %6673 = vmatmul.mubr.msk.f32.gmra.mxu1 %vm471_vm0, %v1808_v8  ;;  %v7811_v23 = vpop.f32.mrf.mxu1 }
  0xef   : > { %v1809_v14 = vmax.f32 %v1053_v11, 0.0  ;;  %v1068_v17 = vadd.f32 %v6435_v13, %v7766_v40 }
  0xf0   : > { %v1062_v18 = vpop.f32.mrf.mxu0  ;;  %v7816_v28 = vpop.f32.mrf.mxu1 }
  0xf1   : > { %v1063_v19 = vadd.f32 %v7766_v40, %v1062_v18  ;;  %6675 = vmatprep.mubr.msk.f32.mxu1 %vm471_vm0, %v1809_v14  ;;  %v1812_v24 = vmax.f32 %v1068_v17, 0.0 }
  0xf2   : > { %v6438_v21 = vpop.f32.mrf.mxu0  ;;  %6676 = vmatmul.mubr.msk.f32.gmra.mxu1 %vm471_vm0, %v1810_v16  ;;  %v7819_v31 = vpop.f32.mrf.mxu1 }
  0xf3   : > { %v1811_v22 = vmax.f32 %v1063_v19, 0.0  ;;  %v1078_v25 = vadd.f32 %v6438_v21, %v7766_v40 }
  0xf4   : > { %v1072_v26 = vpop.f32.mrf.mxu0  ;;  %v7824_v36 = vpop.f32.mrf.mxu1 }
  0xf5   : > { %v1073_v27 = vadd.f32 %v7766_v40, %v1072_v26  ;;  %6678 = vmatprep.mubr.msk.f32.mxu1 %vm471_vm0, %v1811_v22  ;;  %v1814_v32 = vmax.f32 %v1078_v25, 0.0 }
  0xf6   : > { %v6441_v29 = vpop.f32.mrf.mxu0  ;;  %6679 = vmatmul.mubr.msk.f32.gmra.mxu1 %vm471_vm0, %v1812_v24  ;;  %v7827_v39 = vpop.f32.mrf.mxu1 }
  0xf7   : > { %v1813_v30 = vmax.f32 %v1073_v27, 0.0  ;;  %v1088_v33 = vadd.f32 %v6441_v29, %v7766_v40 }
  0xf8   : > { %v1082_v34 = vpop.f32.mrf.mxu0  ;;  %v7832_v45 = vpop.f32.mrf.mxu1 }
  0xf9   : > { %v1083_v35 = vadd.f32 %v7766_v40, %v1082_v34  ;;  %6681 = vmatprep.mubr.msk.f32.mxu1 %vm471_vm0, %v1813_v30  ;;  %v1816_v41 = vmax.f32 %v1088_v33, 0.0 }
  0xfa   : > { %v6444_v37 = vpop.f32.mrf.mxu0  ;;  %6682 = vmatmul.mubr.msk.f32.gmra.mxu1 %vm471_vm0, %v1814_v32  ;;  %v7835_v48 = vpop.f32.mrf.mxu1 }
  0xfb   : > { %v1815_v38 = vmax.f32 %v1083_v35, 0.0  ;;  %v1098_v42 = vadd.f32 %v6444_v37, %v7766_v40 }
  0xfc   : > { %v1092_v43 = vpop.f32.mrf.mxu0  ;;  %v7843_v56 = vpop.f32.mrf.mxu1 }
  0xfd   : > { %v1093_v44 = vadd.f32 %v7766_v40, %v1092_v43  ;;  %6684 = vmatprep.mubr.msk.f32.mxu1 %vm471_vm0, %v1815_v38  ;;  %v1818_v50 = vmax.f32 %v1098_v42, 0.0 }
  0xfe   : > { %v6447_v46 = vpop.f32.mrf.mxu0  ;;  %6685 = vmatmul.mubr.msk.f32.gmra.mxu1 %vm471_vm0, %v1816_v41  ;;  %v7846_v59 = vpop.f32.mrf.mxu1 }
  0xff   : > { %v1817_v47 = vmax.f32 %v1093_v44, 0.0  ;;  %v1108_v51 = vadd.f32 %v6447_v46, %v7766_v40 }
 0x100   : > { %v1102_v53 = vpop.f32.mrf.mxu0  ;;  %v7851_v2 = vpop.f32.mrf.mxu1 }
 0x101   : > { %v1103_v54 = vadd.f32 %v7766_v40, %v1102_v53  ;;  %6687 = vmatprep.mubr.msk.f32.mxu1 %vm471_vm0, %v1817_v47  ;;  %v1820_v61 = vmax.f32 %v1108_v51, 0.0 }
 0x102   : > { %v6450_v57 = vpop.f32.mrf.mxu0  ;;  %6688 = vmatmul.mubr.msk.f32.gmra.mxu1 %vm471_vm0, %v1818_v50  ;;  %v7854_v6 = vpop.f32.mrf.mxu1 }
 0x103   : > { %v1819_v58 = vmax.f32 %v1103_v54, 0.0  ;;  %v1118_v62 = vadd.f32 %v6450_v57, %v7766_v40 }
 0x104   : > { %v1112_v0 = vpop.f32.mrf.mxu0  ;;  %v7859_v13 = vpop.f32.mrf.mxu1 }
 0x105   : > { %v1113_v1 = vadd.f32 %v7766_v40, %v1112_v0  ;;  %6690 = vmatprep.mubr.msk.f32.mxu1 %vm471_vm0, %v1819_v58  ;;  %v1822_v8 = vmax.f32 %v1118_v62, 0.0 }
 0x106   : > { %v6453_v3 = vpop.f32.mrf.mxu0  ;;  %6691 = vmatmul.mubr.msk.f32.gmra.mxu1 %vm471_vm0, %v1820_v61  ;;  %v7862_v17 = vpop.f32.mrf.mxu1 }
 0x107   : > { %v1821_v5 = vmax.f32 %v1113_v1, 0.0  ;;  %v1128_v9 = vadd.f32 %v6453_v3, %v7766_v40 }
 0x108   : > { %v1122_v10 = vpop.f32.mrf.mxu0  ;;  %v7867_v24 = vpop.f32.mrf.mxu1 }
 0x109   : > { %v1123_v11 = vadd.f32 %v7766_v40, %v1122_v10  ;;  %6693 = vmatprep.mubr.msk.f32.mxu1 %vm471_vm0, %v1821_v5  ;;  %v1824_v18 = vmax.f32 %v1128_v9, 0.0 }
 0x10a   : > { %v6456_v14 = vpop.f32.mrf.mxu0  ;;  %6694 = vmatmul.mubr.msk.f32.gmra.mxu1 %vm471_vm0, %v1822_v8  ;;  %v7870_v27 = vpop.f32.mrf.mxu1 }
 0x10b   : > { %v1823_v16 = vmax.f32 %v1123_v11, 0.0  ;;  %v1138_v19 = vadd.f32 %v6456_v14, %v7766_v40 }
 0x10c   : > { %v1132_v21 = vpop.f32.mrf.mxu0  ;;  %v7875_v34 = vpop.f32.mrf.mxu1 }
 0x10d   : > { %v1133_v22 = vadd.f32 %v7766_v40, %v1132_v21  ;;  %6696 = vmatprep.mubr.msk.f32.mxu1 %vm471_vm0, %v1823_v16  ;;  %v1826_v29 = vmax.f32 %v1138_v19, 0.0 }
 0x10e   : > { %v6459_v25 = vpop.f32.mrf.mxu0  ;;  %6697 = vmatmul.mubr.msk.f32.gmra.mxu1 %vm471_vm0, %v1824_v18  ;;  %v7878_v38 = vpop.f32.mrf.mxu1 }
 0x10f   : > { %v1825_v26 = vmax.f32 %v1133_v22, 0.0  ;;  %v1148_v30 = vadd.f32 %v6459_v25, %v7766_v40 }
 0x110   : > { %v1142_v32 = vpop.f32.mrf.mxu0  ;;  %v7883_v46 = vpop.f32.mrf.mxu1 }
 0x111   : > { %v1143_v33 = vadd.f32 %v7766_v40, %v1142_v32  ;;  %6699 = vmatprep.mubr.msk.f32.mxu1 %vm471_vm0, %v1825_v26  ;;  %v1828_v41 = vmax.f32 %v1148_v30, 0.0 }
 0x112   : > { %v6462_v35 = vpop.f32.mrf.mxu0  ;;  %6700 = vmatmul.mubr.msk.f32.gmra.mxu1 %vm471_vm0, %v1826_v29  ;;  %v7886_v50 = vpop.f32.mrf.mxu1 }
 0x113   : > { %v1827_v37 = vmax.f32 %v1143_v33, 0.0  ;;  %v1158_v42 = vadd.f32 %v6462_v35, %v7766_v40 }
 0x114   : > { %v1152_v43 = vpop.f32.mrf.mxu0  ;;  %v7891_v58 = vpop.f32.mrf.mxu1 }
 0x115   : > { %v1153_v44 = vadd.f32 %v7766_v40, %v1152_v43  ;;  %6702 = vmatprep.mubr.msk.f32.mxu1 %vm471_vm0, %v1827_v37  ;;  %v1830_v51 = vmax.f32 %v1158_v42, 0.0 }
 0x116   : > { %v6465_v47 = vpop.f32.mrf.mxu0  ;;  %6703 = vmatmul.mubr.msk.f32.gmra.mxu1 %vm471_vm0, %v1828_v41  ;;  %v7894_v0 = vpop.f32.mrf.mxu1 }
 0x117   : > { %v1829_v49 = vmax.f32 %v1153_v44, 0.0  ;;  %v1168_v53 = vadd.f32 %v6465_v47, %v7766_v40 }
 0x118   : > { %v1162_v54 = vpop.f32.mrf.mxu0  ;;  %v7899_v9 = vpop.f32.mrf.mxu1 }
 0x119   : > { %v1163_v57 = vadd.f32 %v7766_v40, %v1162_v54  ;;  %6705 = vmatprep.mubr.msk.f32.mxu1 %vm471_vm0, %v1829_v49  ;;  %v1832_v1 = vmax.f32 %v1168_v53, 0.0 }
 0x11a   : > { %v6468_v61 = vpop.f32.mrf.mxu0  ;;  %6706 = vmatmul.mubr.msk.f32.gmra.mxu1 %vm471_vm0, %v1830_v51  ;;  %v7902_v14 = vpop.f32.mrf.mxu1 }
 0x11b   : > { %v1831_v62 = vmax.f32 %v1163_v57, 0.0  ;;  %v1178_v3 = vadd.f32 %v6468_v61, %v7766_v40 }
 0x11c   : > { %v1172_v5 = vpop.f32.mrf.mxu0  ;;  %v7907_v22 = vpop.f32.mrf.mxu1 }
 0x11d   : > { %v1173_v8 = vadd.f32 %v7766_v40, %v1172_v5  ;;  %6708 = vmatprep.mubr.msk.f32.mxu1 %vm471_vm0, %v1831_v62  ;;  %v1834_v16 = vmax.f32 %v1178_v3, 0.0 }
 0x11e   : > { %v6471_v10 = vpop.f32.mrf.mxu0  ;;  %6709 = vmatmul.mubr.msk.f32.gmra.mxu1 %vm471_vm0, %v1832_v1  ;;  %v7910_v29 = vpop.f32.mrf.mxu1 }
 0x11f   : > { %v1833_v11 = vmax.f32 %v1173_v8, 0.0  ;;  %v1188_v18 = vadd.f32 %v6471_v10, %v7766_v40 }
 0x120   : > { %v1182_v19 = vpop.f32.mrf.mxu0  ;;  %v7915_v37 = vpop.f32.mrf.mxu1 }
 0x121   : > { %v1183_v21 = vadd.f32 %v7766_v40, %v1182_v19  ;;  %6711 = vmatprep.mubr.msk.f32.mxu1 %vm471_vm0, %v1833_v11  ;;  %v1836_v30 = vmax.f32 %v1188_v18, 0.0 }
 0x122   : > { %v6474_v25 = vpop.f32.mrf.mxu0  ;;  %6712 = vmatmul.mubr.msk.f32.gmra.mxu1 %vm471_vm0, %v1834_v16  ;;  %v7918_v43 = vpop.f32.mrf.mxu1 }
 0x123   : > { %v1835_v26 = vmax.f32 %v1183_v21, 0.0  ;;  %v1198_v32 = vadd.f32 %v6474_v25, %v7766_v40 }
 0x124   : > { %v1192_v33 = vpop.f32.mrf.mxu0  ;;  %v7923_v53 = vpop.f32.mrf.mxu1 }
 0x125   : > { %v1193_v35 = vadd.f32 %v7766_v40, %v1192_v33  ;;  %6714 = vmatprep.mubr.msk.f32.mxu1 %vm471_vm0, %v1835_v26  ;;  %v1838_v44 = vmax.f32 %v1198_v32, 0.0 }
 0x126   : > { %v6477_v41 = vpop.f32.mrf.mxu0  ;;  %6715 = vmatmul.mubr.msk.f32.gmra.mxu1 %vm471_vm0, %v1836_v30  ;;  %v7926_v61 = vpop.f32.mrf.mxu1 }
 0x127   : > { %v1837_v42 = vmax.f32 %v1193_v35, 0.0  ;;  %v1208_v47 = vadd.f32 %v6477_v41, %v7766_v40 }
 0x128   : > { %v1202_v49 = vpop.f32.mrf.mxu0  ;;  %v7931_v8 = vpop.f32.mrf.mxu1 }
 0x129   : > { %v1203_v51 = vadd.f32 %v7766_v40, %v1202_v49  ;;  %6717 = vmatprep.mubr.msk.f32.mxu1 %vm471_vm0, %v1837_v42  ;;  %v1840_v62 = vmax.f32 %v1208_v47, 0.0 }
 0x12a   : > { %v6480_v54 = vpop.f32.mrf.mxu0  ;;  %6718 = vmatmul.mubr.msk.f32.gmra.mxu1 %vm471_vm0, %v1838_v44  ;;  %v7934_v16 = vpop.f32.mrf.mxu1 }
 0x12b   : > { %v1839_v57 = vmax.f32 %v1203_v51, 0.0  ;;  %v1218_v1 = vadd.f32 %v6480_v54, %v7766_v40 }
 0x12c   : > { %v1212_v3 = vpop.f32.mrf.mxu0  ;;  %v7939_v26 = vpop.f32.mrf.mxu1 }
 0x12d   : > { %v1213_v5 = vadd.f32 %v7766_v40, %v1212_v3  ;;  %6720 = vmatprep.mubr.msk.f32.mxu1 %vm471_vm0, %v1839_v57  ;;  %v1842_v18 = vmax.f32 %v1218_v1, 0.0 }
 0x12e   : > { %v6483_v10 = vpop.f32.mrf.mxu0  ;;  %6721 = vmatmul.mubr.msk.f32.gmra.mxu1 %vm471_vm0, %v1840_v62  ;;  %v7942_v33 = vpop.f32.mrf.mxu1 }
 0x12f   : > { %v1841_v11 = vmax.f32 %v1213_v5, 0.0  ;;  %v1228_v19 = vadd.f32 %v6483_v10, %v7766_v40 }
 0x130   : > { %v1222_v21 = vpop.f32.mrf.mxu0  ;;  %v7947_v47 = vpop.f32.mrf.mxu1 }
 0x131   : > { %v1223_v25 = vadd.f32 %v7766_v40, %v1222_v21  ;;  %6723 = vmatprep.mubr.msk.f32.mxu1 %vm471_vm0, %v1841_v11  ;;  %v1844_v35 = vmax.f32 %v1228_v19, 0.0 }
 0x132   : > { %v6486_v30 = vpop.f32.mrf.mxu0  ;;  %6724 = vmatmul.mubr.msk.f32.gmra.mxu1 %vm471_vm0, %v1842_v18  ;;  %v7950_v54 = vpop.f32.mrf.mxu1 }
 0x133   : > { %v1843_v32 = vmax.f32 %v1223_v25, 0.0  ;;  %v1238_v41 = vadd.f32 %v6486_v30, %v7766_v40 }
 0x134   : > { %v1232_v42 = vpop.f32.mrf.mxu0  ;;  %v7955_v5 = vpop.f32.mrf.mxu1 }
 0x135   : > { %v1233_v44 = vadd.f32 %v7766_v40, %v1232_v42  ;;  %6726 = vmatprep.mubr.msk.f32.mxu1 %vm471_vm0, %v1843_v32  ;;  %v1846_v57 = vmax.f32 %v1238_v41, 0.0 }
 0x136   : > { %v6489_v49 = vpop.f32.mrf.mxu0  ;;  %6727 = vmatmul.mubr.msk.f32.gmra.mxu1 %vm471_vm0, %v1844_v35  ;;  %v7958_v18 = vpop.f32.mrf.mxu1 }
 0x137   : > { %v1845_v51 = vmax.f32 %v1233_v44, 0.0  ;;  %v1248_v62 = vadd.f32 %v6489_v49, %v7766_v40 }
 0x138   : > { %v1242_v1 = vpop.f32.mrf.mxu0  ;;  %v7963_v32 = vpop.f32.mrf.mxu1 }
 0x139   : > { %v1243_v3 = vadd.f32 %v7766_v40, %v1242_v1  ;;  %6729 = vmatprep.mubr.msk.f32.mxu1 %vm471_vm0, %v1845_v51  ;;  %v1848_v19 = vmax.f32 %v1248_v62, 0.0 }
 0x13a   : > { %v6492_v10 = vpop.f32.mrf.mxu0  ;;  %6730 = vmatmul.mubr.msk.f32.gmra.mxu1 %vm471_vm0, %v1846_v57  ;;  %v7966_v42 = vpop.f32.mrf.mxu1 }
 0x13b   : > { %v1847_v11 = vmax.f32 %v1243_v3, 0.0  ;;  %v1258_v21 = vadd.f32 %v6492_v10, %v7766_v40 }
 0x13c   : > { %v1252_v25 = vpop.f32.mrf.mxu0  ;;  %v7971_v62 = vpop.f32.mrf.mxu1 }
 0x13d   : > { %v1253_v30 = vadd.f32 %v7766_v40, %v1252_v25  ;;  %6732 = vmatprep.mubr.msk.f32.mxu1 %vm471_vm0, %v1847_v11  ;;  %v1850_v44 = vmax.f32 %v1258_v21, 0.0  ;;  %9358 = vst [vmem:[#allocation5_spill] sm:$0xff] %v7971_v62 }
 0x13e   : > { %v6495_v35 = vpop.f32.mrf.mxu0  ;;  %6733 = vmatmul.mubr.msk.f32.gmra.mxu1 %vm471_vm0, %v1848_v19  ;;  %v7974_v10 = vpop.f32.mrf.mxu1 }
 0x13f   : > { %v1849_v41 = vmax.f32 %v1253_v30, 0.0  ;;  %v1268_v49 = vadd.f32 %v6495_v35, %v7766_v40  ;;  %9359 = vst [vmem:[#allocation6_spill] sm:$0xff] %v7974_v10 }
 0x140   : > { %v1262_v51 = vpop.f32.mrf.mxu0  ;;  %v7979_v30 = vpop.f32.mrf.mxu1 }
 0x141   : > { %v1263_v57 = vadd.f32 %v7766_v40, %v1262_v51  ;;  %6735 = vmatprep.mubr.msk.f32.mxu1 %vm471_vm0, %v1849_v41  ;;  %v1852_v11 = vmax.f32 %v1268_v49, 0.0  ;;  %9360 = vst [vmem:[#allocation7_spill] sm:$0xff] %v7979_v30 }
 0x142   : > { %v6498_v1 = vpop.f32.mrf.mxu0  ;;  %6736 = vmatmul.mubr.msk.f32.gmra.mxu1 %vm471_vm0, %v1850_v44  ;;  %v7982_v51 = vpop.f32.mrf.mxu1 }
 0x143   : > { %v1851_v3 = vmax.f32 %v1263_v57, 0.0  ;;  %v1278_v19 = vadd.f32 %v6498_v1, %v7766_v40  ;;  %9361 = vst [vmem:[#allocation8_spill] sm:$0xff] %v7982_v51 }
 0x144   : > { %v1272_v25 = vpop.f32.mrf.mxu0  ;;  %v7987_v1 = vpop.f32.mrf.mxu1 }
 0x145   : > { %v1273_v21 = vadd.f32 %v7766_v40, %v1272_v25  ;;  %6738 = vmatprep.mubr.msk.f32.mxu1 %vm471_vm0, %v1851_v3  ;;  %v1854_v44 = vmax.f32 %v1278_v19, 0.0  ;;  %9362 = vst [vmem:[#allocation9_spill] sm:$0xff] %v7987_v1 }
 0x146   : > { %v6501_v35 = vpop.f32.mrf.mxu0  ;;  %6739 = vmatmul.mubr.msk.f32.gmra.mxu1 %vm471_vm0, %v1852_v11  ;;  %v7990_v30 = vpop.f32.mrf.mxu1 }
 0x147   : > { %v1853_v41 = vmax.f32 %v1273_v21, 0.0  ;;  %v1288_v57 = vadd.f32 %v6501_v35, %v7766_v40  ;;  %9363 = vst [vmem:[#allocation10_spill] sm:$0xff] %v7990_v30 }
 0x148   : > { %v1282_v62 = vpop.f32.mrf.mxu0  ;;  %v7995_v35 = vpop.f32.mrf.mxu1 }
 0x149   : > { %v1283_v49 = vadd.f32 %v7766_v40, %v1282_v62  ;;  %6741 = vmatprep.mubr.msk.f32.mxu1 %vm471_vm0, %v1853_v41  ;;  %v1856_v11 = vmax.f32 %v1288_v57, 0.0  ;;  %9364 = vst [vmem:[#allocation11_spill] sm:$0xff] %v7995_v35 }
 0x14a   : > { %v6504_v25 = vpop.f32.mrf.mxu0  ;;  %6742 = vmatmul.mubr.msk.f32.gmra.mxu1 %vm471_vm0, %v1854_v44  ;;  %v7998_v1 = vpop.f32.mrf.mxu1 }
 0x14b   : > { %v1855_v3 = vmax.f32 %v1283_v49, 0.0  ;;  %v1298_v21 = vadd.f32 %v6504_v25, %v7766_v40  ;;  %9365 = vst [vmem:[#allocation12_spill] sm:$0xff] %v7998_v1 }
 0x14c   : > { %v1292_v51 = vpop.f32.mrf.mxu0  ;;  %v8003_v25 = vpop.f32.mrf.mxu1 }
 0x14d   : > { %v1293_v19 = vadd.f32 %v7766_v40, %v1292_v51  ;;  %6744 = vmatprep.mubr.msk.f32.mxu1 %vm471_vm0, %v1855_v3  ;;  %v1858_v44 = vmax.f32 %v1298_v21, 0.0  ;;  %9366 = vst [vmem:[#allocation13_spill] sm:$0xff] %v8003_v25 }
 0x14e   : > { %v6507_v62 = vpop.f32.mrf.mxu0  ;;  %6745 = vmatmul.mubr.msk.f32.gmra.mxu1 %vm471_vm0, %v1856_v11  ;;  %v8006_v35 = vpop.f32.mrf.mxu1 }
 0x14f   : > { %v1857_v41 = vmax.f32 %v1293_v19, 0.0  ;;  %v1308_v49 = vadd.f32 %v6507_v62, %v7766_v40  ;;  %9367 = vst [vmem:[#allocation14_spill] sm:$0xff] %v8006_v35 }
 0x150   : > { %v1302_v30 = vpop.f32.mrf.mxu0  ;;  %v8011_v62 = vpop.f32.mrf.mxu1 }
 0x151   : > { %v1303_v57 = vadd.f32 %v7766_v40, %v1302_v30  ;;  %6747 = vmatprep.mubr.msk.f32.mxu1 %vm471_vm0, %v1857_v41  ;;  %v1860_v11 = vmax.f32 %v1308_v49, 0.0  ;;  %9368 = vst [vmem:[#allocation15_spill] sm:$0xff] %v8011_v62 }
 0x152   : > { %v6510_v51 = vpop.f32.mrf.mxu0  ;;  %6748 = vmatmul.mubr.msk.f32.gmra.mxu1 %vm471_vm0, %v1858_v44  ;;  %v8015_v10 = vpop.f32.mrf.mxu1 }
 0x153   : > { %v1859_v3 = vmax.f32 %v1303_v57, 0.0  ;;  %v1318_v19 = vadd.f32 %v6510_v51, %v7766_v40  ;;  %9369 = vst [vmem:[#allocation16_spill] sm:$0xff] %v8015_v10 }
 0x154   : > { %v1312_v1 = vpop.f32.mrf.mxu0 }
 0x155   : > { %v1313_v21 = vadd.f32 %v7766_v40, %v1312_v1  ;;  %6750 = vmatprep.mubr.msk.f32.mxu1 %vm471_vm0, %v1859_v3  ;;  %v1862_v25 = vmax.f32 %v1318_v19, 0.0 }
 0x156   : > { %v6513_v30 = vpop.f32.mrf.mxu0  ;;  %6751 = vmatmul.mubr.msk.f32.gmra.mxu1 %vm471_vm0, %v1860_v11  ;;  %v8021_v11 = vpop.f32.mrf.mxu1 }
 0x157   : > { %v1861_v41 = vmax.f32 %v1313_v21, 0.0  ;;  %v1328_v44 = vadd.f32 %v6513_v30, %v7766_v40  ;;  %9370 = vst [vmem:[#allocation17_spill] sm:$0xff] %v8021_v11 }
 0x158   : > { %v1322_v57 = vpop.f32.mrf.mxu0 }
 0x159   : > { %v1323_v49 = vadd.f32 %v7766_v40, %v1322_v57  ;;  %6753 = vmatprep.mubr.msk.f32.mxu1 %vm471_vm0, %v1861_v41  ;;  %v1864_v3 = vmax.f32 %v1328_v44, 0.0 }
 0x15a   : > { %v6516_v51 = vpop.f32.mrf.mxu0  ;;  %6754 = vmatmul.mubr.msk.f32.gmra.mxu1 %vm471_vm0, %v1862_v25  ;;  %v8027_v25 = vpop.f32.mrf.mxu1 }
 0x15b   : > { %v1863_v1 = vmax.f32 %v1323_v49, 0.0  ;;  %v1338_v62 = vadd.f32 %v6516_v51, %v7766_v40  ;;  %9371 = vst [vmem:[#allocation18_spill] sm:$0xff] %v8027_v25 }
 0x15c   : > { %v1332_v35 = vpop.f32.mrf.mxu0 }
 0x15d   : > { %v1333_v19 = vadd.f32 %v7766_v40, %v1332_v35  ;;  %6756 = vmatprep.mubr.msk.f32.mxu1 %vm471_vm0, %v1863_v1  ;;  %v1866_v57 = vmax.f32 %v1338_v62, 0.0 }
 0x15e   : > { %v6519_v21 = vpop.f32.mrf.mxu0  ;;  %6757 = vmatmul.mubr.msk.f32.gmra.mxu1 %vm471_vm0, %v1864_v3  ;;  %v8033_v3 = vpop.f32.mrf.mxu1 }
 0x15f   : > { %v1865_v30 = vmax.f32 %v1333_v19, 0.0  ;;  %v1348_v41 = vadd.f32 %v6519_v21, %v7766_v40  ;;  %9372 = vst [vmem:[#allocation19_spill] sm:$0xff] %v8033_v3 }
 0x160   : > { %v1342_v10 = vpop.f32.mrf.mxu0 }
 0x161   : > { %v1343_v44 = vadd.f32 %v7766_v40, %v1342_v10  ;;  %6759 = vmatprep.mubr.msk.f32.mxu1 %vm471_vm0, %v1865_v30  ;;  %v1868_v51 = vmax.f32 %v1348_v41, 0.0 }
 0x162   : > { %v6522_v49 = vpop.f32.mrf.mxu0  ;;  %6760 = vmatmul.mubr.msk.f32.gmra.mxu1 %vm471_vm0, %v1866_v57  ;;  %v8039_v57 = vpop.f32.mrf.mxu1 }
 0x163   : > { %v1867_v35 = vmax.f32 %v1343_v44, 0.0  ;;  %v1358_v1 = vadd.f32 %v6522_v49, %v7766_v40  ;;  %9373 = vst [vmem:[#allocation20_spill] sm:$0xff] %v8039_v57 }
 0x164   : > { %v1352_v11 = vpop.f32.mrf.mxu0 }
 0x165   : > { %v1353_v62 = vadd.f32 %v7766_v40, %v1352_v11  ;;  %6762 = vmatprep.mubr.msk.f32.mxu1 %vm471_vm0, %v1867_v35  ;;  %v1870_v21 = vmax.f32 %v1358_v1, 0.0 }
 0x166   : > { %v6525_v19 = vpop.f32.mrf.mxu0  ;;  %6763 = vmatmul.mubr.msk.f32.gmra.mxu1 %vm471_vm0, %v1868_v51  ;;  %v8045_v51 = vpop.f32.mrf.mxu1 }
 0x167   : > { %v1869_v10 = vmax.f32 %v1353_v62, 0.0  ;;  %v1368_v30 = vadd.f32 %v6525_v19, %v7766_v40  ;;  %9374 = vst [vmem:[#allocation21_spill] sm:$0xff] %v8045_v51 }
 0x168   : > { %v1362_v25 = vpop.f32.mrf.mxu0 }
 0x169   : > { %v1363_v41 = vadd.f32 %v7766_v40, %v1362_v25  ;;  %6765 = vmatprep.mubr.msk.f32.mxu1 %vm471_vm0, %v1869_v10  ;;  %v1872_v49 = vmax.f32 %v1368_v30, 0.0 }
 0x16a   : > { %v6528_v44 = vpop.f32.mrf.mxu0  ;;  %6766 = vmatmul.mubr.msk.f32.gmra.mxu1 %vm471_vm0, %v1870_v21  ;;  %v8051_v21 = vpop.f32.mrf.mxu1 }
 0x16b   : > { %v1871_v11 = vmax.f32 %v1363_v41, 0.0  ;;  %v1378_v35 = vadd.f32 %v6528_v44, %v7766_v40  ;;  %9375 = vst [vmem:[#allocation22_spill] sm:$0xff] %v8051_v21 }
 0x16c   : > { %v1372_v3 = vpop.f32.mrf.mxu0 }
 0x16d   : > { %v1373_v1 = vadd.f32 %v7766_v40, %v1372_v3  ;;  %6768 = vmatprep.mubr.msk.f32.mxu1 %vm471_vm0, %v1871_v11  ;;  %v1874_v19 = vmax.f32 %v1378_v35, 0.0 }
 0x16e   : > { %v6531_v62 = vpop.f32.mrf.mxu0  ;;  %6769 = vmatmul.mubr.msk.f32.gmra.mxu1 %vm471_vm0, %v1872_v49  ;;  %v8057_v49 = vpop.f32.mrf.mxu1 }
 0x16f   : > { %v1873_v25 = vmax.f32 %v1373_v1, 0.0  ;;  %v1388_v10 = vadd.f32 %v6531_v62, %v7766_v40 }
 0x170   : > { %v1382_v57 = vpop.f32.mrf.mxu0 }
 0x171   : > { %v1383_v30 = vadd.f32 %v7766_v40, %v1382_v57  ;;  %6771 = vmatprep.mubr.msk.f32.mxu1 %vm471_vm0, %v1873_v25  ;;  %v1876_v44 = vmax.f32 %v1388_v10, 0.0  ;;  %v1413_v10 = vadd.f32 %v7766_v40, %v7779_v55 }
 0x172   : > { %v6534_v41 = vpop.f32.mrf.mxu0  ;;  %6772 = vmatmul.mubr.msk.f32.gmra.mxu1 %vm471_vm0, %v1874_v19  ;;  %v8063_v19 = vpop.f32.mrf.mxu1 }
 0x173   : > { %v1875_v3 = vmax.f32 %v1383_v30, 0.0  ;;  %v1398_v11 = vadd.f32 %v6534_v41, %v7766_v40  ;;  %v1418_v41 = vadd.f32 %v7776_v52, %v7766_v40 }
 0x174   : > { %v1392_v51 = vpop.f32.mrf.mxu0 }
 0x175   : > { %v1393_v35 = vadd.f32 %v7766_v40, %v1392_v51  ;;  %6774 = vmatprep.mubr.msk.f32.mxu1 %vm471_vm0, %v1875_v3  ;;  %v1878_v62 = vmax.f32 %v1398_v11, 0.0  ;;  %v1881_v11 = vmax.f32 %v1413_v10, 0.0  ;;  %v1882_v55 = vmax.f32 %v1418_v41, 0.0 }
 0x176   : > { %v6537_v1 = vpop.f32.mrf.mxu0  ;;  %6775 = vmatmul.mubr.msk.f32.gmra.mxu1 %vm471_vm0, %v1876_v44  ;;  %v8072_v44 = vpop.f32.mrf.mxu1 }
 0x177   : > { %v1877_v57 = vmax.f32 %v1393_v35, 0.0  ;;  %v1408_v25 = vadd.f32 %v6537_v1, %v7766_v40  ;;  %v1423_v35 = vadd.f32 %v7766_v40, %v7787_v63 }
 0x178   : > { %v1402_v21 = vpop.f32.mrf.mxu0  ;;  %v8081_v1 = vpop.f32.mrf.mxu1 }
 0x179   : > { %v1403_v30 = vadd.f32 %v7766_v40, %v1402_v21  ;;  %6777 = vmatprep.mubr.msk.f32.mxu1 %vm471_vm0, %v1877_v57  ;;  %v1880_v3 = vmax.f32 %v1408_v25, 0.0  ;;  %v1428_v21 = vadd.f32 %v7784_v60, %v7766_v40  ;;  %v1883_v52 = vmax.f32 %v1423_v35, 0.0 }
 0x17a   : > { %6778 = vmatmul.mubr.msk.f32.gmra.mxu1 %vm471_vm0, %v1878_v62  ;;  %v1433_v57 = vadd.f32 %v7766_v40, %v7795_v7  ;;  %v1438_v62 = vadd.f32 %v7792_v4, %v7766_v40  ;;  %v8089_v25 = vpop.f32.mrf.mxu1  ;;  %v1443_v60 = vadd.f32 %v7766_v40, %v7803_v15  ;;  %v1448_v7 = vadd.f32 %v7800_v12, %v7766_v40 }
 0x17b   : > { %v1879_v51 = vmax.f32 %v1403_v30, 0.0  ;;  %v1884_v63 = vmax.f32 %v1428_v21, 0.0  ;;  %v1453_v4 = vadd.f32 %v7766_v40, %v7811_v23  ;;  %v1458_v15 = vadd.f32 %v7808_v20, %v7766_v40 }
 0x17c   : > { %v1885_v10 = vmax.f32 %v1433_v57, 0.0  ;;  %v1886_v30 = vmax.f32 %v1438_v62, 0.0  ;;  %v1887_v41 = vmax.f32 %v1443_v60, 0.0  ;;  %v1463_v12 = vadd.f32 %v7766_v40, %v7819_v31 }
 0x17d   : > { %6780 = vmatprep.mubr.msk.f32.mxu1 %vm471_vm0, %v1879_v51  ;;  %v8097_v51 = vpop.f32.mrf.mxu1  ;;  %v1889_v35 = vmax.f32 %v1453_v4, 0.0  ;;  %v1468_v23 = vadd.f32 %v7816_v28, %v7766_v40  ;;  %v1473_v20 = vadd.f32 %v7766_v40, %v7827_v39  ;;  %v1478_v31 = vadd.f32 %v7824_v36, %v7766_v40 }
 0x17e   : > { %6781 = vmatmul.mubr.msk.f32.gmra.mxu1 %vm471_vm0, %v1880_v3  ;;  %v1888_v3 = vmax.f32 %v1448_v7, 0.0  ;;  %v1483_v28 = vadd.f32 %v7766_v40, %v7835_v48  ;;  %v1488_v39 = vadd.f32 %v7832_v45, %v7766_v40  ;;  %v1493_v36 = vadd.f32 %v7766_v40, %v7846_v59 }
 0x17f   : > { %6783 = vmatprep.mubr.msk.f32.mxu1 %vm471_vm0, %v1881_v11  ;;  %v8105_v11 = vpop.f32.mrf.mxu1  ;;  %v1892_v57 = vmax.f32 %v1468_v23, 0.0  ;;  %v1893_v62 = vmax.f32 %v1473_v20, 0.0  ;;  %v1498_v48 = vadd.f32 %v7843_v56, %v7766_v40  ;;  %v1503_v45 = vadd.f32 %v7766_v40, %v7854_v6 }
 0x180   : > { %v1896_v7 = vmax.f32 %v1488_v39, 0.0  ;;  %v1897_v4 = vmax.f32 %v1493_v36, 0.0  ;;  %v1508_v59 = vadd.f32 %v7851_v2, %v7766_v40  ;;  %v1513_v56 = vadd.f32 %v7766_v40, %v7862_v17 }
 0x181   : > { %v8113_v21 = vpop.f32.mrf.mxu1  ;;  %v1518_v2 = vadd.f32 %v7859_v13, %v7766_v40  ;;  %v1523_v17 = vadd.f32 %v7766_v40, %v7870_v27  ;;  %v1533_v27 = vadd.f32 %v7766_v40, %v7878_v38 }
 0x182   : > { %6784 = vmatmul.mubr.msk.f32.gmra.mxu1 %vm471_vm0, %v1882_v55  ;;  %v1890_v55 = vmax.f32 %v1458_v15, 0.0  ;;  %v1901_v20 = vmax.f32 %v1513_v56, 0.0  ;;  %v1543_v56 = vadd.f32 %v7766_v40, %v7886_v50 }
 0x183   : > { %6786 = vmatprep.mubr.msk.f32.mxu1 %vm471_vm0, %v1883_v52  ;;  %v1891_v52 = vmax.f32 %v1463_v12, 0.0  ;;  %v8152_v12 = vld [vmem:[%s9353_s5] ss:$0 sm:$0xff]  ;;  %v1903_v36 = vmax.f32 %v1523_v17, 0.0 }
 0x184   : > { %v1907_v17 = vmax.f32 %v1543_v56, 0.0 }
 0x186   : > { %6787 = vmatmul.mubr.msk.f32.gmra.mxu1 %vm471_vm0, %v1884_v63  ;;  %v8121_v63 = vpop.f32.mrf.mxu1 }
 0x187   : > { %6789 = vmatprep.mubr.msk.f32.mxu1 %vm471_vm0, %v1885_v10  ;;  %v1894_v10 = vmax.f32 %v1478_v31, 0.0 }
 0x188   : > { %v8129_v60 = vpop.f32.mrf.mxu1 }
 0x18a   : > { %6790 = vmatmul.mubr.msk.f32.gmra.mxu1 %vm471_vm0, %v1886_v30  ;;  %v1895_v30 = vmax.f32 %v1483_v28, 0.0  ;;  %v1902_v28 = vmax.f32 %v1518_v2, 0.0 }
 0x18b   : > { %6792 = vmatprep.mubr.msk.f32.mxu1 %vm471_vm0, %v1887_v41  ;;  %v8137_v41 = vpop.f32.mrf.mxu1 }
 0x18d   : > { %v8145_v15 = vpop.f32.mrf.mxu1 }
 0x18e   : > { %6793 = vmatmul.mubr.msk.f32.gmra.mxu1 %vm471_vm0, %v1888_v3  ;;  %v1898_v3 = vmax.f32 %v1498_v48, 0.0 }
 0x18f   : > { %6795 = vmatprep.mubr.msk.f32.mxu1 %vm471_vm0, %v1889_v35  ;;  %v1899_v35 = vmax.f32 %v1503_v45, 0.0  ;;  %v1538_v45 = vadd.f32 %v7875_v34, %v7766_v40 }
 0x191   : > { %v1906_v34 = vmax.f32 %v1538_v45, 0.0 }
 0x192   : > { %6796 = vmatmul.mubr.msk.f32.gmra.mxu1 %vm471_vm0, %v1890_v55  ;;  %v1900_v55 = vmax.f32 %v1508_v59, 0.0 }
 0x193   : > { %6798 = vmatprep.mubr.msk.f32.mxu1 %vm471_vm0, %v1891_v52 }
 0x196   : > { %6799 = vmatmul.mubr.msk.f32.gmra.mxu1 %vm471_vm0, %v1892_v57 }
 0x197   : > { %6801 = vmatprep.mubr.msk.f32.mxu1 %vm471_vm0, %v1893_v62 }
 0x19a   : > { %6802 = vmatmul.mubr.msk.f32.gmra.mxu1 %vm471_vm0, %v1894_v10  ;;  %v1528_v10 = vadd.f32 %v7867_v24, %v7766_v40 }
 0x19b   : > { %6804 = vmatprep.mubr.msk.f32.mxu1 %vm471_vm0, %v1895_v30 }
 0x19c   : > { %v1904_v24 = vmax.f32 %v1528_v10, 0.0  ;;  %v8197_v10 = vld [vmem:[%s9351_s3] ss:$0 sm:$0xff] }
 0x19e   : > { %6805 = vmatmul.mubr.msk.f32.gmra.mxu1 %vm471_vm0, %v1896_v7 }
 0x19f   : > { %6807 = vmatprep.mubr.msk.f32.mxu1 %vm471_vm0, %v1897_v4 }
 0x1a2   : > { %v6665_v6 = vpop.f32.mrf.mxu1  ;;  %6808 = vmatmul.mubr.msk.f32.gmra.mxu1 %vm471_vm0, %v1898_v3 }
 0x1a3   : > { %6810 = vmatprep.mubr.msk.f32.mxu1 %vm471_vm0, %v1899_v35  ;;  %v2516_v23 = vadd.f32 %v6665_v6, %v8152_v12  ;;  %v1905_v35 = vmax.f32 %v1533_v27, 0.0 }
 0x1a4   : > { %v2510_v52 = vpop.f32.mrf.mxu1 }
 0x1a5   : > { %v2511_v57 = vadd.f32 %v8152_v12, %v2510_v52  ;;  %v3300_v13 = vmax.f32 %v2516_v23, 0.0  ;;  %v1548_v23 = vadd.f32 %v7883_v46, %v7766_v40 }
 0x1a6   : > { %v6668_v31 = vpop.f32.mrf.mxu1  ;;  %6811 = vmatmul.mubr.msk.f32.gmra.mxu1 %vm471_vm0, %v1900_v55 }
 0x1a7   : > { %v3299_v62 = vmax.f32 %v2511_v57, 0.0  ;;  %6813 = vmatprep.mubr.msk.f32.mxu1 %vm471_vm0, %v1901_v20  ;;  %v2526_v39 = vadd.f32 %v6668_v31, %v8152_v12  ;;  %v1553_v57 = vadd.f32 %v7766_v40, %v7894_v0  ;;  %v1908_v46 = vmax.f32 %v1548_v23, 0.0 }
 0x1a8   : > { %v2520_v30 = vpop.f32.mrf.mxu1  ;;  %v1558_v40 = vadd.f32 %v8197_v10, %v7891_v58  ;;  %v1583_v23 = vadd.f32 %v8197_v10, %v7918_v43 }
 0x1a9   : > { %v2521_v7 = vadd.f32 %v8152_v12, %v2520_v30  ;;  %6908 = vmatprep.mubr.msk.f32.mxu0 %vm471_vm0, %v3299_v62  ;;  %v3302_v3 = vmax.f32 %v2526_v39, 0.0  ;;  %v1909_v30 = vmax.f32 %v1553_v57, 0.0 }
 0x1aa   : > { %v6671_v48 = vpop.f32.mrf.mxu1  ;;  %6814 = vmatmul.mubr.msk.f32.gmra.mxu1 %vm471_vm0, %v1902_v28  ;;  %6909 = vmatmul.mubr.msk.f32.vlgmr.msra.gmra.mxu0 %vm471_vm0, %v3300_v13  ;;  %v1910_v58 = vmax.f32 %v1558_v40, 0.0 }
 0x1ab   : > { %v3301_v4 = vmax.f32 %v2521_v7, 0.0  ;;  %6816 = vmatprep.mubr.msk.f32.mxu1 %vm471_vm0, %v1903_v36  ;;  %v2536_v59 = vadd.f32 %v6671_v48, %v8152_v12  ;;  %v1563_v36 = vadd.f32 %v8197_v10, %v7902_v14 }
 0x1ac   : > { %v2530_v38 = vpop.f32.mrf.mxu1 }
 0x1ad   : > { %v2531_v6 = vadd.f32 %v8152_v12, %v2530_v38  ;;  %6911 = vmatprep.mubr.msk.f32.mxu0 %vm471_vm0, %v3301_v4  ;;  %v3304_v52 = vmax.f32 %v2536_v59, 0.0  ;;  %v1568_v4 = vadd.f32 %v8197_v10, %v7899_v9  ;;  %v1573_v59 = vadd.f32 %v8197_v10, %v7910_v29 }
 0x1ae   : > { %v6674_v55 = vpop.f32.mrf.mxu1  ;;  %6817 = vmatmul.mubr.msk.f32.gmra.mxu1 %vm471_vm0, %v1904_v24  ;;  %6912 = vmatmul.mubr.msk.f32.gmra.mxu0 %vm471_vm0, %v3302_v3  ;;  %v1911_v3 = vmax.f32 %v1563_v36, 0.0 }
 0x1af   : > { %v3303_v2 = vmax.f32 %v2531_v6, 0.0  ;;  %6819 = vmatprep.mubr.msk.f32.mxu1 %vm471_vm0, %v1905_v35  ;;  %v2546_v20 = vadd.f32 %v6674_v55, %v8152_v12  ;;  %v1912_v9 = vmax.f32 %v1568_v4, 0.0  ;;  %v1578_v6 = vadd.f32 %v8197_v10, %v7907_v22 }
 0x1b0   : > { %v2540_v50 = vpop.f32.mrf.mxu1  ;;  %v1608_v4 = vadd.f32 %v8197_v10, %v7931_v8 }
 0x1b1   : > { %v2541_v31 = vadd.f32 %v8152_v12, %v2540_v50  ;;  %6914 = vmatprep.mubr.msk.f32.mxu0 %vm471_vm0, %v3303_v2  ;;  %v3306_v0 = vmax.f32 %v2546_v20, 0.0  ;;  %v1914_v22 = vmax.f32 %v1578_v6, 0.0 }
 0x1b2   : > { %v6677_v62 = vpop.f32.mrf.mxu1  ;;  %6820 = vmatmul.mubr.msk.f32.gmra.mxu1 %vm471_vm0, %v1906_v34  ;;  %6915 = vmatmul.mubr.msk.f32.gmra.mxu0 %vm471_vm0, %v3304_v52  ;;  %v1913_v34 = vmax.f32 %v1573_v59, 0.0  ;;  %v1920_v8 = vmax.f32 %v1608_v4, 0.0 }
 0x1b3   : > { %v3305_v28 = vmax.f32 %v2541_v31, 0.0  ;;  %6822 = vmatprep.mubr.msk.f32.mxu1 %vm471_vm0, %v1907_v17  ;;  %v2556_v13 = vadd.f32 %v6677_v62, %v8152_v12  ;;  %v1588_v17 = vadd.f32 %v8197_v10, %v7915_v37  ;;  %v1915_v62 = vmax.f32 %v1583_v23, 0.0 }
 0x1b4   : > { %v2550_v39 = vpop.f32.mrf.mxu1 }
 0x1b5   : > { %v2551_v27 = vadd.f32 %v8152_v12, %v2550_v39  ;;  %6917 = vmatprep.mubr.msk.f32.mxu0 %vm471_vm0, %v3305_v28  ;;  %v3308_v24 = vmax.f32 %v2556_v13, 0.0  ;;  %v1593_v28 = vadd.f32 %v8197_v10, %v7926_v61  ;;  %v1916_v37 = vmax.f32 %v1588_v17, 0.0 }
 0x1b6   : > { %v6680_v7 = vpop.f32.mrf.mxu1  ;;  %6823 = vmatmul.mubr.msk.f32.gmra.mxu1 %vm471_vm0, %v1908_v46  ;;  %6918 = vmatmul.mubr.msk.f32.gmra.mxu0 %vm471_vm0, %v3306_v0  ;;  %v1598_v13 = vadd.f32 %v8197_v10, %v7923_v53  ;;  %v1633_v17 = vadd.f32 %v8197_v10, %v7958_v18 }
 0x1b7   : > { %v3307_v48 = vmax.f32 %v2551_v27, 0.0  ;;  %6825 = vmatprep.mubr.msk.f32.mxu1 %vm471_vm0, %v1909_v30  ;;  %v2566_v45 = vadd.f32 %v6680_v7, %v8152_v12  ;;  %v1917_v36 = vmax.f32 %v1593_v28, 0.0  ;;  %v1603_v27 = vadd.f32 %v8197_v10, %v7934_v16 }
 0x1b8   : > { %v2560_v14 = vpop.f32.mrf.mxu1  ;;  %v1918_v53 = vmax.f32 %v1598_v13, 0.0 }
 0x1b9   : > { %v2561_v38 = vadd.f32 %v8152_v12, %v2560_v14  ;;  %6920 = vmatprep.mubr.msk.f32.mxu0 %vm471_vm0, %v3307_v48  ;;  %v3310_v55 = vmax.f32 %v2566_v45, 0.0  ;;  %v1919_v14 = vmax.f32 %v1603_v27, 0.0 }
 0x1ba   : > { %v6683_v35 = vpop.f32.mrf.mxu1  ;;  %6826 = vmatmul.mubr.msk.f32.gmra.mxu1 %vm471_vm0, %v1910_v58  ;;  %6921 = vmatmul.mubr.msk.f32.gmra.mxu0 %vm471_vm0, %v3308_v24 }
 0x1bb   : > { %v3309_v56 = vmax.f32 %v2561_v38, 0.0  ;;  %6828 = vmatprep.mubr.msk.f32.mxu1 %vm471_vm0, %v1911_v3  ;;  %v2576_v2 = vadd.f32 %v6683_v35, %v8152_v12  ;;  %v1613_v3 = vadd.f32 %v8197_v10, %v7942_v33 }
 0x1bc   : > { %v2570_v29 = vpop.f32.mrf.mxu1 }
 0x1bd   : > { %v2571_v52 = vadd.f32 %v8152_v12, %v2570_v29  ;;  %6923 = vmatprep.mubr.msk.f32.mxu0 %vm471_vm0, %v3309_v56  ;;  %v3312_v57 = vmax.f32 %v2576_v2, 0.0  ;;  %v1618_v56 = vadd.f32 %v8197_v10, %v7939_v26  ;;  %v1623_v2 = vadd.f32 %v8197_v10, %v7950_v54 }
 0x1be   : > { %v6686_v20 = vpop.f32.mrf.mxu1  ;;  %6829 = vmatmul.mubr.msk.f32.gmra.mxu1 %vm471_vm0, %v1912_v9  ;;  %6924 = vmatmul.mubr.msk.f32.gmra.mxu0 %vm471_vm0, %v3310_v55  ;;  %v1921_v55 = vmax.f32 %v1613_v3, 0.0 }
 0x1bf   : > { %v3311_v50 = vmax.f32 %v2571_v52, 0.0  ;;  %6831 = vmatprep.mubr.msk.f32.mxu1 %vm471_vm0, %v1913_v34  ;;  %v2586_v31 = vadd.f32 %v6686_v20, %v8152_v12  ;;  %v1922_v26 = vmax.f32 %v1618_v56, 0.0  ;;  %v1628_v52 = vadd.f32 %v8197_v10, %v7947_v47 }
 0x1c0   : > { %v2580_v43 = vpop.f32.mrf.mxu1 }
 0x1c1   : > { %v2581_v46 = vadd.f32 %v8152_v12, %v2580_v43  ;;  %6926 = vmatprep.mubr.msk.f32.mxu0 %vm471_vm0, %v3311_v50  ;;  %v3314_v39 = vmax.f32 %v2586_v31, 0.0  ;;  %v1924_v47 = vmax.f32 %v1628_v52, 0.0 }
 0x1c2   : > { %v6689_v40 = vpop.f32.mrf.mxu1  ;;  %6832 = vmatmul.mubr.msk.f32.gmra.mxu1 %vm471_vm0, %v1914_v22  ;;  %6927 = vmatmul.mubr.msk.f32.gmra.mxu0 %vm471_vm0, %v3312_v57  ;;  %v1923_v22 = vmax.f32 %v1623_v2, 0.0 }
 0x1c3   : > { %v3313_v0 = vmax.f32 %v2581_v46, 0.0  ;;  %6834 = vmatprep.mubr.msk.f32.mxu1 %vm471_vm0, %v1915_v62  ;;  %v2596_v30 = vadd.f32 %v6689_v40, %v8152_v12  ;;  %v1638_v62 = vadd.f32 %v8197_v10, %v7955_v5  ;;  %v1925_v40 = vmax.f32 %v1633_v17, 0.0  ;;  %v9381_v17 = vld [vmem:[#allocation9_spill] sm:$0xff] }
 0x1c4   : > { %v2590_v61 = vpop.f32.mrf.mxu1 }
 0x1c5   : > { %v2591_v7 = vadd.f32 %v8152_v12, %v2590_v61  ;;  %6929 = vmatprep.mubr.msk.f32.mxu0 %vm471_vm0, %v3313_v0  ;;  %v3316_v24 = vmax.f32 %v2596_v30, 0.0  ;;  %v1643_v0 = vadd.f32 %v8197_v10, %v7966_v42  ;;  %v1926_v5 = vmax.f32 %v1638_v62, 0.0 }
 0x1c6   : > { %v6692_v48 = vpop.f32.mrf.mxu1  ;;  %6835 = vmatmul.mubr.msk.f32.gmra.mxu1 %vm471_vm0, %v1916_v37  ;;  %6930 = vmatmul.mubr.msk.f32.gmra.mxu0 %vm471_vm0, %v3314_v39  ;;  %v1648_v30 = vadd.f32 %v8197_v10, %v7963_v32 }
 0x1c7   : > { %v3315_v58 = vmax.f32 %v2591_v7, 0.0  ;;  %6837 = vmatprep.mubr.msk.f32.mxu1 %vm471_vm0, %v1917_v36  ;;  %v2606_v45 = vadd.f32 %v6692_v48, %v8152_v12  ;;  %v1927_v27 = vmax.f32 %v1643_v0, 0.0  ;;  %v9376_v7 = vld [vmem:[#allocation6_spill] sm:$0xff] }
 0x1c8   : > { %v2600_v16 = vpop.f32.mrf.mxu1  ;;  %v1653_v48 = vadd.f32 %v8197_v10, %v9376_v7  ;;  %v1928_v32 = vmax.f32 %v1648_v30, 0.0 }
 0x1c9   : > { %v2601_v59 = vadd.f32 %v8152_v12, %v2600_v16  ;;  %6932 = vmatprep.mubr.msk.f32.mxu0 %vm471_vm0, %v3315_v58  ;;  %v3318_v9 = vmax.f32 %v2606_v45, 0.0 }
 0x1ca   : > { %v6695_v38 = vpop.f32.mrf.mxu1  ;;  %6838 = vmatmul.mubr.msk.f32.gmra.mxu1 %vm471_vm0, %v1918_v53  ;;  %6933 = vmatmul.mubr.msk.f32.gmra.mxu0 %vm471_vm0, %v3316_v24  ;;  %v9377_v24 = vld [vmem:[#allocation5_spill] sm:$0xff] }
 0x1cb   : > { %v3317_v35 = vmax.f32 %v2601_v59, 0.0  ;;  %6840 = vmatprep.mubr.msk.f32.mxu1 %vm471_vm0, %v1919_v14  ;;  %v2616_v6 = vadd.f32 %v6695_v38, %v8152_v12  ;;  %v1658_v45 = vadd.f32 %v8197_v10, %v9377_v24  ;;  %v1929_v59 = vmax.f32 %v1653_v48, 0.0  ;;  %v9378_v38 = vld [vmem:[#allocation8_spill] sm:$0xff] }
 0x1cc   : > { %v2610_v33 = vpop.f32.mrf.mxu1 }
 0x1cd   : > { %v2611_v29 = vadd.f32 %v8152_v12, %v2610_v33  ;;  %6935 = vmatprep.mubr.msk.f32.mxu0 %vm471_vm0, %v3317_v35  ;;  %v3320_v20 = vmax.f32 %v2616_v6, 0.0  ;;  %v1663_v35 = vadd.f32 %v8197_v10, %v9378_v38  ;;  %v1930_v6 = vmax.f32 %v1658_v45, 0.0  ;;  %v9379_v33 = vld [vmem:[#allocation7_spill] sm:$0xff] }
 0x1ce   : > { %v6698_v34 = vpop.f32.mrf.mxu1  ;;  %6841 = vmatmul.mubr.msk.f32.gmra.mxu1 %vm471_vm0, %v1920_v8  ;;  %6936 = vmatmul.mubr.msk.f32.gmra.mxu0 %vm471_vm0, %v3318_v9 }
 0x1cf   : > { %v3319_v23 = vmax.f32 %v2611_v29, 0.0  ;;  %6843 = vmatprep.mubr.msk.f32.mxu1 %vm471_vm0, %v1921_v55  ;;  %v2626_v50 = vadd.f32 %v6698_v34, %v8152_v12  ;;  %v1668_v55 = vadd.f32 %v8197_v10, %v9379_v33 }
 0x1d0   : > { %v2620_v54 = vpop.f32.mrf.mxu1 }
 0x1d1   : > { %v2621_v57 = vadd.f32 %v8152_v12, %v2620_v54  ;;  %6938 = vmatprep.mubr.msk.f32.mxu0 %vm471_vm0, %v3319_v23  ;;  %v3322_v28 = vmax.f32 %v2626_v50, 0.0  ;;  %v1931_v23 = vmax.f32 %v1663_v35, 0.0 }
 0x1d2   : > { %v6701_v31 = vpop.f32.mrf.mxu1  ;;  %6844 = vmatmul.mubr.msk.f32.gmra.mxu1 %vm471_vm0, %v1922_v26  ;;  %6939 = vmatmul.mubr.msk.f32.gmra.mxu0 %vm471_vm0, %v3320_v20  ;;  %v9380_v26 = vld [vmem:[#allocation10_spill] sm:$0xff] }
 0x1d3   : > { %v3321_v43 = vmax.f32 %v2621_v57, 0.0  ;;  %6846 = vmatprep.mubr.msk.f32.mxu1 %vm471_vm0, %v1923_v22  ;;  %v2636_v46 = vadd.f32 %v6701_v31, %v8152_v12  ;;  %v1673_v52 = vadd.f32 %v8197_v10, %v9380_v26  ;;  %v1932_v22 = vmax.f32 %v1668_v55, 0.0 }
 0x1d4   : > { %v2630_v18 = vpop.f32.mrf.mxu1  ;;  %v1678_v57 = vadd.f32 %v8197_v10, %v9381_v17 }
 0x1d5   : > { %v2631_v37 = vadd.f32 %v8152_v12, %v2630_v18  ;;  %6941 = vmatprep.mubr.msk.f32.mxu0 %vm471_vm0, %v3321_v43  ;;  %v3324_v61 = vmax.f32 %v2636_v46, 0.0  ;;  %v1933_v62 = vmax.f32 %v1673_v52, 0.0 }
 0x1d6   : > { %v6704_v13 = vpop.f32.mrf.mxu1  ;;  %6847 = vmatmul.mubr.msk.f32.gmra.mxu1 %vm471_vm0, %v1924_v47  ;;  %6942 = vmatmul.mubr.msk.f32.gmra.mxu0 %vm471_vm0, %v3322_v28  ;;  %v9382_v28 = vld [vmem:[#allocation12_spill] sm:$0xff] }
 0x1d7   : > { %v3323_v39 = vmax.f32 %v2631_v37, 0.0  ;;  %6849 = vmatprep.mubr.msk.f32.mxu1 %vm471_vm0, %v1925_v40  ;;  %v2646_v36 = vadd.f32 %v6704_v13, %v8152_v12  ;;  %v1683_v46 = vadd.f32 %v8197_v10, %v9382_v28  ;;  %v1934_v37 = vmax.f32 %v1678_v57, 0.0  ;;  %v9383_v13 = vld [vmem:[#allocation11_spill] sm:$0xff] }
 0x1d8   : > { %v2640_v42 = vpop.f32.mrf.mxu1 }
 0x1d9   : > { %v2641_v58 = vadd.f32 %v8152_v12, %v2640_v42  ;;  %6944 = vmatprep.mubr.msk.f32.mxu0 %vm471_vm0, %v3323_v39  ;;  %v3326_v16 = vmax.f32 %v2646_v36, 0.0  ;;  %v1688_v39 = vadd.f32 %v8197_v10, %v9383_v13  ;;  %v1935_v36 = vmax.f32 %v1683_v46, 0.0  ;;  %v9384_v42 = vld [vmem:[#allocation14_spill] sm:$0xff] }
 0x1da   : > { %v6707_v53 = vpop.f32.mrf.mxu1  ;;  %6850 = vmatmul.mubr.msk.f32.gmra.mxu1 %vm471_vm0, %v1926_v5  ;;  %6945 = vmatmul.mubr.msk.f32.gmra.mxu0 %vm471_vm0, %v3324_v61 }
 0x1db   : > { %v3325_v4 = vmax.f32 %v2641_v58, 0.0  ;;  %6852 = vmatprep.mubr.msk.f32.mxu1 %vm471_vm0, %v1927_v27  ;;  %v2656_v14 = vadd.f32 %v6707_v53, %v8152_v12  ;;  %v1693_v27 = vadd.f32 %v8197_v10, %v9384_v42  ;;  %v1936_v53 = vmax.f32 %v1688_v39, 0.0 }
 0x1dc   : > { %v2650_v3 = vpop.f32.mrf.mxu1 }
 0x1dd   : > { %v2651_v8 = vadd.f32 %v8152_v12, %v2650_v3  ;;  %6947 = vmatprep.mubr.msk.f32.mxu0 %vm471_vm0, %v3325_v4  ;;  %v3328_v2 = vmax.f32 %v2656_v14, 0.0  ;;  %v9385_v4 = vld [vmem:[#allocation13_spill] sm:$0xff]  ;;  %v1937_v14 = vmax.f32 %v1693_v27, 0.0  ;;  %v9386_v3 = vld [vmem:[#allocation16_spill] sm:$0xff] }
 0x1de   : > { %v6710_v56 = vpop.f32.mrf.mxu1  ;;  %6853 = vmatmul.mubr.msk.f32.gmra.mxu1 %vm471_vm0, %v1928_v32  ;;  %6948 = vmatmul.mubr.msk.f32.gmra.mxu0 %vm471_vm0, %v3326_v16  ;;  %v1698_v32 = vadd.f32 %v8197_v10, %v9385_v4 }
 0x1df   : > { %v3327_v9 = vmax.f32 %v2651_v8, 0.0  ;;  %6855 = vmatprep.mubr.msk.f32.mxu1 %vm471_vm0, %v1929_v59  ;;  %v2666_v29 = vadd.f32 %v6710_v56, %v8152_v12  ;;  %v1703_v59 = vadd.f32 %v8197_v10, %v9386_v3 }
 0x1e0   : > { %v2660_v34 = vpop.f32.mrf.mxu1  ;;  %v1938_v56 = vmax.f32 %v1698_v32, 0.0 }
 0x1e1   : > { %v2661_v20 = vadd.f32 %v8152_v12, %v2660_v34  ;;  %6950 = vmatprep.mubr.msk.f32.mxu0 %vm471_vm0, %v3327_v9  ;;  %v3330_v31 = vmax.f32 %v2666_v29, 0.0  ;;  %v9387_v9 = vld [vmem:[#allocation15_spill] sm:$0xff]  ;;  %v1939_v29 = vmax.f32 %v1703_v59, 0.0  ;;  %v9388_v34 = vld [vmem:[#allocation18_spill] sm:$0xff] }
 0x1e2   : > { %v6713_v50 = vpop.f32.mrf.mxu1  ;;  %6856 = vmatmul.mubr.msk.f32.gmra.mxu1 %vm471_vm0, %v1930_v6  ;;  %6951 = vmatmul.mubr.msk.f32.gmra.mxu0 %vm471_vm0, %v3328_v2  ;;  %v1708_v6 = vadd.f32 %v8197_v10, %v9387_v9 }
 0x1e3   : > { %v3329_v54 = vmax.f32 %v2661_v20, 0.0  ;;  %6858 = vmatprep.mubr.msk.f32.mxu1 %vm471_vm0, %v1931_v23  ;;  %v2676_v43 = vadd.f32 %v6713_v50, %v8152_v12  ;;  %v1713_v23 = vadd.f32 %v8197_v10, %v9388_v34 }
 0x1e4   : > { %v2670_v47 = vpop.f32.mrf.mxu1  ;;  %v1940_v50 = vmax.f32 %v1708_v6, 0.0  ;;  %v1753_v6 = vadd.f32 %v8197_v10, %v8081_v1 }
 0x1e5   : > { %v2671_v18 = vadd.f32 %v8152_v12, %v2670_v47  ;;  %6953 = vmatprep.mubr.msk.f32.mxu0 %vm471_vm0, %v3329_v54  ;;  %v3332_v5 = vmax.f32 %v2676_v43, 0.0  ;;  %v9389_v54 = vld [vmem:[#allocation17_spill] sm:$0xff]  ;;  %v1941_v43 = vmax.f32 %v1713_v23, 0.0  ;;  %v9390_v47 = vld [vmem:[#allocation20_spill] sm:$0xff] }
 0x1e6   : > { %v6716_v40 = vpop.f32.mrf.mxu1  ;;  %6859 = vmatmul.mubr.msk.f32.gmra.mxu1 %vm471_vm0, %v1932_v22  ;;  %6954 = vmatmul.mubr.msk.f32.gmra.mxu0 %vm471_vm0, %v3330_v31  ;;  %v1718_v22 = vadd.f32 %v8197_v10, %v9389_v54 }
 0x1e7   : > { %v3331_v0 = vmax.f32 %v2671_v18, 0.0  ;;  %6861 = vmatprep.mubr.msk.f32.mxu1 %vm471_vm0, %v1933_v62  ;;  %v2686_v30 = vadd.f32 %v6716_v40, %v8152_v12  ;;  %v1723_v62 = vadd.f32 %v8197_v10, %v9390_v47 }
 0x1e8   : > { %v2680_v61 = vpop.f32.mrf.mxu1  ;;  %v1942_v40 = vmax.f32 %v1718_v22, 0.0  ;;  %v1768_v22 = vadd.f32 %v8197_v10, %v8089_v25 }
 0x1e9   : > { %v2681_v7 = vadd.f32 %v8152_v12, %v2680_v61  ;;  %6956 = vmatprep.mubr.msk.f32.mxu0 %vm471_vm0, %v3331_v0  ;;  %v3334_v24 = vmax.f32 %v2686_v30, 0.0  ;;  %v9391_v0 = vld [vmem:[#allocation19_spill] sm:$0xff]  ;;  %v1943_v30 = vmax.f32 %v1723_v62, 0.0  ;;  %v9392_v61 = vld [vmem:[#allocation22_spill] sm:$0xff] }
 0x1ea   : > { %v6719_v48 = vpop.f32.mrf.mxu1  ;;  %6862 = vmatmul.mubr.msk.f32.gmra.mxu1 %vm471_vm0, %v1934_v37  ;;  %6957 = vmatmul.mubr.msk.f32.gmra.mxu0 %vm471_vm0, %v3332_v5  ;;  %v1728_v37 = vadd.f32 %v8197_v10, %v9391_v0  ;;  %v1952_v25 = vmax.f32 %v1768_v22, 0.0 }
 0x1eb   : > { %v3333_v58 = vmax.f32 %v2681_v7, 0.0  ;;  %6864 = vmatprep.mubr.msk.f32.mxu1 %vm471_vm0, %v1935_v36  ;;  %v2696_v45 = vadd.f32 %v6719_v48, %v8152_v12  ;;  %v1733_v36 = vadd.f32 %v8197_v10, %v9392_v61 }
 0x1ec   : > { %v2690_v16 = vpop.f32.mrf.mxu1  ;;  %v1944_v48 = vmax.f32 %v1728_v37, 0.0  ;;  %v1783_v37 = vadd.f32 %v8197_v10, %v8129_v60 }
 0x1ed   : > { %v2691_v38 = vadd.f32 %v8152_v12, %v2690_v16  ;;  %6959 = vmatprep.mubr.msk.f32.mxu0 %vm471_vm0, %v3333_v58  ;;  %v3336_v33 = vmax.f32 %v2696_v45, 0.0  ;;  %v9393_v58 = vld [vmem:[#allocation21_spill] sm:$0xff]  ;;  %v1945_v45 = vmax.f32 %v1733_v36, 0.0  ;;  %v1743_v16 = vadd.f32 %v8197_v10, %v8063_v19 }
 0x1ee   : > { %v6722_v35 = vpop.f32.mrf.mxu1  ;;  %6865 = vmatmul.mubr.msk.f32.gmra.mxu1 %vm471_vm0, %v1936_v53  ;;  %6960 = vmatmul.mubr.msk.f32.gmra.mxu0 %vm471_vm0, %v3334_v24  ;;  %v1738_v53 = vadd.f32 %v8197_v10, %v9393_v58 }
 0x1ef   : > { %v3335_v8 = vmax.f32 %v2691_v38, 0.0  ;;  %6867 = vmatprep.mubr.msk.f32.mxu1 %vm471_vm0, %v1937_v14  ;;  %v2706_v55 = vadd.f32 %v6722_v35, %v8152_v12  ;;  %v1748_v35 = vadd.f32 %v8197_v10, %v8057_v49  ;;  %v1947_v9 = vmax.f32 %v1743_v16, 0.0 }
 0x1f0   : > { %v2700_v2 = vpop.f32.mrf.mxu1  ;;  %v1946_v38 = vmax.f32 %v1738_v53, 0.0  ;;  %v1798_v53 = vadd.f32 %v8197_v10, %v8137_v41 }
 0x1f1   : > { %v2701_v26 = vadd.f32 %v8152_v12, %v2700_v2  ;;  %6962 = vmatprep.mubr.msk.f32.mxu0 %vm471_vm0, %v3335_v8  ;;  %v3338_v17 = vmax.f32 %v2706_v55, 0.0  ;;  %v1948_v49 = vmax.f32 %v1748_v35, 0.0 }
 0x1f2   : > { %v6725_v52 = vpop.f32.mrf.mxu1  ;;  %6868 = vmatmul.mubr.msk.f32.gmra.mxu1 %vm471_vm0, %v1938_v56  ;;  %6963 = vmatmul.mubr.msk.f32.gmra.mxu0 %vm471_vm0, %v3336_v33 }
 0x1f3   : > { %v3337_v20 = vmax.f32 %v2701_v26, 0.0  ;;  %6870 = vmatprep.mubr.msk.f32.mxu1 %vm471_vm0, %v1939_v29  ;;  %v2716_v57 = vadd.f32 %v6725_v52, %v8152_v12  ;;  %v1758_v29 = vadd.f32 %v8197_v10, %v8072_v44  ;;  %v1949_v26 = vmax.f32 %v1753_v6, 0.0 }
 0x1f4   : > { %v2710_v31 = vpop.f32.mrf.mxu1  ;;  %v1763_v52 = vadd.f32 %v8197_v10, %v8097_v51 }
 0x1f5   : > { %v2711_v28 = vadd.f32 %v8152_v12, %v2710_v31  ;;  %6965 = vmatprep.mubr.msk.f32.mxu0 %vm471_vm0, %v3337_v20  ;;  %v3340_v13 = vmax.f32 %v2716_v57, 0.0  ;;  %v1950_v44 = vmax.f32 %v1758_v29, 0.0 }
 0x1f6   : > { %v6728_v46 = vpop.f32.mrf.mxu1  ;;  %6871 = vmatmul.mubr.msk.f32.gmra.mxu1 %vm471_vm0, %v1940_v50  ;;  %6966 = vmatmul.mubr.msk.f32.gmra.mxu0 %vm471_vm0, %v3338_v17  ;;  %v1951_v31 = vmax.f32 %v1763_v52, 0.0 }
 0x1f7   : > { %v3339_v18 = vmax.f32 %v2711_v28, 0.0  ;;  %6873 = vmatprep.mubr.msk.f32.mxu1 %vm471_vm0, %v1941_v43  ;;  %v2726_v39 = vadd.f32 %v6728_v46, %v8152_v12  ;;  %v1773_v43 = vadd.f32 %v8197_v10, %v8113_v21  ;;  %v1778_v46 = vadd.f32 %v8197_v10, %v8105_v11 }
 0x1f8   : > { %v2720_v5 = vpop.f32.mrf.mxu1 }
 0x1f9   : > { %v2721_v42 = vadd.f32 %v8152_v12, %v2720_v5  ;;  %6968 = vmatprep.mubr.msk.f32.mxu0 %vm471_vm0, %v3339_v18  ;;  %v3342_v4 = vmax.f32 %v2726_v39, 0.0  ;;  %v1953_v0 = vmax.f32 %v1773_v43, 0.0  ;;  %v1954_v11 = vmax.f32 %v1778_v46, 0.0 }
 0x1fa   : > { %v6731_v27 = vpop.f32.mrf.mxu1  ;;  %6874 = vmatmul.mubr.msk.f32.gmra.mxu1 %vm471_vm0, %v1942_v40  ;;  %6969 = vmatmul.mubr.msk.f32.gmra.mxu0 %vm471_vm0, %v3340_v13 }
 0x1fb   : > { %v3341_v7 = vmax.f32 %v2721_v42, 0.0  ;;  %6876 = vmatprep.mubr.msk.f32.mxu1 %vm471_vm0, %v1943_v30  ;;  %v2736_v32 = vadd.f32 %v6731_v27, %v8152_v12  ;;  %v1788_v30 = vadd.f32 %v8197_v10, %v8121_v63  ;;  %v1955_v42 = vmax.f32 %v1783_v37, 0.0 }
 0x1fc   : > { %v2730_v24 = vpop.f32.mrf.mxu1  ;;  %v1793_v27 = vadd.f32 %v8197_v10, %v8145_v15 }
 0x1fd   : > { %v2731_v14 = vadd.f32 %v8152_v12, %v2730_v24  ;;  %6971 = vmatprep.mubr.msk.f32.mxu0 %vm471_vm0, %v3341_v7  ;;  %v3344_v8 = vmax.f32 %v2736_v32, 0.0  ;;  %v1956_v63 = vmax.f32 %v1788_v30, 0.0 }
 0x1fe   : > { %v6734_v3 = vpop.f32.mrf.mxu1  ;;  %6877 = vmatmul.mubr.msk.f32.gmra.mxu1 %vm471_vm0, %v1944_v48  ;;  %6972 = vmatmul.mubr.msk.f32.gmra.mxu0 %vm471_vm0, %v3342_v4  ;;  %v1957_v24 = vmax.f32 %v1793_v27, 0.0 }
 0x1ff   : > { %v3343_v59 = vmax.f32 %v2731_v14, 0.0  ;;  %6879 = vmatprep.mubr.msk.f32.mxu1 %vm471_vm0, %v1945_v45  ;;  %v2746_v56 = vadd.f32 %v6734_v3, %v8152_v12  ;;  %v1958_v3 = vmax.f32 %v1798_v53, 0.0 }
 0x200   : > { %v2740_v19 = vpop.f32.mrf.mxu1 }
 0x201   : > { %v2741_v33 = vadd.f32 %v8152_v12, %v2740_v19  ;;  %6974 = vmatprep.mubr.msk.f32.mxu0 %vm471_vm0, %v3343_v59  ;;  %v3346_v34 = vmax.f32 %v2746_v56, 0.0 }
 0x202   : > { %v6737_v55 = vpop.f32.mrf.mxu1  ;;  %6880 = vmatmul.mubr.msk.f32.gmra.mxu1 %vm471_vm0, %v1946_v38  ;;  %6975 = vmatmul.mubr.msk.f32.gmra.mxu0 %vm471_vm0, %v3344_v8 }
 0x203   : > { %v3345_v2 = vmax.f32 %v2741_v33, 0.0  ;;  %6882 = vmatprep.mubr.msk.f32.mxu1 %vm471_vm0, %v1947_v9  ;;  %v2756_v23 = vadd.f32 %v6737_v55, %v8152_v12 }
 0x204   : > { %v2750_v1 = vpop.f32.mrf.mxu1 }
 0x205   : > { %v2751_v20 = vadd.f32 %v8152_v12, %v2750_v1  ;;  %6977 = vmatprep.mubr.msk.f32.mxu0 %vm471_vm0, %v3345_v2  ;;  %v3348_v17 = vmax.f32 %v2756_v23, 0.0 }
 0x206   : > { %v6740_v50 = vpop.f32.mrf.mxu1  ;;  %6883 = vmatmul.mubr.msk.f32.gmra.mxu1 %vm471_vm0, %v1948_v49  ;;  %6978 = vmatmul.mubr.msk.f32.gmra.mxu0 %vm471_vm0, %v3346_v34 }
 0x207   : > { %v3347_v54 = vmax.f32 %v2751_v20, 0.0  ;;  %6885 = vmatprep.mubr.msk.f32.mxu1 %vm471_vm0, %v1949_v26  ;;  %v2766_v57 = vadd.f32 %v6740_v50, %v8152_v12 }
 0x208   : > { %v2760_v51 = vpop.f32.mrf.mxu1 }
 0x209   : > { %v2761_v47 = vadd.f32 %v8152_v12, %v2760_v51  ;;  %6980 = vmatprep.mubr.msk.f32.mxu0 %vm471_vm0, %v3347_v54  ;;  %v3350_v18 = vmax.f32 %v2766_v57, 0.0 }
 0x20a   : > { %v6743_v62 = vpop.f32.mrf.mxu1  ;;  %6886 = vmatmul.mubr.msk.f32.gmra.mxu1 %vm471_vm0, %v1950_v44  ;;  %6981 = vmatmul.mubr.msk.f32.gmra.mxu0 %vm471_vm0, %v3348_v17 }
 0x20b   : > { %v3349_v28 = vmax.f32 %v2761_v47, 0.0  ;;  %6888 = vmatprep.mubr.msk.f32.mxu1 %vm471_vm0, %v1951_v31  ;;  %v2776_v40 = vadd.f32 %v6743_v62, %v8152_v12 }
 0x20c   : > { %v2770_v21 = vpop.f32.mrf.mxu1 }
 0x20d   : > { %v2771_v13 = vadd.f32 %v8152_v12, %v2770_v21  ;;  %6983 = vmatprep.mubr.msk.f32.mxu0 %vm471_vm0, %v3349_v28  ;;  %v3352_v61 = vmax.f32 %v2776_v40, 0.0 }
 0x20e   : > { %v6746_v39 = vpop.f32.mrf.mxu1  ;;  %6889 = vmatmul.mubr.msk.f32.gmra.mxu1 %vm471_vm0, %v1952_v25  ;;  %6984 = vmatmul.mubr.msk.f32.gmra.mxu0 %vm471_vm0, %v3350_v18 }
 0x20f   : > { %v3351_v5 = vmax.f32 %v2771_v13, 0.0  ;;  %6891 = vmatprep.mubr.msk.f32.mxu1 %vm471_vm0, %v1953_v0  ;;  %v2786_v36 = vadd.f32 %v6746_v39, %v8152_v12 }
 0x210   : > { %v2780_v60 = vpop.f32.mrf.mxu1 }
 0x211   : > { %v2781_v7 = vadd.f32 %v8152_v12, %v2780_v60  ;;  %6986 = vmatprep.mubr.msk.f32.mxu0 %vm471_vm0, %v3351_v5  ;;  %v3354_v4 = vmax.f32 %v2786_v36, 0.0 }
 0x212   : > { %v6749_v48 = vpop.f32.mrf.mxu1  ;;  %6892 = vmatmul.mubr.msk.f32.gmra.mxu1 %vm471_vm0, %v1954_v11  ;;  %6987 = vmatmul.mubr.msk.f32.gmra.mxu0 %vm471_vm0, %v3352_v61 }
 0x213   : > { %v3353_v58 = vmax.f32 %v2781_v7, 0.0  ;;  %6894 = vmatprep.mubr.msk.f32.mxu1 %vm471_vm0, %v1955_v42  ;;  %v2796_v32 = vadd.f32 %v6749_v48, %v8152_v12 }
 0x214   : > { %v2790_v15 = vpop.f32.mrf.mxu1 }
 0x215   : > { %v2791_v45 = vadd.f32 %v8152_v12, %v2790_v15  ;;  %6989 = vmatprep.mubr.msk.f32.mxu0 %vm471_vm0, %v3353_v58  ;;  %v3356_v59 = vmax.f32 %v2796_v32, 0.0 }
 0x216   : > { %v6752_v16 = vpop.f32.mrf.mxu1  ;;  %6895 = vmatmul.mubr.msk.f32.gmra.mxu1 %vm471_vm0, %v1956_v63  ;;  %6990 = vmatmul.mubr.msk.f32.gmra.mxu0 %vm471_vm0, %v3354_v4 }
 0x217   : > { %v3355_v14 = vmax.f32 %v2791_v45, 0.0  ;;  %6897 = vmatprep.mubr.msk.f32.mxu1 %vm471_vm0, %v1957_v24  ;;  %v2806_v41 = vadd.f32 %v6752_v16, %v8152_v12 }
 0x218   : > { %v2800_v10 = vpop.f32.mrf.mxu1 }
 0x219   : > { %v2801_v38 = vadd.f32 %v8152_v12, %v2800_v10  ;;  %6992 = vmatprep.mubr.msk.f32.mxu0 %vm471_vm0, %v3355_v14  ;;  %v3358_v56 = vmax.f32 %v2806_v41, 0.0 }
 0x21a   : > { %v6755_v35 = vpop.f32.mrf.mxu1  ;;  %6898 = vmatmul.mubr.msk.f32.gmra.mxu1 %vm471_vm0, %v1958_v3  ;;  %6993 = vmatmul.mubr.msk.f32.gmra.mxu0 %vm471_vm0, %v3356_v59 }
 0x21b   : > { %v3357_v8 = vmax.f32 %v2801_v38, 0.0  ;;  %v2816_v19 = vadd.f32 %v6755_v35, %v8152_v12 }
 0x21c   : > { %v2810_v9 = vpop.f32.mrf.mxu1 }
 0x21d   : > { %v2811_v6 = vadd.f32 %v8152_v12, %v2810_v9  ;;  %6995 = vmatprep.mubr.msk.f32.mxu0 %vm471_vm0, %v3357_v8  ;;  %v3360_v2 = vmax.f32 %v2816_v19, 0.0 }
 0x21e   : > { %v6758_v33 = vpop.f32.mrf.mxu1  ;;  %6996 = vmatmul.mubr.msk.f32.gmra.mxu0 %vm471_vm0, %v3358_v56 }
 0x21f   : > { %v3359_v55 = vmax.f32 %v2811_v6, 0.0  ;;  %v2826_v49 = vadd.f32 %v6758_v33, %v8152_v12 }
 0x220   : > { %v2820_v29 = vpop.f32.mrf.mxu1 }
 0x221   : > { %v2821_v34 = vadd.f32 %v8152_v12, %v2820_v29  ;;  %6998 = vmatprep.mubr.msk.f32.mxu0 %vm471_vm0, %v3359_v55  ;;  %v3362_v26 = vmax.f32 %v2826_v49, 0.0 }
 0x222   : > { %v6761_v23 = vpop.f32.mrf.mxu1  ;;  %6999 = vmatmul.mubr.msk.f32.gmra.mxu0 %vm471_vm0, %v3360_v2 }
 0x223   : > { %v3361_v1 = vmax.f32 %v2821_v34, 0.0  ;;  %v2836_v52 = vadd.f32 %v6761_v23, %v8152_v12  ;;  %v8503_v23 = vld [vmem:[%s9353_s5] ss:$0 sm:$0xff] }
 0x224   : > { %v2830_v20 = vpop.f32.mrf.mxu1 }
 0x225   : > { %v2831_v50 = vadd.f32 %v8152_v12, %v2830_v20  ;;  %7001 = vmatprep.mubr.msk.f32.mxu0 %vm471_vm0, %v3361_v1  ;;  %v3364_v22 = vmax.f32 %v2836_v52, 0.0 }
 0x226   : > { %v6764_v54 = vpop.f32.mrf.mxu1  ;;  %7002 = vmatmul.mubr.msk.f32.gmra.mxu0 %vm471_vm0, %v3362_v26 }
 0x227   : > { %v3363_v44 = vmax.f32 %v2831_v50, 0.0  ;;  %v2846_v17 = vadd.f32 %v6764_v54, %v8152_v12 }
 0x228   : > { %v2840_v57 = vpop.f32.mrf.mxu1 }
 0x229   : > { %v2841_v51 = vadd.f32 %v8152_v12, %v2840_v57  ;;  %7004 = vmatprep.mubr.msk.f32.mxu0 %vm471_vm0, %v3363_v44  ;;  %v3366_v47 = vmax.f32 %v2846_v17, 0.0 }
 0x22a   : > { %v6767_v31 = vpop.f32.mrf.mxu1  ;;  %7005 = vmatmul.mubr.msk.f32.gmra.mxu0 %vm471_vm0, %v3364_v22 }
 0x22b   : > { %v3365_v43 = vmax.f32 %v2841_v51, 0.0  ;;  %v2856_v62 = vadd.f32 %v6767_v31, %v8152_v12 }
 0x22c   : > { %v2850_v28 = vpop.f32.mrf.mxu1 }
 0x22d   : > { %v2851_v25 = vadd.f32 %v8152_v12, %v2850_v28  ;;  %7007 = vmatprep.mubr.msk.f32.mxu0 %vm471_vm0, %v3365_v43  ;;  %v3368_v40 = vmax.f32 %v2856_v62, 0.0 }
 0x22e   : > { %v6770_v46 = vpop.f32.mrf.mxu1  ;;  %7008 = vmatmul.mubr.msk.f32.gmra.mxu0 %vm471_vm0, %v3366_v47 }
 0x22f   : > { %v3367_v18 = vmax.f32 %v2851_v25, 0.0  ;;  %v2866_v21 = vadd.f32 %v6770_v46, %v8152_v12 }
 0x230   : > { %v2860_v0 = vpop.f32.mrf.mxu1 }
 0x231   : > { %v2861_v37 = vadd.f32 %v8152_v12, %v2860_v0  ;;  %7010 = vmatprep.mubr.msk.f32.mxu0 %vm471_vm0, %v3367_v18  ;;  %v3370_v5 = vmax.f32 %v2866_v21, 0.0 }
 0x232   : > { %v6773_v13 = vpop.f32.mrf.mxu1  ;;  %7011 = vmatmul.mubr.msk.f32.gmra.mxu0 %vm471_vm0, %v3368_v40 }
 0x233   : > { %v3369_v39 = vmax.f32 %v2861_v37, 0.0  ;;  %v2876_v11 = vadd.f32 %v6773_v13, %v8152_v12 }
 0x234   : > { %v2870_v30 = vpop.f32.mrf.mxu1 }
 0x235   : > { %v2871_v61 = vadd.f32 %v8152_v12, %v2870_v30  ;;  %7013 = vmatprep.mubr.msk.f32.mxu0 %vm471_vm0, %v3369_v39  ;;  %v3372_v42 = vmax.f32 %v2876_v11, 0.0 }
 0x236   : > { %v6776_v36 = vpop.f32.mrf.mxu1  ;;  %7014 = vmatmul.mubr.msk.f32.gmra.mxu0 %vm471_vm0, %v3370_v5 }
 0x237   : > { %v3371_v60 = vmax.f32 %v2871_v61, 0.0  ;;  %v2886_v27 = vadd.f32 %v6776_v36, %v8152_v12 }
 0x238   : > { %v2880_v7 = vpop.f32.mrf.mxu1 }
 0x239   : > { %v2881_v48 = vadd.f32 %v8152_v12, %v2880_v7  ;;  %7016 = vmatprep.mubr.msk.f32.mxu0 %vm471_vm0, %v3371_v60  ;;  %v3374_v53 = vmax.f32 %v2886_v27, 0.0 }
 0x23a   : > { %v6779_v58 = vpop.f32.mrf.mxu1  ;;  %7017 = vmatmul.mubr.msk.f32.gmra.mxu0 %vm471_vm0, %v3372_v42 }
 0x23b   : > { %v3373_v63 = vmax.f32 %v2881_v48, 0.0  ;;  %v2896_v4 = vadd.f32 %v6779_v58, %v8152_v12 }
 0x23c   : > { %v2890_v32 = vpop.f32.mrf.mxu1 }
 0x23d   : > { %v2891_v15 = vadd.f32 %v8152_v12, %v2890_v32  ;;  %7019 = vmatprep.mubr.msk.f32.mxu0 %vm471_vm0, %v3373_v63  ;;  %v3376_v16 = vmax.f32 %v2896_v4, 0.0 }
 0x23e   : > { %v6782_v24 = vpop.f32.mrf.mxu1  ;;  %7020 = vmatmul.mubr.msk.f32.gmra.mxu0 %vm471_vm0, %v3374_v53 }
 0x23f   : > { %v3375_v45 = vmax.f32 %v2891_v15, 0.0  ;;  %v2906_v14 = vadd.f32 %v6782_v24, %v8152_v12 }
 0x240   : > { %v2900_v3 = vpop.f32.mrf.mxu1 }
 0x241   : > { %v2901_v59 = vadd.f32 %v8152_v12, %v2900_v3  ;;  %7022 = vmatprep.mubr.msk.f32.mxu0 %vm471_vm0, %v3375_v45  ;;  %v3378_v38 = vmax.f32 %v2906_v14, 0.0 }
 0x242   : > { %v6785_v41 = vpop.f32.mrf.mxu1  ;;  %7023 = vmatmul.mubr.msk.f32.gmra.mxu0 %vm471_vm0, %v3376_v16  ;;  %v8538_v16 = vld [vmem:[%s9355_s7] ss:$0 sm:$0xff] }
 0x243   : > { %v3377_v10 = vmax.f32 %v2901_v59, 0.0  ;;  %v2916_v35 = vadd.f32 %v6785_v41, %v8152_v12 }
 0x244   : > { %v2910_v8 = vpop.f32.mrf.mxu1 }
 0x245   : > { %v2911_v56 = vadd.f32 %v8152_v12, %v2910_v8  ;;  %7025 = vmatprep.mubr.msk.f32.mxu0 %vm471_vm0, %v3377_v10  ;;  %v3380_v6 = vmax.f32 %v2916_v35, 0.0 }
 0x246   : > { %v6788_v19 = vpop.f32.mrf.mxu1  ;;  %7026 = vmatmul.mubr.msk.f32.gmra.mxu0 %vm471_vm0, %v3378_v38 }
 0x247   : > { %v3379_v9 = vmax.f32 %v2911_v56, 0.0  ;;  %v2926_v33 = vadd.f32 %v6788_v19, %v8152_v12 }
 0x248   : > { %v2920_v55 = vpop.f32.mrf.mxu1 }
 0x249   : > { %v2921_v2 = vadd.f32 %v8152_v12, %v2920_v55  ;;  %7028 = vmatprep.mubr.msk.f32.mxu0 %vm471_vm0, %v3379_v9  ;;  %v3382_v34 = vmax.f32 %v2926_v33, 0.0 }
 0x24a   : > { %v6791_v49 = vpop.f32.mrf.mxu1  ;;  %7029 = vmatmul.mubr.msk.f32.gmra.mxu0 %vm471_vm0, %v3380_v6 }
 0x24b   : > { %v3381_v29 = vmax.f32 %v2921_v2, 0.0  ;;  %v2936_v1 = vadd.f32 %v8503_v23, %v6791_v49 }
 0x24c   : > { %v2930_v26 = vpop.f32.mrf.mxu1 }
 0x24d   : > { %v2931_v52 = vadd.f32 %v8503_v23, %v2930_v26  ;;  %7031 = vmatprep.mubr.msk.f32.mxu0 %vm471_vm0, %v3381_v29  ;;  %v3384_v50 = vmax.f32 %v2936_v1, 0.0 }
 0x24e   : > { %v6794_v12 = vpop.f32.mrf.mxu1  ;;  %7032 = vmatmul.mubr.msk.f32.gmra.mxu0 %vm471_vm0, %v3382_v34 }
 0x24f   : > { %v3383_v20 = vmax.f32 %v2931_v52, 0.0  ;;  %v2946_v54 = vadd.f32 %v8503_v23, %v6794_v12 }
 0x250   : > { %v2940_v44 = vpop.f32.mrf.mxu1 }
 0x251   : > { %v2941_v22 = vadd.f32 %v8503_v23, %v2940_v44  ;;  %7034 = vmatprep.mubr.msk.f32.mxu0 %vm471_vm0, %v3383_v20  ;;  %v3386_v51 = vmax.f32 %v2946_v54, 0.0 }
 0x252   : > { %v6797_v17 = vpop.f32.mrf.mxu1  ;;  %7035 = vmatmul.mubr.msk.f32.gmra.mxu0 %vm471_vm0, %v3384_v50 }
 0x253   : > { %v3385_v57 = vmax.f32 %v2941_v22, 0.0  ;;  %v2956_v31 = vadd.f32 %v8503_v23, %v6797_v17 }
 0x254   : > { %v2950_v43 = vpop.f32.mrf.mxu1 }
 0x255   : > { %v2951_v47 = vadd.f32 %v8503_v23, %v2950_v43  ;;  %7037 = vmatprep.mubr.msk.f32.mxu0 %vm471_vm0, %v3385_v57  ;;  %v3388_v25 = vmax.f32 %v2956_v31, 0.0 }
 0x256   : > { %v6800_v62 = vpop.f32.mrf.mxu1  ;;  %7038 = vmatmul.mubr.msk.f32.gmra.mxu0 %vm471_vm0, %v3386_v51 }
 0x257   : > { %v3387_v28 = vmax.f32 %v2951_v47, 0.0  ;;  %v2966_v46 = vadd.f32 %v8503_v23, %v6800_v62 }
 0x258   : > { %v2960_v18 = vpop.f32.mrf.mxu1 }
 0x259   : > { %v2961_v40 = vadd.f32 %v8503_v23, %v2960_v18  ;;  %7040 = vmatprep.mubr.msk.f32.mxu0 %vm471_vm0, %v3387_v28  ;;  %v3390_v37 = vmax.f32 %v2966_v46, 0.0 }
 0x25a   : > { %v6803_v21 = vpop.f32.mrf.mxu1  ;;  %7041 = vmatmul.mubr.msk.f32.gmra.mxu0 %vm471_vm0, %v3388_v25 }
 0x25b   : > { %v3389_v0 = vmax.f32 %v2961_v40, 0.0  ;;  %v2976_v13 = vadd.f32 %v8503_v23, %v6803_v21 }
 0x25c   : > { %v2970_v39 = vpop.f32.mrf.mxu1 }
 0x25d   : > { %v2971_v5 = vadd.f32 %v8503_v23, %v2970_v39  ;;  %7043 = vmatprep.mubr.msk.f32.mxu0 %vm471_vm0, %v3389_v0  ;;  %v3392_v61 = vmax.f32 %v2976_v13, 0.0 }
 0x25e   : > { %v6806_v11 = vpop.f32.mrf.mxu1  ;;  %7044 = vmatmul.mubr.msk.f32.gmra.mxu0 %vm471_vm0, %v3390_v37 }
 0x25f   : > { %v3391_v30 = vmax.f32 %v2971_v5, 0.0  ;;  %v2986_v36 = vadd.f32 %v8503_v23, %v6806_v11 }
 0x260   : > { %v2980_v60 = vpop.f32.mrf.mxu1 }
 0x261   : > { %v2981_v42 = vadd.f32 %v8503_v23, %v2980_v60  ;;  %7046 = vmatprep.mubr.msk.f32.mxu0 %vm471_vm0, %v3391_v30  ;;  %v3394_v48 = vmax.f32 %v2986_v36, 0.0 }
 0x262   : > { %v6809_v27 = vpop.f32.mrf.mxu1  ;;  %7047 = vmatmul.mubr.msk.f32.gmra.mxu0 %vm471_vm0, %v3392_v61 }
 0x263   : > { %v3393_v7 = vmax.f32 %v2981_v42, 0.0  ;;  %v2996_v58 = vadd.f32 %v8503_v23, %v6809_v27 }
 0x264   : > { %v2990_v63 = vpop.f32.mrf.mxu1 }
 0x265   : > { %v2991_v53 = vadd.f32 %v8503_v23, %v2990_v63  ;;  %7049 = vmatprep.mubr.msk.f32.mxu0 %vm471_vm0, %v3393_v7  ;;  %v3396_v15 = vmax.f32 %v2996_v58, 0.0 }
 0x266   : > { %v6812_v4 = vpop.f32.mrf.mxu1  ;;  %7050 = vmatmul.mubr.msk.f32.gmra.mxu0 %vm471_vm0, %v3394_v48 }
 0x267   : > { %v3395_v32 = vmax.f32 %v2991_v53, 0.0  ;;  %v3006_v24 = vadd.f32 %v8503_v23, %v6812_v4 }
 0x268   : > { %v3000_v45 = vpop.f32.mrf.mxu1 }
 0x269   : > { %v3001_v14 = vadd.f32 %v8503_v23, %v3000_v45  ;;  %7052 = vmatprep.mubr.msk.f32.mxu0 %vm471_vm0, %v3395_v32  ;;  %v3398_v38 = vmax.f32 %v3006_v24, 0.0 }
 0x26a   : > { %v6815_v3 = vpop.f32.mrf.mxu1  ;;  %v6910_v59 = vpop.f32.mrf.mxu0  ;;  %7053 = vmatmul.mubr.msk.f32.gmra.mxu0 %vm471_vm0, %v3396_v15 }
 0x26b   : > { %v3397_v41 = vmax.f32 %v3001_v14, 0.0  ;;  %v4014_v10 = vadd.f32 %v6910_v59, %v8538_v16  ;;  %v3016_v35 = vadd.f32 %v8503_v23, %v6815_v3 }
 0x26c   : > { %v3010_v8 = vpop.f32.mrf.mxu1  ;;  %v4008_v56 = vpop.f32.mrf.mxu0 }
 0x26d   : > { %4799 = vst.msk [vmem:[%s8545_s26 + $0x8] sm:$0xff] %vm4797_vm1, %v4014_v10  ;;  %v3011_v19 = vadd.f32 %v8503_v23, %v3010_v8  ;;  %v4009_v9 = vadd.f32 %v8538_v16, %v4008_v56  ;;  %7055 = vmatprep.mubr.msk.f32.mxu0 %vm471_vm0, %v3397_v41  ;;  %v3400_v49 = vmax.f32 %v3016_v35, 0.0 }
 0x26e   : > { %v6818_v6 = vpop.f32.mrf.mxu1  ;;  %v6913_v33 = vpop.f32.mrf.mxu0  ;;  %7056 = vmatmul.mubr.msk.f32.gmra.mxu0 %vm471_vm0, %v3398_v38 }
 0x26f   : > { %v3399_v55 = vmax.f32 %v3011_v19, 0.0  ;;  %4798 = vst.msk [vmem:[%s8545_s26] sm:$0xff] %vm4797_vm1, %v4009_v9  ;;  %v4024_v2 = vadd.f32 %v6913_v33, %v8538_v16  ;;  %v3026_v29 = vadd.f32 %v8503_v23, %v6818_v6 }
 0x270   : > { %v3020_v34 = vpop.f32.mrf.mxu1  ;;  %v4018_v1 = vpop.f32.mrf.mxu0 }
 0x271   : > { %4801 = vst.msk [vmem:[%s8545_s26 + $0x18] sm:$0xff] %vm4797_vm1, %v4024_v2  ;;  %v3021_v26 = vadd.f32 %v8503_v23, %v3020_v34  ;;  %v4019_v52 = vadd.f32 %v8538_v16, %v4018_v1  ;;  %7058 = vmatprep.mubr.msk.f32.mxu0 %vm471_vm0, %v3399_v55  ;;  %v3402_v44 = vmax.f32 %v3026_v29, 0.0 }
 0x272   : > { %v6821_v12 = vpop.f32.mrf.mxu1  ;;  %v6916_v20 = vpop.f32.mrf.mxu0  ;;  %7059 = vmatmul.mubr.msk.f32.gmra.mxu0 %vm471_vm0, %v3400_v49 }
 0x273   : > { %v3401_v50 = vmax.f32 %v3021_v26, 0.0  ;;  %4800 = vst.msk [vmem:[%s8545_s26 + $0x10] sm:$0xff] %vm4797_vm1, %v4019_v52  ;;  %v4034_v54 = vadd.f32 %v6916_v20, %v8538_v16  ;;  %v3036_v22 = vadd.f32 %v8503_v23, %v6821_v12 }
 0x274   : > { %v3030_v17 = vpop.f32.mrf.mxu1  ;;  %v4028_v57 = vpop.f32.mrf.mxu0 }
 0x275   : > { %4803 = vst.msk [vmem:[%s8545_s26 + $0x28] sm:$0xff] %vm4797_vm1, %v4034_v54  ;;  %v3031_v51 = vadd.f32 %v8503_v23, %v3030_v17  ;;  %v4029_v31 = vadd.f32 %v8538_v16, %v4028_v57  ;;  %7061 = vmatprep.mubr.msk.f32.mxu0 %vm471_vm0, %v3401_v50  ;;  %v3404_v25 = vmax.f32 %v3036_v22, 0.0 }
 0x276   : > { %v6824_v43 = vpop.f32.mrf.mxu1  ;;  %v6919_v47 = vpop.f32.mrf.mxu0  ;;  %7062 = vmatmul.mubr.msk.f32.gmra.mxu0 %vm471_vm0, %v3402_v44 }
 0x277   : > { %v3403_v62 = vmax.f32 %v3031_v51, 0.0  ;;  %4802 = vst.msk [vmem:[%s8545_s26 + $0x20] sm:$0xff] %vm4797_vm1, %v4029_v31  ;;  %v4044_v28 = vadd.f32 %v6919_v47, %v8538_v16  ;;  %v3046_v46 = vadd.f32 %v8503_v23, %v6824_v43 }
 0x278   : > { %v3040_v18 = vpop.f32.mrf.mxu1  ;;  %v4038_v40 = vpop.f32.mrf.mxu0 }
 0x279   : > { %4805 = vst.msk [vmem:[%s8545_s26 + $0x38] sm:$0xff] %vm4797_vm1, %v4044_v28  ;;  %v3041_v21 = vadd.f32 %v8503_v23, %v3040_v18  ;;  %v4039_v0 = vadd.f32 %v8538_v16, %v4038_v40  ;;  %7064 = vmatprep.mubr.msk.f32.mxu0 %vm471_vm0, %v3403_v62  ;;  %v3406_v11 = vmax.f32 %v3046_v46, 0.0 }
 0x27a   : > { %v6827_v37 = vpop.f32.mrf.mxu1  ;;  %v6922_v13 = vpop.f32.mrf.mxu0  ;;  %7065 = vmatmul.mubr.msk.f32.gmra.mxu0 %vm471_vm0, %v3404_v25 }
 0x27b   : > { %v3405_v39 = vmax.f32 %v3041_v21, 0.0  ;;  %4804 = vst.msk [vmem:[%s8545_s26 + $0x30] sm:$0xff] %vm4797_vm1, %v4039_v0  ;;  %v4054_v5 = vadd.f32 %v6922_v13, %v8538_v16  ;;  %v3056_v30 = vadd.f32 %v8503_v23, %v6827_v37 }
 0x27c   : > { %v3050_v61 = vpop.f32.mrf.mxu1  ;;  %v4048_v36 = vpop.f32.mrf.mxu0 }
 0x27d   : > { %4807 = vst.msk [vmem:[%s8545_s26 + $0x48] sm:$0xff] %vm4797_vm1, %v4054_v5  ;;  %v3051_v60 = vadd.f32 %v8503_v23, %v3050_v61  ;;  %v4049_v42 = vadd.f32 %v8538_v16, %v4048_v36  ;;  %7067 = vmatprep.mubr.msk.f32.mxu0 %vm471_vm0, %v3405_v39  ;;  %v3408_v63 = vmax.f32 %v3056_v30, 0.0 }
 0x27e   : > { %v6830_v27 = vpop.f32.mrf.mxu1  ;;  %v6925_v7 = vpop.f32.mrf.mxu0  ;;  %7068 = vmatmul.mubr.msk.f32.gmra.mxu0 %vm471_vm0, %v3406_v11 }
 0x27f   : > { %v3407_v48 = vmax.f32 %v3051_v60, 0.0  ;;  %4806 = vst.msk [vmem:[%s8545_s26 + $0x40] sm:$0xff] %vm4797_vm1, %v4049_v42  ;;  %v4064_v58 = vadd.f32 %v6925_v7, %v8538_v16  ;;  %v3066_v53 = vadd.f32 %v8503_v23, %v6830_v27 }
 0x280   : > { %v3060_v4 = vpop.f32.mrf.mxu1  ;;  %v4058_v32 = vpop.f32.mrf.mxu0 }
 0x281   : > { %4809 = vst.msk [vmem:[%s8545_s26 + $0x58] sm:$0xff] %vm4797_vm1, %v4064_v58  ;;  %v3061_v15 = vadd.f32 %v8503_v23, %v3060_v4  ;;  %v4059_v24 = vadd.f32 %v8538_v16, %v4058_v32  ;;  %7070 = vmatprep.mubr.msk.f32.mxu0 %vm471_vm0, %v3407_v48  ;;  %v3410_v41 = vmax.f32 %v3066_v53, 0.0 }
 0x282   : > { %v6833_v45 = vpop.f32.mrf.mxu1  ;;  %v6928_v14 = vpop.f32.mrf.mxu0  ;;  %7071 = vmatmul.mubr.msk.f32.gmra.mxu0 %vm471_vm0, %v3408_v63 }
 0x283   : > { %v3409_v3 = vmax.f32 %v3061_v15, 0.0  ;;  %4808 = vst.msk [vmem:[%s8545_s26 + $0x50] sm:$0xff] %vm4797_vm1, %v4059_v24  ;;  %v4074_v59 = vadd.f32 %v6928_v14, %v8538_v16  ;;  %v3076_v10 = vadd.f32 %v8503_v23, %v6833_v45 }
 0x284   : > { %v3070_v38 = vpop.f32.mrf.mxu1  ;;  %v4068_v35 = vpop.f32.mrf.mxu0 }
 0x285   : > { %4811 = vst.msk [vmem:[%s8545_s26 + $0x68] sm:$0xff] %vm4797_vm1, %v4074_v59  ;;  %v3071_v8 = vadd.f32 %v8503_v23, %v3070_v38  ;;  %v4069_v56 = vadd.f32 %v8538_v16, %v4068_v35  ;;  %7073 = vmatprep.mubr.msk.f32.mxu0 %vm471_vm0, %v3409_v3  ;;  %v3412_v55 = vmax.f32 %v3076_v10, 0.0 }
 0x286   : > { %v6836_v19 = vpop.f32.mrf.mxu1  ;;  %v6931_v9 = vpop.f32.mrf.mxu0  ;;  %7074 = vmatmul.mubr.msk.f32.gmra.mxu0 %vm471_vm0, %v3410_v41 }
 0x287   : > { %v3411_v6 = vmax.f32 %v3071_v8, 0.0  ;;  %4810 = vst.msk [vmem:[%s8545_s26 + $0x60] sm:$0xff] %vm4797_vm1, %v4069_v56  ;;  %v4084_v33 = vadd.f32 %v6931_v9, %v8538_v16  ;;  %v3086_v2 = vadd.f32 %v8503_v23, %v6836_v19 }
 0x288   : > { %v3080_v49 = vpop.f32.mrf.mxu1  ;;  %v4078_v29 = vpop.f32.mrf.mxu0 }
 0x289   : > { %4813 = vst.msk [vmem:[%s8545_s26 + $0x78] sm:$0xff] %vm4797_vm1, %v4084_v33  ;;  %v3081_v34 = vadd.f32 %v8503_v23, %v3080_v49  ;;  %v4079_v1 = vadd.f32 %v8538_v16, %v4078_v29  ;;  %7076 = vmatprep.mubr.msk.f32.mxu0 %vm471_vm0, %v3411_v6  ;;  %v3414_v50 = vmax.f32 %v3086_v2, 0.0 }
 0x28a   : > { %v6839_v26 = vpop.f32.mrf.mxu1  ;;  %v6934_v52 = vpop.f32.mrf.mxu0  ;;  %7077 = vmatmul.mubr.msk.f32.gmra.mxu0 %vm471_vm0, %v3412_v55 }
 0x28b   : > { %v3413_v12 = vmax.f32 %v3081_v34, 0.0  ;;  %4812 = vst.msk [vmem:[%s8545_s26 + $0x70] sm:$0xff] %vm4797_vm1, %v4079_v1  ;;  %v4094_v20 = vadd.f32 %v6934_v52, %v8538_v16  ;;  %v3096_v54 = vadd.f32 %v8503_v23, %v6839_v26 }
 0x28c   : > { %v3090_v44 = vpop.f32.mrf.mxu1  ;;  %v4088_v22 = vpop.f32.mrf.mxu0 }
 0x28d   : > { %4815 = vst.msk [vmem:[%s8545_s26 + $0x88] sm:$0xff] %vm4797_vm1, %v4094_v20  ;;  %v3091_v17 = vadd.f32 %v8503_v23, %v3090_v44  ;;  %v4089_v57 = vadd.f32 %v8538_v16, %v4088_v22  ;;  %7079 = vmatprep.mubr.msk.f32.mxu0 %vm471_vm0, %v3413_v12  ;;  %v3416_v62 = vmax.f32 %v3096_v54, 0.0 }
 0x28e   : > { %v6842_v51 = vpop.f32.mrf.mxu1  ;;  %v6937_v31 = vpop.f32.mrf.mxu0  ;;  %7080 = vmatmul.mubr.msk.f32.gmra.mxu0 %vm471_vm0, %v3414_v50 }
 0x28f   : > { %v3415_v43 = vmax.f32 %v3091_v17, 0.0  ;;  %4814 = vst.msk [vmem:[%s8545_s26 + $0x80] sm:$0xff] %vm4797_vm1, %v4089_v57  ;;  %v4104_v47 = vadd.f32 %v6937_v31, %v8538_v16  ;;  %v3106_v28 = vadd.f32 %v8503_v23, %v6842_v51 }
 0x290   : > { %v3100_v25 = vpop.f32.mrf.mxu1  ;;  %v4098_v46 = vpop.f32.mrf.mxu0 }
 0x291   : > { %4817 = vst.msk [vmem:[%s8545_s26 + $0x98] sm:$0xff] %vm4797_vm1, %v4104_v47  ;;  %v3101_v18 = vadd.f32 %v8503_v23, %v3100_v25  ;;  %v4099_v40 = vadd.f32 %v8538_v16, %v4098_v46  ;;  %7082 = vmatprep.mubr.msk.f32.mxu0 %vm471_vm0, %v3415_v43  ;;  %v3418_v39 = vmax.f32 %v3106_v28, 0.0 }
 0x292   : > { %v6845_v21 = vpop.f32.mrf.mxu1  ;;  %v6940_v0 = vpop.f32.mrf.mxu0  ;;  %7083 = vmatmul.mubr.msk.f32.gmra.mxu0 %vm471_vm0, %v3416_v62 }
 0x293   : > { %v3417_v37 = vmax.f32 %v3101_v18, 0.0  ;;  %4816 = vst.msk [vmem:[%s8545_s26 + $0x90] sm:$0xff] %vm4797_vm1, %v4099_v40  ;;  %v4114_v13 = vadd.f32 %v6940_v0, %v8538_v16  ;;  %v3116_v5 = vadd.f32 %v8503_v23, %v6845_v21 }
 0x294   : > { %v3110_v11 = vpop.f32.mrf.mxu1  ;;  %v4108_v30 = vpop.f32.mrf.mxu0 }
 0x295   : > { %4819 = vst.msk [vmem:[%s8545_s26 + $0xa8] sm:$0xff] %vm4797_vm1, %v4114_v13  ;;  %v3111_v61 = vadd.f32 %v8503_v23, %v3110_v11  ;;  %v4109_v36 = vadd.f32 %v8538_v16, %v4108_v30  ;;  %7085 = vmatprep.mubr.msk.f32.mxu0 %vm471_vm0, %v3417_v37  ;;  %v3420_v48 = vmax.f32 %v3116_v5, 0.0 }
 0x296   : > { %v6848_v60 = vpop.f32.mrf.mxu1  ;;  %v6943_v42 = vpop.f32.mrf.mxu0  ;;  %7086 = vmatmul.mubr.msk.f32.gmra.mxu0 %vm471_vm0, %v3418_v39 }
 0x297   : > { %v3419_v27 = vmax.f32 %v3111_v61, 0.0  ;;  %4818 = vst.msk [vmem:[%s8545_s26 + $0xa0] sm:$0xff] %vm4797_vm1, %v4109_v36  ;;  %v4124_v7 = vadd.f32 %v6943_v42, %v8538_v16  ;;  %v3126_v58 = vadd.f32 %v8503_v23, %v6848_v60 }
 0x298   : > { %v3120_v63 = vpop.f32.mrf.mxu1  ;;  %v4118_v53 = vpop.f32.mrf.mxu0 }
 0x299   : > { %4821 = vst.msk [vmem:[%s8545_s26 + $0xb8] sm:$0xff] %vm4797_vm1, %v4124_v7  ;;  %v3121_v4 = vadd.f32 %v8503_v23, %v3120_v63  ;;  %v4119_v32 = vadd.f32 %v8538_v16, %v4118_v53  ;;  %7088 = vmatprep.mubr.msk.f32.mxu0 %vm471_vm0, %v3419_v27  ;;  %v3422_v3 = vmax.f32 %v3126_v58, 0.0 }
 0x29a   : > { %v6851_v15 = vpop.f32.mrf.mxu1  ;;  %v6946_v24 = vpop.f32.mrf.mxu0  ;;  %7089 = vmatmul.mubr.msk.f32.gmra.mxu0 %vm471_vm0, %v3420_v48 }
 0x29b   : > { %v3421_v45 = vmax.f32 %v3121_v4, 0.0  ;;  %4820 = vst.msk [vmem:[%s8545_s26 + $0xb0] sm:$0xff] %vm4797_vm1, %v4119_v32  ;;  %v4134_v14 = vadd.f32 %v6946_v24, %v8538_v16  ;;  %v3136_v59 = vadd.f32 %v8503_v23, %v6851_v15 }
 0x29c   : > { %v3130_v41 = vpop.f32.mrf.mxu1  ;;  %v4128_v10 = vpop.f32.mrf.mxu0 }
 0x29d   : > { %4823 = vst.msk [vmem:[%s8545_s26 + $0xc8] sm:$0xff] %vm4797_vm1, %v4134_v14  ;;  %v3131_v38 = vadd.f32 %v8503_v23, %v3130_v41  ;;  %v4129_v35 = vadd.f32 %v8538_v16, %v4128_v10  ;;  %7091 = vmatprep.mubr.msk.f32.mxu0 %vm471_vm0, %v3421_v45  ;;  %v3424_v6 = vmax.f32 %v3136_v59, 0.0 }
 0x29e   : > { %v6854_v8 = vpop.f32.mrf.mxu1  ;;  %v6949_v56 = vpop.f32.mrf.mxu0  ;;  %7092 = vmatmul.mubr.msk.f32.gmra.mxu0 %vm471_vm0, %v3422_v3 }
 0x29f   : > { %v3423_v19 = vmax.f32 %v3131_v38, 0.0  ;;  %4822 = vst.msk [vmem:[%s8545_s26 + $0xc0] sm:$0xff] %vm4797_vm1, %v4129_v35  ;;  %v4144_v9 = vadd.f32 %v6949_v56, %v8538_v16  ;;  %v3146_v33 = vadd.f32 %v8503_v23, %v6854_v8 }
 0x2a0   : > { %v3140_v55 = vpop.f32.mrf.mxu1  ;;  %v4138_v2 = vpop.f32.mrf.mxu0 }
 0x2a1   : > { %4825 = vst.msk [vmem:[%s8545_s26 + $0xd8] sm:$0xff] %vm4797_vm1, %v4144_v9  ;;  %v3141_v49 = vadd.f32 %v8503_v23, %v3140_v55  ;;  %v4139_v29 = vadd.f32 %v8538_v16, %v4138_v2  ;;  %7094 = vmatprep.mubr.msk.f32.mxu0 %vm471_vm0, %v3423_v19  ;;  %v3426_v12 = vmax.f32 %v3146_v33, 0.0 }
 0x2a2   : > { %v6857_v34 = vpop.f32.mrf.mxu1  ;;  %v6952_v1 = vpop.f32.mrf.mxu0  ;;  %7095 = vmatmul.mubr.msk.f32.gmra.mxu0 %vm471_vm0, %v3424_v6 }
 0x2a3   : > { %v3425_v26 = vmax.f32 %v3141_v49, 0.0  ;;  %4824 = vst.msk [vmem:[%s8545_s26 + $0xd0] sm:$0xff] %vm4797_vm1, %v4139_v29  ;;  %v4154_v52 = vadd.f32 %v6952_v1, %v8538_v16  ;;  %v3156_v20 = vadd.f32 %v8503_v23, %v6857_v34 }
 0x2a4   : > { %v3150_v50 = vpop.f32.mrf.mxu1  ;;  %v4148_v54 = vpop.f32.mrf.mxu0 }
 0x2a5   : > { %4827 = vst.msk [vmem:[%s8545_s26 + $0xe8] sm:$0xff] %vm4797_vm1, %v4154_v52  ;;  %v3151_v44 = vadd.f32 %v8503_v23, %v3150_v50  ;;  %v4149_v22 = vadd.f32 %v8538_v16, %v4148_v54  ;;  %7097 = vmatprep.mubr.msk.f32.mxu0 %vm471_vm0, %v3425_v26  ;;  %v3428_v43 = vmax.f32 %v3156_v20, 0.0 }
 0x2a6   : > { %v6860_v17 = vpop.f32.mrf.mxu1  ;;  %v6955_v57 = vpop.f32.mrf.mxu0  ;;  %7098 = vmatmul.mubr.msk.f32.gmra.mxu0 %vm471_vm0, %v3426_v12 }
 0x2a7   : > { %v3427_v51 = vmax.f32 %v3151_v44, 0.0  ;;  %4826 = vst.msk [vmem:[%s8545_s26 + $0xe0] sm:$0xff] %vm4797_vm1, %v4149_v22  ;;  %v4164_v31 = vadd.f32 %v6955_v57, %v8538_v16  ;;  %v3166_v47 = vadd.f32 %v8503_v23, %v6860_v17 }
 0x2a8   : > { %v3160_v62 = vpop.f32.mrf.mxu1  ;;  %v4158_v28 = vpop.f32.mrf.mxu0 }
 0x2a9   : > { %4829 = vst.msk [vmem:[%s8545_s26 + $0xf8] sm:$0xff] %vm4797_vm1, %v4164_v31  ;;  %v3161_v25 = vadd.f32 %v8503_v23, %v3160_v62  ;;  %v4159_v46 = vadd.f32 %v8538_v16, %v4158_v28  ;;  %7100 = vmatprep.mubr.msk.f32.mxu0 %vm471_vm0, %v3427_v51  ;;  %v3430_v37 = vmax.f32 %v3166_v47, 0.0 }
 0x2aa   : > { %v6863_v18 = vpop.f32.mrf.mxu1  ;;  %v6958_v40 = vpop.f32.mrf.mxu0  ;;  %7101 = vmatmul.mubr.msk.f32.gmra.mxu0 %vm471_vm0, %v3428_v43 }
 0x2ab   : > { %v3429_v21 = vmax.f32 %v3161_v25, 0.0  ;;  %4828 = vst.msk [vmem:[%s8545_s26 + $0xf0] sm:$0xff] %vm4797_vm1, %v4159_v46  ;;  %v4174_v0 = vadd.f32 %v6958_v40, %v8538_v16  ;;  %v3176_v13 = vadd.f32 %v8503_v23, %v6863_v18 }
 0x2ac   : > { %v3170_v39 = vpop.f32.mrf.mxu1  ;;  %v4168_v5 = vpop.f32.mrf.mxu0 }
 0x2ad   : > { %4831 = vst.msk [vmem:[%s8545_s26 + $0x108] sm:$0xff] %vm4797_vm1, %v4174_v0  ;;  %v3171_v11 = vadd.f32 %v8503_v23, %v3170_v39  ;;  %v4169_v30 = vadd.f32 %v8538_v16, %v4168_v5  ;;  %7103 = vmatprep.mubr.msk.f32.mxu0 %vm471_vm0, %v3429_v21  ;;  %v3432_v27 = vmax.f32 %v3176_v13, 0.0 }
 0x2ae   : > { %v6866_v61 = vpop.f32.mrf.mxu1  ;;  %v6961_v36 = vpop.f32.mrf.mxu0  ;;  %7104 = vmatmul.mubr.msk.f32.gmra.mxu0 %vm471_vm0, %v3430_v37 }
 0x2af   : > { %v3431_v60 = vmax.f32 %v3171_v11, 0.0  ;;  %4830 = vst.msk [vmem:[%s8545_s26 + $0x100] sm:$0xff] %vm4797_vm1, %v4169_v30  ;;  %v4184_v42 = vadd.f32 %v6961_v36, %v8538_v16  ;;  %v3186_v7 = vadd.f32 %v8503_v23, %v6866_v61 }
 0x2b0   : > { %v3180_v48 = vpop.f32.mrf.mxu1  ;;  %v4178_v58 = vpop.f32.mrf.mxu0 }
 0x2b1   : > { %4833 = vst.msk [vmem:[%s8545_s26 + $0x118] sm:$0xff] %vm4797_vm1, %v4184_v42  ;;  %v3181_v63 = vadd.f32 %v8503_v23, %v3180_v48  ;;  %v4179_v53 = vadd.f32 %v8538_v16, %v4178_v58  ;;  %7106 = vmatprep.mubr.msk.f32.mxu0 %vm471_vm0, %v3431_v60  ;;  %v3434_v45 = vmax.f32 %v3186_v7, 0.0 }
 0x2b2   : > { %v6869_v4 = vpop.f32.mrf.mxu1  ;;  %v6964_v32 = vpop.f32.mrf.mxu0  ;;  %7107 = vmatmul.mubr.msk.f32.gmra.mxu0 %vm471_vm0, %v3432_v27 }
 0x2b3   : > { %v3433_v15 = vmax.f32 %v3181_v63, 0.0  ;;  %4832 = vst.msk [vmem:[%s8545_s26 + $0x110] sm:$0xff] %vm4797_vm1, %v4179_v53  ;;  %v4194_v24 = vadd.f32 %v6964_v32, %v8538_v16  ;;  %v3196_v14 = vadd.f32 %v8503_v23, %v6869_v4 }
 0x2b4   : > { %v3190_v3 = vpop.f32.mrf.mxu1  ;;  %v4188_v59 = vpop.f32.mrf.mxu0 }
 0x2b5   : > { %4835 = vst.msk [vmem:[%s8545_s26 + $0x128] sm:$0xff] %vm4797_vm1, %v4194_v24  ;;  %v3191_v41 = vadd.f32 %v8503_v23, %v3190_v3  ;;  %v4189_v10 = vadd.f32 %v8538_v16, %v4188_v59  ;;  %7109 = vmatprep.mubr.msk.f32.mxu0 %vm471_vm0, %v3433_v15  ;;  %v3436_v19 = vmax.f32 %v3196_v14, 0.0 }
 0x2b6   : > { %v6872_v38 = vpop.f32.mrf.mxu1  ;;  %v6967_v35 = vpop.f32.mrf.mxu0  ;;  %7110 = vmatmul.mubr.msk.f32.gmra.mxu0 %vm471_vm0, %v3434_v45 }
 0x2b7   : > { %v3435_v8 = vmax.f32 %v3191_v41, 0.0  ;;  %4834 = vst.msk [vmem:[%s8545_s26 + $0x120] sm:$0xff] %vm4797_vm1, %v4189_v10  ;;  %v4204_v56 = vadd.f32 %v6967_v35, %v8538_v16  ;;  %v3206_v9 = vadd.f32 %v8503_v23, %v6872_v38 }
 0x2b8   : > { %v3200_v6 = vpop.f32.mrf.mxu1  ;;  %v4198_v33 = vpop.f32.mrf.mxu0 }
 0x2b9   : > { %4837 = vst.msk [vmem:[%s8545_s26 + $0x138] sm:$0xff] %vm4797_vm1, %v4204_v56  ;;  %v3201_v55 = vadd.f32 %v8503_v23, %v3200_v6  ;;  %v4199_v2 = vadd.f32 %v8538_v16, %v4198_v33  ;;  %7112 = vmatprep.mubr.msk.f32.mxu0 %vm471_vm0, %v3435_v8  ;;  %v3438_v26 = vmax.f32 %v3206_v9, 0.0 }
 0x2ba   : > { %v6875_v49 = vpop.f32.mrf.mxu1  ;;  %v6970_v29 = vpop.f32.mrf.mxu0  ;;  %7113 = vmatmul.mubr.msk.f32.gmra.mxu0 %vm471_vm0, %v3436_v19 }
 0x2bb   : > { %v3437_v34 = vmax.f32 %v3201_v55, 0.0  ;;  %4836 = vst.msk [vmem:[%s8545_s26 + $0x130] sm:$0xff] %vm4797_vm1, %v4199_v2  ;;  %v4214_v1 = vadd.f32 %v6970_v29, %v8538_v16  ;;  %v3216_v52 = vadd.f32 %v8503_v23, %v6875_v49 }
 0x2bc   : > { %v3210_v12 = vpop.f32.mrf.mxu1  ;;  %v4208_v20 = vpop.f32.mrf.mxu0 }
 0x2bd   : > { %4839 = vst.msk [vmem:[%s8545_s26 + $0x148] sm:$0xff] %vm4797_vm1, %v4214_v1  ;;  %v3211_v50 = vadd.f32 %v8503_v23, %v3210_v12  ;;  %v4209_v54 = vadd.f32 %v8538_v16, %v4208_v20  ;;  %7115 = vmatprep.mubr.msk.f32.mxu0 %vm471_vm0, %v3437_v34  ;;  %v3440_v51 = vmax.f32 %v3216_v52, 0.0 }
 0x2be   : > { %v6878_v44 = vpop.f32.mrf.mxu1  ;;  %v6973_v22 = vpop.f32.mrf.mxu0  ;;  %7116 = vmatmul.mubr.msk.f32.gmra.mxu0 %vm471_vm0, %v3438_v26 }
 0x2bf   : > { %v3439_v17 = vmax.f32 %v3211_v50, 0.0  ;;  %4838 = vst.msk [vmem:[%s8545_s26 + $0x140] sm:$0xff] %vm4797_vm1, %v4209_v54  ;;  %v4224_v57 = vadd.f32 %v6973_v22, %v8538_v16  ;;  %v3226_v31 = vadd.f32 %v8503_v23, %v6878_v44 }
 0x2c0   : > { %v3220_v43 = vpop.f32.mrf.mxu1  ;;  %v4218_v47 = vpop.f32.mrf.mxu0 }
 0x2c1   : > { %4841 = vst.msk [vmem:[%s8545_s26 + $0x158] sm:$0xff] %vm4797_vm1, %v4224_v57  ;;  %v3221_v62 = vadd.f32 %v8503_v23, %v3220_v43  ;;  %v4219_v28 = vadd.f32 %v8538_v16, %v4218_v47  ;;  %7118 = vmatprep.mubr.msk.f32.mxu0 %vm471_vm0, %v3439_v17  ;;  %v3442_v21 = vmax.f32 %v3226_v31, 0.0 }
 0x2c2   : > { %v6881_v25 = vpop.f32.mrf.mxu1  ;;  %v6976_v46 = vpop.f32.mrf.mxu0  ;;  %7119 = vmatmul.mubr.msk.f32.gmra.mxu0 %vm471_vm0, %v3440_v51 }
 0x2c3   : > { %v3441_v18 = vmax.f32 %v3221_v62, 0.0  ;;  %4840 = vst.msk [vmem:[%s8545_s26 + $0x150] sm:$0xff] %vm4797_vm1, %v4219_v28  ;;  %v4234_v40 = vadd.f32 %v6976_v46, %v8538_v16  ;;  %v3236_v0 = vadd.f32 %v8503_v23, %v6881_v25 }
 0x2c4   : > { %v3230_v37 = vpop.f32.mrf.mxu1  ;;  %v4228_v13 = vpop.f32.mrf.mxu0 }
 0x2c5   : > { %4843 = vst.msk [vmem:[%s8545_s26 + $0x168] sm:$0xff] %vm4797_vm1, %v4234_v40  ;;  %v3231_v39 = vadd.f32 %v8503_v23, %v3230_v37  ;;  %v4229_v5 = vadd.f32 %v8538_v16, %v4228_v13  ;;  %7121 = vmatprep.mubr.msk.f32.mxu0 %vm471_vm0, %v3441_v18  ;;  %v3444_v60 = vmax.f32 %v3236_v0, 0.0 }
 0x2c6   : > { %v6884_v11 = vpop.f32.mrf.mxu1  ;;  %v6979_v30 = vpop.f32.mrf.mxu0  ;;  %7122 = vmatmul.mubr.msk.f32.gmra.mxu0 %vm471_vm0, %v3442_v21 }
 0x2c7   : > { %v3443_v61 = vmax.f32 %v3231_v39, 0.0  ;;  %4842 = vst.msk [vmem:[%s8545_s26 + $0x160] sm:$0xff] %vm4797_vm1, %v4229_v5  ;;  %v4244_v36 = vadd.f32 %v6979_v30, %v8538_v16  ;;  %v3246_v42 = vadd.f32 %v8503_v23, %v6884_v11 }
 0x2c8   : > { %v3240_v27 = vpop.f32.mrf.mxu1  ;;  %v4238_v7 = vpop.f32.mrf.mxu0 }
 0x2c9   : > { %4845 = vst.msk [vmem:[%s8545_s26 + $0x178] sm:$0xff] %vm4797_vm1, %v4244_v36  ;;  %v3241_v48 = vadd.f32 %v8503_v23, %v3240_v27  ;;  %v4239_v58 = vadd.f32 %v8538_v16, %v4238_v7  ;;  %7124 = vmatprep.mubr.msk.f32.mxu0 %vm471_vm0, %v3443_v61  ;;  %v3446_v15 = vmax.f32 %v3246_v42, 0.0 }
 0x2ca   : > { %v6887_v63 = vpop.f32.mrf.mxu1  ;;  %v6982_v53 = vpop.f32.mrf.mxu0  ;;  %7125 = vmatmul.mubr.msk.f32.gmra.mxu0 %vm471_vm0, %v3444_v60 }
 0x2cb   : > { %v3445_v4 = vmax.f32 %v3241_v48, 0.0  ;;  %4844 = vst.msk [vmem:[%s8545_s26 + $0x170] sm:$0xff] %vm4797_vm1, %v4239_v58  ;;  %v4254_v32 = vadd.f32 %v6982_v53, %v8538_v16  ;;  %v3256_v24 = vadd.f32 %v8503_v23, %v6887_v63 }
 0x2cc   : > { %v3250_v45 = vpop.f32.mrf.mxu1  ;;  %v4248_v14 = vpop.f32.mrf.mxu0 }
 0x2cd   : > { %4847 = vst.msk [vmem:[%s8545_s26 + $0x188] sm:$0xff] %vm4797_vm1, %v4254_v32  ;;  %v3251_v3 = vadd.f32 %v8503_v23, %v3250_v45  ;;  %v4249_v59 = vadd.f32 %v8538_v16, %v4248_v14  ;;  %7127 = vmatprep.mubr.msk.f32.mxu0 %vm471_vm0, %v3445_v4  ;;  %v3448_v8 = vmax.f32 %v3256_v24, 0.0 }
 0x2ce   : > { %v6890_v41 = vpop.f32.mrf.mxu1  ;;  %v6985_v10 = vpop.f32.mrf.mxu0  ;;  %7128 = vmatmul.mubr.msk.f32.gmra.mxu0 %vm471_vm0, %v3446_v15 }
 0x2cf   : > { %v3447_v38 = vmax.f32 %v3251_v3, 0.0  ;;  %4846 = vst.msk [vmem:[%s8545_s26 + $0x180] sm:$0xff] %vm4797_vm1, %v4249_v59  ;;  %v4264_v35 = vadd.f32 %v6985_v10, %v8538_v16  ;;  %v3266_v56 = vadd.f32 %v8503_v23, %v6890_v41 }
 0x2d0   : > { %v3260_v19 = vpop.f32.mrf.mxu1  ;;  %v4258_v9 = vpop.f32.mrf.mxu0 }
 0x2d1   : > { %4849 = vst.msk [vmem:[%s8545_s26 + $0x198] sm:$0xff] %vm4797_vm1, %v4264_v35  ;;  %v3261_v6 = vadd.f32 %v8503_v23, %v3260_v19  ;;  %v4259_v33 = vadd.f32 %v8538_v16, %v4258_v9  ;;  %7130 = vmatprep.mubr.msk.f32.mxu0 %vm471_vm0, %v3447_v38  ;;  %v3450_v34 = vmax.f32 %v3266_v56, 0.0 }
 0x2d2   : > { %v6893_v55 = vpop.f32.mrf.mxu1  ;;  %v6988_v2 = vpop.f32.mrf.mxu0  ;;  %7131 = vmatmul.mubr.msk.f32.gmra.mxu0 %vm471_vm0, %v3448_v8 }
 0x2d3   : > { %v3449_v49 = vmax.f32 %v3261_v6, 0.0  ;;  %4848 = vst.msk [vmem:[%s8545_s26 + $0x190] sm:$0xff] %vm4797_vm1, %v4259_v33  ;;  %v4274_v29 = vadd.f32 %v6988_v2, %v8538_v16  ;;  %v3276_v1 = vadd.f32 %v8503_v23, %v6893_v55 }
 0x2d4   : > { %v3270_v26 = vpop.f32.mrf.mxu1  ;;  %v4268_v52 = vpop.f32.mrf.mxu0 }
 0x2d5   : > { %4851 = vst.msk [vmem:[%s8545_s26 + $0x1a8] sm:$0xff] %vm4797_vm1, %v4274_v29  ;;  %v3271_v12 = vadd.f32 %v8503_v23, %v3270_v26  ;;  %v4269_v20 = vadd.f32 %v8538_v16, %v4268_v52  ;;  %7133 = vmatprep.mubr.msk.f32.mxu0 %vm471_vm0, %v3449_v49  ;;  %v3452_v17 = vmax.f32 %v3276_v1, 0.0 }
 0x2d6   : > { %v6896_v50 = vpop.f32.mrf.mxu1  ;;  %v6991_v54 = vpop.f32.mrf.mxu0  ;;  %7134 = vmatmul.mubr.msk.f32.gmra.mxu0 %vm471_vm0, %v3450_v34 }
 0x2d7   : > { %v3451_v44 = vmax.f32 %v3271_v12, 0.0  ;;  %4850 = vst.msk [vmem:[%s8545_s26 + $0x1a0] sm:$0xff] %vm4797_vm1, %v4269_v20  ;;  %v4284_v22 = vadd.f32 %v6991_v54, %v8538_v16  ;;  %v3286_v57 = vadd.f32 %v8503_v23, %v6896_v50 }
 0x2d8   : > { %v3280_v51 = vpop.f32.mrf.mxu1  ;;  %v4278_v31 = vpop.f32.mrf.mxu0 }
 0x2d9   : > { %4853 = vst.msk [vmem:[%s8545_s26 + $0x1b8] sm:$0xff] %vm4797_vm1, %v4284_v22  ;;  %v3281_v43 = vadd.f32 %v8503_v23, %v3280_v51  ;;  %v4279_v47 = vadd.f32 %v8538_v16, %v4278_v31  ;;  %7136 = vmatprep.mubr.msk.f32.mxu0 %vm471_vm0, %v3451_v44  ;;  %v3454_v18 = vmax.f32 %v3286_v57, 0.0 }
 0x2da   : > { %v6899_v62 = vpop.f32.mrf.mxu1  ;;  %v6994_v28 = vpop.f32.mrf.mxu0  ;;  %7137 = vmatmul.mubr.msk.f32.gmra.mxu0 %vm471_vm0, %v3452_v17 }
 0x2db   : > { %v3453_v25 = vmax.f32 %v3281_v43, 0.0  ;;  %4852 = vst.msk [vmem:[%s8545_s26 + $0x1b0] sm:$0xff] %vm4797_vm1, %v4279_v47  ;;  %v4294_v46 = vadd.f32 %v6994_v28, %v8538_v16  ;;  %v3296_v40 = vadd.f32 %v8503_v23, %v6899_v62 }
 0x2dc   : > { %v3290_v21 = vpop.f32.mrf.mxu1  ;;  %v4288_v0 = vpop.f32.mrf.mxu0 }
 0x2dd   : > { %4855 = vst.msk [vmem:[%s8545_s26 + $0x1c8] sm:$0xff] %vm4797_vm1, %v4294_v46  ;;  %v3291_v37 = vadd.f32 %v8503_v23, %v3290_v21  ;;  %v4289_v13 = vadd.f32 %v8538_v16, %v4288_v0  ;;  %7139 = vmatprep.mubr.msk.f32.mxu0 %vm471_vm0, %v3453_v25  ;;  %v3456_v30 = vmax.f32 %v3296_v40, 0.0 }
 0x2de   : > { %v6997_v39 = vpop.f32.mrf.mxu0  ;;  %7140 = vmatmul.mubr.msk.f32.gmra.mxu0 %vm471_vm0, %v3454_v18 }
 0x2df   : > { %v3455_v5 = vmax.f32 %v3291_v37, 0.0  ;;  %4854 = vst.msk [vmem:[%s8545_s26 + $0x1c0] sm:$0xff] %vm4797_vm1, %v4289_v13  ;;  %v4304_v11 = vadd.f32 %v6997_v39, %v8538_v16 }
 0x2e0   : > { %v4298_v61 = vpop.f32.mrf.mxu0 }
 0x2e1   : > { %4857 = vst.msk [vmem:[%s8545_s26 + $0x1d8] sm:$0xff] %vm4797_vm1, %v4304_v11  ;;  %v4299_v23 = vadd.f32 %v8538_v16, %v4298_v61  ;;  %7142 = vmatprep.mubr.msk.f32.mxu0 %vm471_vm0, %v3455_v5  ;;  %v8936_v61 = vld [vmem:[%s9355_s7] ss:$0 sm:$0xff] }
 0x2e2   : > { %v7000_v36 = vpop.f32.mrf.mxu0  ;;  %7143 = vmatmul.mubr.msk.f32.gmra.mxu0 %vm471_vm0, %v3456_v30 }
 0x2e3   : > { %4856 = vst.msk [vmem:[%s8545_s26 + $0x1d0] sm:$0xff] %vm4797_vm1, %v4299_v23  ;;  %v4314_v60 = vadd.f32 %v7000_v36, %v8538_v16 }
 0x2e4   : > { %v4308_v42 = vpop.f32.mrf.mxu0 }
 0x2e5   : > { %4859 = vst.msk [vmem:[%s8545_s26 + $0x1e8] sm:$0xff] %vm4797_vm1, %v4314_v60  ;;  %v4309_v27 = vadd.f32 %v8538_v16, %v4308_v42 }
 0x2e6   : > { %v7003_v7 = vpop.f32.mrf.mxu0 }
 0x2e7   : > { %4858 = vst.msk [vmem:[%s8545_s26 + $0x1e0] sm:$0xff] %vm4797_vm1, %v4309_v27  ;;  %v4324_v48 = vadd.f32 %v7003_v7, %v8538_v16 }
 0x2e8   : > { %v4318_v58 = vpop.f32.mrf.mxu0 }
 0x2e9   : > { %4861 = vst.msk [vmem:[%s8545_s26 + $0x1f8] sm:$0xff] %vm4797_vm1, %v4324_v48  ;;  %v4319_v63 = vadd.f32 %v8538_v16, %v4318_v58 }
 0x2ea   : > { %v7006_v53 = vpop.f32.mrf.mxu0 }
 0x2eb   : > { %4860 = vst.msk [vmem:[%s8545_s26 + $0x1f0] sm:$0xff] %vm4797_vm1, %v4319_v63  ;;  %v4334_v4 = vadd.f32 %v7006_v53, %v8538_v16 }
 0x2ec   : > { %v4328_v32 = vpop.f32.mrf.mxu0 }
 0x2ed   : > { %4863 = vst.msk [vmem:[%s8545_s26 + $0x208] sm:$0xff] %vm4797_vm1, %v4334_v4  ;;  %v4329_v15 = vadd.f32 %v8538_v16, %v4328_v32 }
 0x2ee   : > { %v7009_v24 = vpop.f32.mrf.mxu0 }
 0x2ef   : > { %4862 = vst.msk [vmem:[%s8545_s26 + $0x200] sm:$0xff] %vm4797_vm1, %v4329_v15  ;;  %v4344_v45 = vadd.f32 %v7009_v24, %v8538_v16 }
 0x2f0   : > { %v4338_v14 = vpop.f32.mrf.mxu0 }
 0x2f1   : > { %4865 = vst.msk [vmem:[%s8545_s26 + $0x218] sm:$0xff] %vm4797_vm1, %v4344_v45  ;;  %v4339_v3 = vadd.f32 %v8538_v16, %v4338_v14 }
 0x2f2   : > { %v7012_v59 = vpop.f32.mrf.mxu0 }
 0x2f3   : > { %4864 = vst.msk [vmem:[%s8545_s26 + $0x210] sm:$0xff] %vm4797_vm1, %v4339_v3  ;;  %v4354_v41 = vadd.f32 %v7012_v59, %v8538_v16 }
 0x2f4   : > { %v4348_v10 = vpop.f32.mrf.mxu0 }
 0x2f5   : > { %4867 = vst.msk [vmem:[%s8545_s26 + $0x228] sm:$0xff] %vm4797_vm1, %v4354_v41  ;;  %v4349_v38 = vadd.f32 %v8538_v16, %v4348_v10 }
 0x2f6   : > { %v7015_v35 = vpop.f32.mrf.mxu0 }
 0x2f7   : > { %4866 = vst.msk [vmem:[%s8545_s26 + $0x220] sm:$0xff] %vm4797_vm1, %v4349_v38  ;;  %v4364_v8 = vadd.f32 %v7015_v35, %v8538_v16 }
 0x2f8   : > { %v4358_v56 = vpop.f32.mrf.mxu0 }
 0x2f9   : > { %4869 = vst.msk [vmem:[%s8545_s26 + $0x238] sm:$0xff] %vm4797_vm1, %v4364_v8  ;;  %v4359_v19 = vadd.f32 %v8538_v16, %v4358_v56 }
 0x2fa   : > { %v7018_v9 = vpop.f32.mrf.mxu0 }
 0x2fb   : > { %4868 = vst.msk [vmem:[%s8545_s26 + $0x230] sm:$0xff] %vm4797_vm1, %v4359_v19  ;;  %v4374_v6 = vadd.f32 %v7018_v9, %v8538_v16 }
 0x2fc   : > { %v4368_v33 = vpop.f32.mrf.mxu0 }
 0x2fd   : > { %4871 = vst.msk [vmem:[%s8545_s26 + $0x248] sm:$0xff] %vm4797_vm1, %v4374_v6  ;;  %v4369_v55 = vadd.f32 %v8538_v16, %v4368_v33 }
 0x2fe   : > { %v7021_v2 = vpop.f32.mrf.mxu0 }
 0x2ff   : > { %4870 = vst.msk [vmem:[%s8545_s26 + $0x240] sm:$0xff] %vm4797_vm1, %v4369_v55  ;;  %v4384_v49 = vadd.f32 %v7021_v2, %v8538_v16 }
 0x300   : > { %v4378_v29 = vpop.f32.mrf.mxu0 }
 0x301   : > { %4873 = vst.msk [vmem:[%s8545_s26 + $0x258] sm:$0xff] %vm4797_vm1, %v4384_v49  ;;  %v4379_v34 = vadd.f32 %v8538_v16, %v4378_v29 }
 0x302   : > { %v7024_v1 = vpop.f32.mrf.mxu0 }
 0x303   : > { %4872 = vst.msk [vmem:[%s8545_s26 + $0x250] sm:$0xff] %vm4797_vm1, %v4379_v34  ;;  %v4394_v26 = vadd.f32 %v7024_v1, %v8538_v16 }
 0x304   : > { %v4388_v52 = vpop.f32.mrf.mxu0 }
 0x305   : > { %4875 = vst.msk [vmem:[%s8545_s26 + $0x268] sm:$0xff] %vm4797_vm1, %v4394_v26  ;;  %v4389_v12 = vadd.f32 %v8538_v16, %v4388_v52 }
 0x306   : > { %v7027_v20 = vpop.f32.mrf.mxu0 }
 0x307   : > { %4874 = vst.msk [vmem:[%s8545_s26 + $0x260] sm:$0xff] %vm4797_vm1, %v4389_v12  ;;  %v4404_v50 = vadd.f32 %v7027_v20, %v8538_v16 }
 0x308   : > { %v4398_v54 = vpop.f32.mrf.mxu0 }
 0x309   : > { %4877 = vst.msk [vmem:[%s8545_s26 + $0x278] sm:$0xff] %vm4797_vm1, %v4404_v50  ;;  %v4399_v44 = vadd.f32 %v8538_v16, %v4398_v54 }
 0x30a   : > { %v7030_v22 = vpop.f32.mrf.mxu0 }
 0x30b   : > { %4876 = vst.msk [vmem:[%s8545_s26 + $0x270] sm:$0xff] %vm4797_vm1, %v4399_v44  ;;  %v4414_v17 = vadd.f32 %v7030_v22, %v8538_v16 }
 0x30c   : > { %v4408_v57 = vpop.f32.mrf.mxu0 }
 0x30d   : > { %4879 = vst.msk [vmem:[%s8545_s26 + $0x288] sm:$0xff] %vm4797_vm1, %v4414_v17  ;;  %v4409_v51 = vadd.f32 %v8538_v16, %v4408_v57 }
 0x30e   : > { %v7033_v31 = vpop.f32.mrf.mxu0 }
 0x30f   : > { %4878 = vst.msk [vmem:[%s8545_s26 + $0x280] sm:$0xff] %vm4797_vm1, %v4409_v51  ;;  %v4424_v43 = vadd.f32 %v7033_v31, %v8538_v16 }
 0x310   : > { %v4418_v47 = vpop.f32.mrf.mxu0 }
 0x311   : > { %4881 = vst.msk [vmem:[%s8545_s26 + $0x298] sm:$0xff] %vm4797_vm1, %v4424_v43  ;;  %v4419_v62 = vadd.f32 %v8538_v16, %v4418_v47 }
 0x312   : > { %v7036_v28 = vpop.f32.mrf.mxu0 }
 0x313   : > { %4880 = vst.msk [vmem:[%s8545_s26 + $0x290] sm:$0xff] %vm4797_vm1, %v4419_v62  ;;  %v4434_v25 = vadd.f32 %v7036_v28, %v8538_v16 }
 0x314   : > { %v4428_v46 = vpop.f32.mrf.mxu0 }
 0x315   : > { %4883 = vst.msk [vmem:[%s8545_s26 + $0x2a8] sm:$0xff] %vm4797_vm1, %v4434_v25  ;;  %v4429_v18 = vadd.f32 %v8538_v16, %v4428_v46 }
 0x316   : > { %v7039_v40 = vpop.f32.mrf.mxu0 }
 0x317   : > { %4882 = vst.msk [vmem:[%s8545_s26 + $0x2a0] sm:$0xff] %vm4797_vm1, %v4429_v18  ;;  %v4444_v21 = vadd.f32 %v7039_v40, %v8538_v16 }
 0x318   : > { %v4438_v0 = vpop.f32.mrf.mxu0 }
 0x319   : > { %4885 = vst.msk [vmem:[%s8545_s26 + $0x2b8] sm:$0xff] %vm4797_vm1, %v4444_v21  ;;  %v4439_v37 = vadd.f32 %v8538_v16, %v4438_v0 }
 0x31a   : > { %v7042_v13 = vpop.f32.mrf.mxu0 }
 0x31b   : > { %4884 = vst.msk [vmem:[%s8545_s26 + $0x2b0] sm:$0xff] %vm4797_vm1, %v4439_v37  ;;  %v4454_v39 = vadd.f32 %v7042_v13, %v8538_v16 }
 0x31c   : > { %v4448_v5 = vpop.f32.mrf.mxu0 }
 0x31d   : > { %4887 = vst.msk [vmem:[%s8545_s26 + $0x2c8] sm:$0xff] %vm4797_vm1, %v4454_v39  ;;  %v4449_v11 = vadd.f32 %v8538_v16, %v4448_v5 }
 0x31e   : > { %v7045_v30 = vpop.f32.mrf.mxu0 }
 0x31f   : > { %4886 = vst.msk [vmem:[%s8545_s26 + $0x2c0] sm:$0xff] %vm4797_vm1, %v4449_v11  ;;  %v4464_v23 = vadd.f32 %v8936_v61, %v7045_v30 }
 0x320   : > { %v4458_v36 = vpop.f32.mrf.mxu0 }
 0x321   : > { %4889 = vst.msk [vmem:[%s8545_s26 + $0x2d8] sm:$0xff] %vm4797_vm1, %v4464_v23  ;;  %v4459_v60 = vadd.f32 %v8936_v61, %v4458_v36 }
 0x322   : > { %v7048_v42 = vpop.f32.mrf.mxu0 }
 0x323   : > { %4888 = vst.msk [vmem:[%s8545_s26 + $0x2d0] sm:$0xff] %vm4797_vm1, %v4459_v60  ;;  %v4474_v16 = vadd.f32 %v8936_v61, %v7048_v42 }
 0x324   : > { %v4468_v27 = vpop.f32.mrf.mxu0 }
 0x325   : > { %4891 = vst.msk [vmem:[%s8545_s26 + $0x2e8] sm:$0xff] %vm4797_vm1, %v4474_v16  ;;  %v4469_v7 = vadd.f32 %v8936_v61, %v4468_v27 }
 0x326   : > { %v7051_v48 = vpop.f32.mrf.mxu0 }
 0x327   : > { %4890 = vst.msk [vmem:[%s8545_s26 + $0x2e0] sm:$0xff] %vm4797_vm1, %v4469_v7  ;;  %v4484_v58 = vadd.f32 %v8936_v61, %v7051_v48 }
 0x328   : > { %v4478_v63 = vpop.f32.mrf.mxu0 }
 0x329   : > { %4893 = vst.msk [vmem:[%s8545_s26 + $0x2f8] sm:$0xff] %vm4797_vm1, %v4484_v58  ;;  %v4479_v53 = vadd.f32 %v8936_v61, %v4478_v63 }
 0x32a   : > { %v7054_v4 = vpop.f32.mrf.mxu0 }
 0x32b   : > { %4892 = vst.msk [vmem:[%s8545_s26 + $0x2f0] sm:$0xff] %vm4797_vm1, %v4479_v53  ;;  %v4494_v32 = vadd.f32 %v8936_v61, %v7054_v4 }
 0x32c   : > { %v4488_v15 = vpop.f32.mrf.mxu0 }
 0x32d   : > { %4895 = vst.msk [vmem:[%s8545_s26 + $0x308] sm:$0xff] %vm4797_vm1, %v4494_v32  ;;  %v4489_v24 = vadd.f32 %v8936_v61, %v4488_v15 }
 0x32e   : > { %v7057_v45 = vpop.f32.mrf.mxu0 }
 0x32f   : > { %4894 = vst.msk [vmem:[%s8545_s26 + $0x300] sm:$0xff] %vm4797_vm1, %v4489_v24  ;;  %v4504_v14 = vadd.f32 %v8936_v61, %v7057_v45 }
 0x330   : > { %v4498_v3 = vpop.f32.mrf.mxu0 }
 0x331   : > { %4897 = vst.msk [vmem:[%s8545_s26 + $0x318] sm:$0xff] %vm4797_vm1, %v4504_v14  ;;  %v4499_v59 = vadd.f32 %v8936_v61, %v4498_v3 }
 0x332   : > { %v7060_v41 = vpop.f32.mrf.mxu0 }
 0x333   : > { %4896 = vst.msk [vmem:[%s8545_s26 + $0x310] sm:$0xff] %vm4797_vm1, %v4499_v59  ;;  %v4514_v10 = vadd.f32 %v8936_v61, %v7060_v41 }
 0x334   : > { %v4508_v38 = vpop.f32.mrf.mxu0 }
 0x335   : > { %4899 = vst.msk [vmem:[%s8545_s26 + $0x328] sm:$0xff] %vm4797_vm1, %v4514_v10  ;;  %v4509_v35 = vadd.f32 %v8936_v61, %v4508_v38 }
 0x336   : > { %v7063_v8 = vpop.f32.mrf.mxu0 }
 0x337   : > { %4898 = vst.msk [vmem:[%s8545_s26 + $0x320] sm:$0xff] %vm4797_vm1, %v4509_v35  ;;  %v4524_v56 = vadd.f32 %v8936_v61, %v7063_v8 }
 0x338   : > { %v4518_v19 = vpop.f32.mrf.mxu0 }
 0x339   : > { %4901 = vst.msk [vmem:[%s8545_s26 + $0x338] sm:$0xff] %vm4797_vm1, %v4524_v56  ;;  %v4519_v9 = vadd.f32 %v8936_v61, %v4518_v19 }
 0x33a   : > { %v7066_v6 = vpop.f32.mrf.mxu0 }
 0x33b   : > { %4900 = vst.msk [vmem:[%s8545_s26 + $0x330] sm:$0xff] %vm4797_vm1, %v4519_v9  ;;  %v4534_v33 = vadd.f32 %v8936_v61, %v7066_v6 }
 0x33c   : > { %v4528_v55 = vpop.f32.mrf.mxu0 }
 0x33d   : > { %4903 = vst.msk [vmem:[%s8545_s26 + $0x348] sm:$0xff] %vm4797_vm1, %v4534_v33  ;;  %v4529_v2 = vadd.f32 %v8936_v61, %v4528_v55 }
 0x33e   : > { %v7069_v49 = vpop.f32.mrf.mxu0 }
 0x33f   : > { %4902 = vst.msk [vmem:[%s8545_s26 + $0x340] sm:$0xff] %vm4797_vm1, %v4529_v2  ;;  %v4544_v29 = vadd.f32 %v8936_v61, %v7069_v49 }
 0x340   : > { %v4538_v34 = vpop.f32.mrf.mxu0 }
 0x341   : > { %4905 = vst.msk [vmem:[%s8545_s26 + $0x358] sm:$0xff] %vm4797_vm1, %v4544_v29  ;;  %v4539_v1 = vadd.f32 %v8936_v61, %v4538_v34 }
 0x342   : > { %v7072_v26 = vpop.f32.mrf.mxu0 }
 0x343   : > { %4904 = vst.msk [vmem:[%s8545_s26 + $0x350] sm:$0xff] %vm4797_vm1, %v4539_v1  ;;  %v4554_v52 = vadd.f32 %v8936_v61, %v7072_v26 }
 0x344   : > { %v4548_v12 = vpop.f32.mrf.mxu0 }
 0x345   : > { %4907 = vst.msk [vmem:[%s8545_s26 + $0x368] sm:$0xff] %vm4797_vm1, %v4554_v52  ;;  %v4549_v20 = vadd.f32 %v8936_v61, %v4548_v12 }
 0x346   : > { %v7075_v50 = vpop.f32.mrf.mxu0 }
 0x347   : > { %4906 = vst.msk [vmem:[%s8545_s26 + $0x360] sm:$0xff] %vm4797_vm1, %v4549_v20  ;;  %v4564_v54 = vadd.f32 %v8936_v61, %v7075_v50 }
 0x348   : > { %v4558_v44 = vpop.f32.mrf.mxu0 }
 0x349   : > { %4909 = vst.msk [vmem:[%s8545_s26 + $0x378] sm:$0xff] %vm4797_vm1, %v4564_v54  ;;  %v4559_v22 = vadd.f32 %v8936_v61, %v4558_v44 }
 0x34a   : > { %v7078_v17 = vpop.f32.mrf.mxu0 }
 0x34b   : > { %4908 = vst.msk [vmem:[%s8545_s26 + $0x370] sm:$0xff] %vm4797_vm1, %v4559_v22  ;;  %v4574_v57 = vadd.f32 %v8936_v61, %v7078_v17 }
 0x34c   : > { %v4568_v51 = vpop.f32.mrf.mxu0 }
 0x34d   : > { %4911 = vst.msk [vmem:[%s8545_s26 + $0x388] sm:$0xff] %vm4797_vm1, %v4574_v57  ;;  %v4569_v31 = vadd.f32 %v8936_v61, %v4568_v51 }
 0x34e   : > { %v7081_v43 = vpop.f32.mrf.mxu0 }
 0x34f   : > { %4910 = vst.msk [vmem:[%s8545_s26 + $0x380] sm:$0xff] %vm4797_vm1, %v4569_v31  ;;  %v4584_v47 = vadd.f32 %v8936_v61, %v7081_v43 }
 0x350   : > { %v4578_v62 = vpop.f32.mrf.mxu0 }
 0x351   : > { %4913 = vst.msk [vmem:[%s8545_s26 + $0x398] sm:$0xff] %vm4797_vm1, %v4584_v47  ;;  %v4579_v28 = vadd.f32 %v8936_v61, %v4578_v62 }
 0x352   : > { %v7084_v25 = vpop.f32.mrf.mxu0 }
 0x353   : > { %4912 = vst.msk [vmem:[%s8545_s26 + $0x390] sm:$0xff] %vm4797_vm1, %v4579_v28  ;;  %v4594_v46 = vadd.f32 %v8936_v61, %v7084_v25 }
 0x354   : > { %v4588_v18 = vpop.f32.mrf.mxu0 }
 0x355   : > { %4915 = vst.msk [vmem:[%s8545_s26 + $0x3a8] sm:$0xff] %vm4797_vm1, %v4594_v46  ;;  %v4589_v40 = vadd.f32 %v8936_v61, %v4588_v18 }
 0x356   : > { %v7087_v21 = vpop.f32.mrf.mxu0 }
 0x357   : > { %4914 = vst.msk [vmem:[%s8545_s26 + $0x3a0] sm:$0xff] %vm4797_vm1, %v4589_v40  ;;  %v4604_v0 = vadd.f32 %v8936_v61, %v7087_v21 }
 0x358   : > { %v4598_v37 = vpop.f32.mrf.mxu0 }
 0x359   : > { %4917 = vst.msk [vmem:[%s8545_s26 + $0x3b8] sm:$0xff] %vm4797_vm1, %v4604_v0  ;;  %v4599_v13 = vadd.f32 %v8936_v61, %v4598_v37 }
 0x35a   : > { %v7090_v39 = vpop.f32.mrf.mxu0 }
 0x35b   : > { %4916 = vst.msk [vmem:[%s8545_s26 + $0x3b0] sm:$0xff] %vm4797_vm1, %v4599_v13  ;;  %v4614_v5 = vadd.f32 %v8936_v61, %v7090_v39 }
 0x35c   : > { %v4608_v11 = vpop.f32.mrf.mxu0 }
 0x35d   : > { %4919 = vst.msk [vmem:[%s8545_s26 + $0x3c8] sm:$0xff] %vm4797_vm1, %v4614_v5  ;;  %v4609_v30 = vadd.f32 %v8936_v61, %v4608_v11 }
 0x35e   : > { %v7093_v23 = vpop.f32.mrf.mxu0 }
 0x35f   : > { %4918 = vst.msk [vmem:[%s8545_s26 + $0x3c0] sm:$0xff] %vm4797_vm1, %v4609_v30  ;;  %v4624_v36 = vadd.f32 %v8936_v61, %v7093_v23 }
 0x360   : > { %v4618_v60 = vpop.f32.mrf.mxu0 }
 0x361   : > { %4921 = vst.msk [vmem:[%s8545_s26 + $0x3d8] sm:$0xff] %vm4797_vm1, %v4624_v36  ;;  %v4619_v42 = vadd.f32 %v8936_v61, %v4618_v60 }
 0x362   : > { %v7096_v16 = vpop.f32.mrf.mxu0 }
 0x363   : > { %4920 = vst.msk [vmem:[%s8545_s26 + $0x3d0] sm:$0xff] %vm4797_vm1, %v4619_v42  ;;  %v4634_v27 = vadd.f32 %v8936_v61, %v7096_v16 }
 0x364   : > { %v4628_v7 = vpop.f32.mrf.mxu0 }
 0x365   : > { %4923 = vst.msk [vmem:[%s8545_s26 + $0x3e8] sm:$0xff] %vm4797_vm1, %v4634_v27  ;;  %v4629_v48 = vadd.f32 %v8936_v61, %v4628_v7 }
 0x366   : > { %v7099_v58 = vpop.f32.mrf.mxu0 }
 0x367   : > { %4922 = vst.msk [vmem:[%s8545_s26 + $0x3e0] sm:$0xff] %vm4797_vm1, %v4629_v48  ;;  %v4644_v63 = vadd.f32 %v8936_v61, %v7099_v58 }
 0x368   : > { %v4638_v53 = vpop.f32.mrf.mxu0 }
 0x369   : > { %4925 = vst.msk [vmem:[%s8545_s26 + $0x3f8] sm:$0xff] %vm4797_vm1, %v4644_v63  ;;  %v4639_v4 = vadd.f32 %v8936_v61, %v4638_v53 }
 0x36a   : > { %v7102_v32 = vpop.f32.mrf.mxu0 }
 0x36b   : > { %4924 = vst.msk [vmem:[%s8545_s26 + $0x3f0] sm:$0xff] %vm4797_vm1, %v4639_v4  ;;  %v4654_v15 = vadd.f32 %v8936_v61, %v7102_v32 }
 0x36c   : > { %v4648_v24 = vpop.f32.mrf.mxu0 }
 0x36d   : > { %4927 = vst.msk [vmem:[%s8545_s26 + $0x408] sm:$0xff] %vm4797_vm1, %v4654_v15  ;;  %v4649_v45 = vadd.f32 %v8936_v61, %v4648_v24 }
 0x36e   : > { %v7105_v14 = vpop.f32.mrf.mxu0 }
 0x36f   : > { %4926 = vst.msk [vmem:[%s8545_s26 + $0x400] sm:$0xff] %vm4797_vm1, %v4649_v45  ;;  %v4664_v3 = vadd.f32 %v8936_v61, %v7105_v14 }
 0x370   : > { %v4658_v59 = vpop.f32.mrf.mxu0 }
 0x371   : > { %4929 = vst.msk [vmem:[%s8545_s26 + $0x418] sm:$0xff] %vm4797_vm1, %v4664_v3  ;;  %v4659_v41 = vadd.f32 %v8936_v61, %v4658_v59 }
 0x372   : > { %v7108_v10 = vpop.f32.mrf.mxu0 }
 0x373   : > { %4928 = vst.msk [vmem:[%s8545_s26 + $0x410] sm:$0xff] %vm4797_vm1, %v4659_v41  ;;  %v4674_v38 = vadd.f32 %v8936_v61, %v7108_v10 }
 0x374   : > { %v4668_v35 = vpop.f32.mrf.mxu0 }
 0x375   : > { %4931 = vst.msk [vmem:[%s8545_s26 + $0x428] sm:$0xff] %vm4797_vm1, %v4674_v38  ;;  %v4669_v8 = vadd.f32 %v8936_v61, %v4668_v35 }
 0x376   : > { %v7111_v56 = vpop.f32.mrf.mxu0 }
 0x377   : > { %4930 = vst.msk [vmem:[%s8545_s26 + $0x420] sm:$0xff] %vm4797_vm1, %v4669_v8  ;;  %v4684_v19 = vadd.f32 %v8936_v61, %v7111_v56 }
 0x378   : > { %v4678_v9 = vpop.f32.mrf.mxu0 }
 0x379   : > { %4933 = vst.msk [vmem:[%s8545_s26 + $0x438] sm:$0xff] %vm4797_vm1, %v4684_v19  ;;  %v4679_v6 = vadd.f32 %v8936_v61, %v4678_v9 }
 0x37a   : > { %v7114_v33 = vpop.f32.mrf.mxu0 }
 0x37b   : > { %4932 = vst.msk [vmem:[%s8545_s26 + $0x430] sm:$0xff] %vm4797_vm1, %v4679_v6  ;;  %v4694_v55 = vadd.f32 %v8936_v61, %v7114_v33 }
 0x37c   : > { %v4688_v2 = vpop.f32.mrf.mxu0 }
 0x37d   : > { %4935 = vst.msk [vmem:[%s8545_s26 + $0x448] sm:$0xff] %vm4797_vm1, %v4694_v55  ;;  %v4689_v49 = vadd.f32 %v8936_v61, %v4688_v2 }
 0x37e   : > { %v7117_v29 = vpop.f32.mrf.mxu0 }
 0x37f   : > { %4934 = vst.msk [vmem:[%s8545_s26 + $0x440] sm:$0xff] %vm4797_vm1, %v4689_v49  ;;  %v4704_v34 = vadd.f32 %v8936_v61, %v7117_v29 }
 0x380   : > { %v4698_v1 = vpop.f32.mrf.mxu0 }
 0x381   : > { %4937 = vst.msk [vmem:[%s8545_s26 + $0x458] sm:$0xff] %vm4797_vm1, %v4704_v34  ;;  %v4699_v26 = vadd.f32 %v8936_v61, %v4698_v1 }
 0x382   : > { %v7120_v52 = vpop.f32.mrf.mxu0 }
 0x383   : > { %4936 = vst.msk [vmem:[%s8545_s26 + $0x450] sm:$0xff] %vm4797_vm1, %v4699_v26  ;;  %v4714_v12 = vadd.f32 %v8936_v61, %v7120_v52 }
 0x384   : > { %v4708_v20 = vpop.f32.mrf.mxu0 }
 0x385   : > { %4939 = vst.msk [vmem:[%s8545_s26 + $0x468] sm:$0xff] %vm4797_vm1, %v4714_v12  ;;  %v4709_v50 = vadd.f32 %v8936_v61, %v4708_v20 }
 0x386   : > { %v7123_v54 = vpop.f32.mrf.mxu0 }
 0x387   : > { %4938 = vst.msk [vmem:[%s8545_s26 + $0x460] sm:$0xff] %vm4797_vm1, %v4709_v50  ;;  %v4724_v44 = vadd.f32 %v8936_v61, %v7123_v54 }
 0x388   : > { %v4718_v22 = vpop.f32.mrf.mxu0 }
 0x389   : > { %4941 = vst.msk [vmem:[%s8545_s26 + $0x478] sm:$0xff] %vm4797_vm1, %v4724_v44  ;;  %v4719_v17 = vadd.f32 %v8936_v61, %v4718_v22 }
 0x38a   : > { %v7126_v57 = vpop.f32.mrf.mxu0 }
 0x38b   : > { %4940 = vst.msk [vmem:[%s8545_s26 + $0x470] sm:$0xff] %vm4797_vm1, %v4719_v17  ;;  %v4734_v51 = vadd.f32 %v8936_v61, %v7126_v57 }
 0x38c   : > { %v4728_v31 = vpop.f32.mrf.mxu0 }
 0x38d   : > { %4943 = vst.msk [vmem:[%s8545_s26 + $0x488] sm:$0xff] %vm4797_vm1, %v4734_v51  ;;  %v4729_v43 = vadd.f32 %v8936_v61, %v4728_v31 }
 0x38e   : > { %v7129_v47 = vpop.f32.mrf.mxu0 }
 0x38f   : > { %4942 = vst.msk [vmem:[%s8545_s26 + $0x480] sm:$0xff] %vm4797_vm1, %v4729_v43  ;;  %v4744_v62 = vadd.f32 %v8936_v61, %v7129_v47 }
 0x390   : > { %v4738_v28 = vpop.f32.mrf.mxu0 }
 0x391   : > { %4945 = vst.msk [vmem:[%s8545_s26 + $0x498] sm:$0xff] %vm4797_vm1, %v4744_v62  ;;  %v4739_v25 = vadd.f32 %v8936_v61, %v4738_v28 }
 0x392   : > { %v7132_v46 = vpop.f32.mrf.mxu0 }
 0x393   : > { %4944 = vst.msk [vmem:[%s8545_s26 + $0x490] sm:$0xff] %vm4797_vm1, %v4739_v25  ;;  %v4754_v18 = vadd.f32 %v8936_v61, %v7132_v46 }
 0x394   : > { %v4748_v40 = vpop.f32.mrf.mxu0 }
 0x395   : > { %4947 = vst.msk [vmem:[%s8545_s26 + $0x4a8] sm:$0xff] %vm4797_vm1, %v4754_v18  ;;  %v4749_v21 = vadd.f32 %v8936_v61, %v4748_v40 }
 0x396   : > { %v7135_v0 = vpop.f32.mrf.mxu0 }
 0x397   : > { %4946 = vst.msk [vmem:[%s8545_s26 + $0x4a0] sm:$0xff] %vm4797_vm1, %v4749_v21  ;;  %v4764_v37 = vadd.f32 %v8936_v61, %v7135_v0 }
 0x398   : > { %v4758_v13 = vpop.f32.mrf.mxu0 }
 0x399   : > { %4949 = vst.msk [vmem:[%s8545_s26 + $0x4b8] sm:$0xff] %vm4797_vm1, %v4764_v37  ;;  %v4759_v39 = vadd.f32 %v8936_v61, %v4758_v13 }
 0x39a   : > { %v7138_v5 = vpop.f32.mrf.mxu0 }
 0x39b   : > { %4948 = vst.msk [vmem:[%s8545_s26 + $0x4b0] sm:$0xff] %vm4797_vm1, %v4759_v39  ;;  %v4774_v11 = vadd.f32 %v8936_v61, %v7138_v5 }
 0x39c   : > { %v4768_v30 = vpop.f32.mrf.mxu0 }
 0x39d   : > { %4951 = vst.msk [vmem:[%s8545_s26 + $0x4c8] sm:$0xff] %vm4797_vm1, %v4774_v11  ;;  %v4769_v23 = vadd.f32 %v8936_v61, %v4768_v30 }
 0x39e   : > { %v7141_v36 = vpop.f32.mrf.mxu0 }
 0x39f   : > { %4950 = vst.msk [vmem:[%s8545_s26 + $0x4c0] sm:$0xff] %vm4797_vm1, %v4769_v23  ;;  %v4784_v60 = vadd.f32 %v8936_v61, %v7141_v36 }
 0x3a0   : > { %v4778_v42 = vpop.f32.mrf.mxu0 }
 0x3a1   : > { %4953 = vst.msk [vmem:[%s8545_s26 + $0x4d8] sm:$0xff] %vm4797_vm1, %v4784_v60  ;;  %v4779_v16 = vadd.f32 %v8936_v61, %v4778_v42 }
 0x3a2   : > { %v7144_v27 = vpop.f32.mrf.mxu0 }
 0x3a3   : > { %4952 = vst.msk [vmem:[%s8545_s26 + $0x4d0] sm:$0xff] %vm4797_vm1, %v4779_v16  ;;  %v4794_v7 = vadd.f32 %v8936_v61, %v7144_v27  ;;  %4962 = sbr.rel (!%p7403_p4) target bundleno = 1000 (0x3e8), region = 52 }
 0x3a4   : > { %v4788_v48 = vpop.f32.mrf.mxu0 }
 0x3a5   : > { %4955 = vst.msk [vmem:[%s8545_s26 + $0x4e8] sm:$0xff] %vm4797_vm1, %v4794_v7  ;;  %v4789_v58 = vadd.f32 %v8936_v61, %v4788_v48 }
 0x3a7   : > { %4954 = vst.msk [vmem:[%s8545_s26 + $0x4e0] sm:$0xff] %vm4797_vm1, %v4789_v58 }
 0x3a8   : > { %s9403_s24 = smov (!%p4965_p8, %s4964_s24), 158 }
 0x3a9   : > { %s5906_s13 = sshll.u32 %s9403_s24, 7 }
 0x3aa   : > { %p5909_p9 = scmp.eq.s32.totalorder %s5906_s13, 0 }
 0x3ab   : > { %s9155_s14 = sshrl.u32 (!%p5909_p9), %s9403_s24, 6 }
 0x3ac   : > { %4973 = sbr.rel (%p5909_p9) target bundleno = 1000 (0x3e8), region = 56  ;;  %p5910_p10 = scmp.le.s32.totalorder (!%p5909_p9), %s9155_s14, 0 }
 0x3b1   : > { %5380 = sbr.rel (%p5910_p10) target bundleno = 983 (0x3d7), region = 132  ;;  %s9394_s29 = smov (!%p5910_p10), %s9149_s10 }
 0x3b2   : > { %s9395_s12 = smov (!%p5910_p10), %s8545_s26  ;;  %s9164_s17 = smov (!%p5910_p10), 0  }
 0x3b3   : > { %s9166_s15 = smov (!%p5910_p10), 0  }
 0x3b6 LB: >> { %v5162_v61 = vld [vmem:[%s7307_s12] sm:$0xff]  ;;  %v5164_v63 = vld [vmem:[%s7307_s12 + $0x8] sm:$0xff]  ;;  %v5166_v53 = vld [vmem:[%s7307_s12 + $0x10] sm:$0xff]  ;;  %s5290_s16 = sadd.s32 1, %s7311_s17  ;;  %s5156_s15 = sadd.s32 1, %s7315_s15   ;;  %s7315_s15 = sphi %s9166_s15, %s5156_s15   ;;  %s7311_s17 = sphi %s9164_s17, %s9398_s17   ;;  %s7307_s12 = sphi %s9395_s12, %s9397_s12   ;;  %s7303_s29 = sphi %s9394_s29, %s9396_s29  }
 0x3b7   : >> { %5163 = vst [vmem:[%s7303_s29] sm:$0xff] %v5162_v61  ;;  %5165 = vst [vmem:[%s7303_s29 + $0x8] sm:$0xff] %v5164_v63  ;;  %v5168_v4 = vld [vmem:[%s7307_s12 + $0x18] sm:$0xff]  ;;  %v5170_v32 = vld [vmem:[%s7307_s12 + $0x20] sm:$0xff]  ;;  %p5291_p11 = scmp.ge.s32.totalorder %s5290_s16, %s9155_s14  ;;  %p5155_p12 = scmp.ge.s32.totalorder %s5156_s15, %s9155_s14 }
 0x3b8   : >> { %5167 = vst [vmem:[%s7303_s29 + $0x10] sm:$0xff] %v5166_v53  ;;  %v5172_v15 = vld [vmem:[%s7307_s12 + $0x28] sm:$0xff]  ;;  %5169 = vst [vmem:[%s7303_s29 + $0x18] sm:$0xff] %v5168_v4  ;;  %v5174_v24 = vld [vmem:[%s7307_s12 + $0x30] sm:$0xff] }
 0x3b9   : >> { %5171 = vst [vmem:[%s7303_s29 + $0x20] sm:$0xff] %v5170_v32  ;;  %5173 = vst [vmem:[%s7303_s29 + $0x28] sm:$0xff] %v5172_v15  ;;  %v5176_v45 = vld [vmem:[%s7307_s12 + $0x38] sm:$0xff]  ;;  %v5178_v14 = vld [vmem:[%s7307_s12 + $0x40] sm:$0xff]  ;;  %s9405_s16 = smov (%p5291_p11, %s5290_s16), 0 }
 0x3ba   : >> { %5175 = vst [vmem:[%s7303_s29 + $0x30] sm:$0xff] %v5174_v24  ;;  %5177 = vst [vmem:[%s7303_s29 + $0x38] sm:$0xff] %v5176_v45  ;;  %v5180_v3 = vld [vmem:[%s7307_s12 + $0x48] sm:$0xff]  ;;  %v5182_v59 = vld [vmem:[%s7307_s12 + $0x50] sm:$0xff]  ;;  %s5911_s18 = sshll.u32 %s9405_s16, 9  ;;  %s9398_s17 = smov %s9405_s16 }
 0x3bb   : >> { %5179 = vst [vmem:[%s7303_s29 + $0x40] sm:$0xff] %v5178_v14  ;;  %v5184_v41 = vld [vmem:[%s7307_s12 + $0x58] sm:$0xff]  ;;  %5181 = vst [vmem:[%s7303_s29 + $0x48] sm:$0xff] %v5180_v3  ;;  %v5186_v10 = vld [vmem:[%s7307_s12 + $0x60] sm:$0xff]  ;;  %s9222_s19 = scalar_lea.vmem %s8545_s26, %s5911_s18 [#allocation4]   ;;  %s9225_s20 = scalar_lea.vmem %s9149_s10, %s5911_s18  }
 0x3bc   : >> { %5183 = vst [vmem:[%s7303_s29 + $0x50] sm:$0xff] %v5182_v59  ;;  %5185 = vst [vmem:[%s7303_s29 + $0x58] sm:$0xff] %v5184_v41  ;;  %v5188_v38 = vld [vmem:[%s7307_s12 + $0x68] sm:$0xff]  ;;  %v5190_v35 = vld [vmem:[%s7307_s12 + $0x70] sm:$0xff] }
 0x3bd   : >> { %5187 = vst [vmem:[%s7303_s29 + $0x60] sm:$0xff] %v5186_v10  ;;  %5189 = vst [vmem:[%s7303_s29 + $0x68] sm:$0xff] %v5188_v38  ;;  %v5192_v8 = vld [vmem:[%s7307_s12 + $0x78] sm:$0xff]  ;;  %v5194_v56 = vld [vmem:[%s7307_s12 + $0x80] sm:$0xff] }
 0x3be   : >> { %5191 = vst [vmem:[%s7303_s29 + $0x70] sm:$0xff] %v5190_v35  ;;  %v5196_v19 = vld [vmem:[%s7307_s12 + $0x88] sm:$0xff]  ;;  %5193 = vst [vmem:[%s7303_s29 + $0x78] sm:$0xff] %v5192_v8  ;;  %v5198_v9 = vld [vmem:[%s7307_s12 + $0x90] sm:$0xff] }
 0x3bf   : >> { %5195 = vst [vmem:[%s7303_s29 + $0x80] sm:$0xff] %v5194_v56  ;;  %5197 = vst [vmem:[%s7303_s29 + $0x88] sm:$0xff] %v5196_v19  ;;  %v5200_v6 = vld [vmem:[%s7307_s12 + $0x98] sm:$0xff]  ;;  %v5202_v33 = vld [vmem:[%s7307_s12 + $0xa0] sm:$0xff] }
 0x3c0   : >> { %5199 = vst [vmem:[%s7303_s29 + $0x90] sm:$0xff] %v5198_v9  ;;  %5201 = vst [vmem:[%s7303_s29 + $0x98] sm:$0xff] %v5200_v6  ;;  %v5204_v55 = vld [vmem:[%s7307_s12 + $0xa8] sm:$0xff]  ;;  %v5206_v2 = vld [vmem:[%s7307_s12 + $0xb0] sm:$0xff] }
 0x3c1   : >> { %5203 = vst [vmem:[%s7303_s29 + $0xa0] sm:$0xff] %v5202_v33  ;;  %v5208_v49 = vld [vmem:[%s7307_s12 + $0xb8] sm:$0xff]  ;;  %5205 = vst [vmem:[%s7303_s29 + $0xa8] sm:$0xff] %v5204_v55  ;;  %v5210_v29 = vld [vmem:[%s7307_s12 + $0xc0] sm:$0xff] }
 0x3c2   : >> { %5207 = vst [vmem:[%s7303_s29 + $0xb0] sm:$0xff] %v5206_v2  ;;  %5209 = vst [vmem:[%s7303_s29 + $0xb8] sm:$0xff] %v5208_v49  ;;  %v5212_v34 = vld [vmem:[%s7307_s12 + $0xc8] sm:$0xff]  ;;  %v5214_v1 = vld [vmem:[%s7307_s12 + $0xd0] sm:$0xff] }
 0x3c3   : >> { %5211 = vst [vmem:[%s7303_s29 + $0xc0] sm:$0xff] %v5210_v29  ;;  %5213 = vst [vmem:[%s7303_s29 + $0xc8] sm:$0xff] %v5212_v34  ;;  %v5216_v26 = vld [vmem:[%s7307_s12 + $0xd8] sm:$0xff]  ;;  %v5218_v52 = vld [vmem:[%s7307_s12 + $0xe0] sm:$0xff] }
 0x3c4   : >> { %5215 = vst [vmem:[%s7303_s29 + $0xd0] sm:$0xff] %v5214_v1  ;;  %v5220_v12 = vld [vmem:[%s7307_s12 + $0xe8] sm:$0xff]  ;;  %5217 = vst [vmem:[%s7303_s29 + $0xd8] sm:$0xff] %v5216_v26  ;;  %v5222_v20 = vld [vmem:[%s7307_s12 + $0xf0] sm:$0xff] }
 0x3c5   : >> { %5219 = vst [vmem:[%s7303_s29 + $0xe0] sm:$0xff] %v5218_v52  ;;  %5221 = vst [vmem:[%s7303_s29 + $0xe8] sm:$0xff] %v5220_v12  ;;  %v5224_v50 = vld [vmem:[%s7307_s12 + $0xf8] sm:$0xff]  ;;  %v5226_v54 = vld [vmem:[%s7307_s12 + $0x100] sm:$0xff] }
 0x3c6   : >> { %5223 = vst [vmem:[%s7303_s29 + $0xf0] sm:$0xff] %v5222_v20  ;;  %5225 = vst [vmem:[%s7303_s29 + $0xf8] sm:$0xff] %v5224_v50  ;;  %v5228_v44 = vld [vmem:[%s7307_s12 + $0x108] sm:$0xff]  ;;  %v5230_v22 = vld [vmem:[%s7307_s12 + $0x110] sm:$0xff] }
 0x3c7   : >> { %5227 = vst [vmem:[%s7303_s29 + $0x100] sm:$0xff] %v5226_v54  ;;  %v5232_v17 = vld [vmem:[%s7307_s12 + $0x118] sm:$0xff]  ;;  %5229 = vst [vmem:[%s7303_s29 + $0x108] sm:$0xff] %v5228_v44  ;;  %v5234_v57 = vld [vmem:[%s7307_s12 + $0x120] sm:$0xff] }
 0x3c8   : >> { %5231 = vst [vmem:[%s7303_s29 + $0x110] sm:$0xff] %v5230_v22  ;;  %5233 = vst [vmem:[%s7303_s29 + $0x118] sm:$0xff] %v5232_v17  ;;  %v5236_v51 = vld [vmem:[%s7307_s12 + $0x128] sm:$0xff]  ;;  %v5238_v31 = vld [vmem:[%s7307_s12 + $0x130] sm:$0xff] }
 0x3c9   : >> { %5235 = vst [vmem:[%s7303_s29 + $0x120] sm:$0xff] %v5234_v57  ;;  %5237 = vst [vmem:[%s7303_s29 + $0x128] sm:$0xff] %v5236_v51  ;;  %v5240_v43 = vld [vmem:[%s7307_s12 + $0x138] sm:$0xff]  ;;  %v5242_v47 = vld [vmem:[%s7307_s12 + $0x140] sm:$0xff] }
 0x3ca   : >> { %5239 = vst [vmem:[%s7303_s29 + $0x130] sm:$0xff] %v5238_v31  ;;  %v5244_v62 = vld [vmem:[%s7307_s12 + $0x148] sm:$0xff]  ;;  %5241 = vst [vmem:[%s7303_s29 + $0x138] sm:$0xff] %v5240_v43  ;;  %v5246_v28 = vld [vmem:[%s7307_s12 + $0x150] sm:$0xff] }
 0x3cb   : >> { %5243 = vst [vmem:[%s7303_s29 + $0x140] sm:$0xff] %v5242_v47  ;;  %5245 = vst [vmem:[%s7303_s29 + $0x148] sm:$0xff] %v5244_v62  ;;  %v5248_v25 = vld [vmem:[%s7307_s12 + $0x158] sm:$0xff]  ;;  %v5250_v46 = vld [vmem:[%s7307_s12 + $0x160] sm:$0xff] }
 0x3cc   : >> { %5247 = vst [vmem:[%s7303_s29 + $0x150] sm:$0xff] %v5246_v28  ;;  %5249 = vst [vmem:[%s7303_s29 + $0x158] sm:$0xff] %v5248_v25  ;;  %v5252_v18 = vld [vmem:[%s7307_s12 + $0x168] sm:$0xff]  ;;  %v5254_v40 = vld [vmem:[%s7307_s12 + $0x170] sm:$0xff] }
 0x3cd   : >> { %5251 = vst [vmem:[%s7303_s29 + $0x160] sm:$0xff] %v5250_v46  ;;  %v5256_v21 = vld [vmem:[%s7307_s12 + $0x178] sm:$0xff]  ;;  %5253 = vst [vmem:[%s7303_s29 + $0x168] sm:$0xff] %v5252_v18  ;;  %v5258_v0 = vld [vmem:[%s7307_s12 + $0x180] sm:$0xff] }
 0x3ce   : >> { %5255 = vst [vmem:[%s7303_s29 + $0x170] sm:$0xff] %v5254_v40  ;;  %5257 = vst [vmem:[%s7303_s29 + $0x178] sm:$0xff] %v5256_v21  ;;  %v5260_v37 = vld [vmem:[%s7307_s12 + $0x188] sm:$0xff]  ;;  %v5262_v13 = vld [vmem:[%s7307_s12 + $0x190] sm:$0xff] }
 0x3cf   : >> { %5259 = vst [vmem:[%s7303_s29 + $0x180] sm:$0xff] %v5258_v0  ;;  %5261 = vst [vmem:[%s7303_s29 + $0x188] sm:$0xff] %v5260_v37  ;;  %v5264_v39 = vld [vmem:[%s7307_s12 + $0x198] sm:$0xff]  ;;  %v5266_v5 = vld [vmem:[%s7307_s12 + $0x1a0] sm:$0xff] }
 0x3d0   : >> { %5263 = vst [vmem:[%s7303_s29 + $0x190] sm:$0xff] %v5262_v13  ;;  %v5268_v11 = vld [vmem:[%s7307_s12 + $0x1a8] sm:$0xff]  ;;  %5265 = vst [vmem:[%s7303_s29 + $0x198] sm:$0xff] %v5264_v39  ;;  %v5270_v30 = vld [vmem:[%s7307_s12 + $0x1b0] sm:$0xff] }
 0x3d1   : >> { %5267 = vst [vmem:[%s7303_s29 + $0x1a0] sm:$0xff] %v5266_v5  ;;  %5269 = vst [vmem:[%s7303_s29 + $0x1a8] sm:$0xff] %v5268_v11  ;;  %v5272_v23 = vld [vmem:[%s7307_s12 + $0x1b8] sm:$0xff]  ;;  %v5274_v36 = vld [vmem:[%s7307_s12 + $0x1c0] sm:$0xff] }
 0x3d2   : >> { %5271 = vst [vmem:[%s7303_s29 + $0x1b0] sm:$0xff] %v5270_v30  ;;  %5273 = vst [vmem:[%s7303_s29 + $0x1b8] sm:$0xff] %v5272_v23  ;;  %v5276_v60 = vld [vmem:[%s7307_s12 + $0x1c8] sm:$0xff]  ;;  %v5278_v42 = vld [vmem:[%s7307_s12 + $0x1d0] sm:$0xff]  ;;  %5158 = sbr.rel (!%p5155_p12) target bundleno = 950 (0x3b6), region = 138 }
 0x3d3   : >> { %5275 = vst [vmem:[%s7303_s29 + $0x1c0] sm:$0xff] %v5274_v36  ;;  %v5280_v16 = vld [vmem:[%s7307_s12 + $0x1d8] sm:$0xff]  ;;  %5277 = vst [vmem:[%s7303_s29 + $0x1c8] sm:$0xff] %v5276_v60  ;;  %v5282_v27 = vld [vmem:[%s7307_s12 + $0x1e0] sm:$0xff] }
 0x3d4   : >> { %5279 = vst [vmem:[%s7303_s29 + $0x1d0] sm:$0xff] %v5278_v42  ;;  %5281 = vst [vmem:[%s7303_s29 + $0x1d8] sm:$0xff] %v5280_v16  ;;  %v5284_v7 = vld [vmem:[%s7307_s12 + $0x1e8] sm:$0xff]  ;;  %v5286_v48 = vld [vmem:[%s7307_s12 + $0x1f0] sm:$0xff] }
 0x3d5   : >> { %5283 = vst [vmem:[%s7303_s29 + $0x1e0] sm:$0xff] %v5282_v27  ;;  %5285 = vst [vmem:[%s7303_s29 + $0x1e8] sm:$0xff] %v5284_v7  ;;  %v5288_v58 = vld [vmem:[%s7307_s12 + $0x1f8] sm:$0xff]  ;;  %s9397_s12 = smov %s9222_s19 }
 0x3d6   : >> { %5287 = vst [vmem:[%s7303_s29 + $0x1f0] sm:$0xff] %v5286_v48  ;;  %5289 = vst [vmem:[%s7303_s29 + $0x1f8] sm:$0xff] %v5288_v58  ;;  %s9396_s29 = smov %s9225_s20 }
 0x3d7 PF: > { %s9330_s21 = sand.u32 63, %s9403_s24   ;;  %s5922_s22 = sshll.u32 %s9155_s14, 9 }
 0x3d8   : > { %s5301_s23 = scalar_lea.vmem %s8545_s26, %s5922_s22 [#allocation4]   ;;  %s5303_s0 = scalar_lea.vmem %s9149_s10, %s5922_s22  }
 0x3d9   : > { %p5916_p13 = scmp.le.s32.totalorder %s9330_s21, 0 }
 0x3da   : > { %s7317_s25 = smov (!%p5916_p13), %s5303_s0   ;;  %s7321_s28 = smov (!%p5916_p13), %s5301_s23  }
 0x3db   : > { %5394 = sbr.rel (%p5916_p13) target bundleno = 1000 (0x3e8), region = 143  ;;  %s7325_s9 = smov (!%p5916_p13), 0  }
 0x3dc   : > { %s7329_s13 = smov (!%p5916_p13), 0  }
 0x3e0 LB: >> { %v5313_v61 = vld [vmem:[%s7323_s28] sm:$0xff]  ;;  %s5315_s24 = sadd.s32 1, %s7327_s9  ;;  %s5307_s13 = sadd.s32 1, %s7331_s13   ;;  %s7331_s13 = sphi %s7329_s13, %s5307_s13   ;;  %s7327_s9 = sphi %s7325_s9, %s7326_s9   ;;  %s7323_s28 = sphi %s7321_s28, %s5320_s28   ;;  %s7319_s25 = sphi %s7317_s25, %s5321_s25  }
 0x3e1   : >> { %5314 = vst [vmem:[%s7319_s25] sm:$0xff] %v5313_v61  ;;  %p5316_p0 = scmp.ge.s32.totalorder %s5315_s24, %s9330_s21  ;;  %p5306_p1 = scmp.ge.s32.totalorder %s5307_s13, %s9330_s21 }
 0x3e3   : >> { %s9407_s24 = smov (%p5316_p0, %s5315_s24), 0  ;;  %5309 = sbr.rel (!%p5306_p1) target bundleno = 992 (0x3e0), region = 149 }
 0x3e4   : >> { %s5917_s26 = sshll.u32 %s9407_s24, 3  ;;  %s7326_s9 = smov %s9407_s24  }
 0x3e5   : >> { %s5320_s28 = scalar_lea.vmem %s5301_s23, %s5917_s26 [#allocation4]   ;;  %s5321_s25 = scalar_lea.vmem %s5303_s0, %s5917_s26  }
 0x3e8 PF: > { %p16_p2 = scmp.ge.s32.totalorder %s7393_s30, 4   ;;  %s9399_s26 = smov %s7295_s27 }
 0x3e9   : > { %s9400_s27 = smov %s7401_s11  ;;  %s9401_s28 = smov %s7393_s30 }
 0x3ea   :  { %18 = sbr.rel (!%p16_p2) target bundleno = 2 (0x2), region = 160 }

</bundles_post_ra>
